<compile_context>
chip_gen: v6e
topology: v6e:2x2x1
jax: 0.10.0
libtpu: 0.0.40
codegen_flags: <defaults>
</compile_context>

<pallas_src>
import functools
import math

import jax
import jax.numpy as jnp
from jax import lax
from jax.experimental import pallas as pl
from jax.experimental.pallas import tpu as pltpu

# ----------------------- hyperparameters (small, synthetic) -----------------------
EMB_SIZE = 256                 # fixed by MidiFormer (self.emb_size = 256)
GROUPS = 8                     # EMA(channels=256, factor=8)
CG = EMB_SIZE // GROUPS        # 32 channels per group
D_MODEL = 32                   # formerConfig.hidden_size
N_HEADS = 2
HEAD_DIM = D_MODEL // N_HEADS
D_FF = 4 * D_MODEL
SLEN = 8
MAX_LEN = SLEN + 1             # sequence length after prepending special token
LPAD = 16                      # former sequence length padded to the sublane tile
N_TOKEN = 16
E_LAMBDA = 1e-4                # Simam e_lambda
GN_EPS = 1e-5                  # nn.GroupNorm default eps
LN_EPS = 1e-12                 # BERT LayerNorm eps
SQRT_EMB = math.sqrt(EMB_SIZE)

# wA (bf16, 256 lanes) row offsets
A_EMB, A_C1 = 0, N_TOKEN
A_C3A, A_C3B, A_C3C = A_C1 + EMB_SIZE, A_C1 + 2 * EMB_SIZE, A_C1 + 3 * EMB_SIZE
A_GS = A_C1 + 4 * EMB_SIZE
N_WA = A_GS + EMB_SIZE
# wB (f32, 128 lanes) row offsets
B_QKVO, B_W1, B_BIAS, B_B1 = 0, D_MODEL, 2 * D_MODEL, 2 * D_MODEL + 1
N_WB = 2 * D_MODEL + 2
# wC (f32, 32 lanes) row offsets
C_INW, C_W2, C_POS = 0, EMB_SIZE, EMB_SIZE + D_FF
C_TOK = C_POS + LPAD
C_SP0 = C_TOK + 1
C_LNE_G, C_LNE_B = C_SP0 + 2, C_SP0 + 3
C_INB = C_SP0 + 4
C_LN1_G, C_LN1_B = C_SP0 + 5, C_SP0 + 6
C_B2 = C_SP0 + 7
C_LN2_G, C_LN2_B = C_SP0 + 8, C_SP0 + 9
N_WC = C_SP0 + 10


# ======================= fused MidiFormer forward kernel ==========================
def midiformer_kernel(special_val,
                      ids_ref, amask_ref, wA_ref, erows_ref, wB_ref, wC_ref,
                      out_ref):
    f32, bf16 = jnp.float32, jnp.bfloat16
    TB = ids_ref.shape[0]                      # folded batch per grid step (static)
    N = TB * SLEN                              # rows for the 256-wide (EMA) stage
    L = TB * LPAD                              # rows for the former stage

    # ---- embedding lookup: one-hot @ table (channels land on the lane axis) ----
    ids = ids_ref[...]                                            # (TB, S, 1) int32
    tok_iota = lax.broadcasted_iota(jnp.int32, (TB, SLEN, N_TOKEN), 2)
    onehot = (tok_iota == ids).astype(bf16).reshape(N, N_TOKEN)
    wemb = wA_ref[A_EMB:A_EMB + N_TOKEN, :]
    x = jnp.dot(onehot, wemb, preferred_element_type=f32) * SQRT_EMB   # (N, 256)

    # ---- SimAM: per-(batch, channel) statistics over the S sublanes ----
    x3 = x.reshape(TB, SLEN, EMB_SIZE)
    n = SLEN * 1 - 1
    mu = jnp.mean(x3, axis=1, keepdims=True)
    d = (x3 - mu) ** 2
    y = d / (4.0 * (jnp.sum(d, axis=1, keepdims=True) / n + E_LAMBDA)) + 0.5
    gx3 = x3 * jax.nn.sigmoid(y)                                  # (TB, S, 256)
    gx = gx3.reshape(N, EMB_SIZE)

    # ---- EMA: all 8 groups at once via block-diagonal weights on the lane axis ----
    w1bT = wA_ref[A_C1:A_C1 + EMB_SIZE, :]               # conv1x1^T block-diag (bf16)
    w3a = wA_ref[A_C3A:A_C3A + EMB_SIZE, :]              # conv3x3 taps prev / mid / next
    w3b = wA_ref[A_C3B:A_C3B + EMB_SIZE, :]
    w3c = wA_ref[A_C3C:A_C3C + EMB_SIZE, :]
    gsum = wA_ref[A_GS:A_GS + EMB_SIZE, :]               # block-of-ones group-sum matrix
    c1b, c3b = erows_ref[0:1, :], erows_ref[1:2, :]
    gng, gnb = erows_ref[2:3, :], erows_ref[3:4, :]

    # conv1x1 on cat([x_h, x_w]): one stacked (N+TB, 256) @ (256, 256) matmul
    xw = jnp.mean(gx3, axis=1)                           # pool over H -> (TB, 256)
    stacked = jnp.concatenate([gx, xw], axis=0).astype(bf16)
    hw = jnp.dot(stacked, w1bT, preferred_element_type=f32) + c1b
    xh2 = hw[:N, :]                                      # (N, 256)
    xw2 = hw[N:, :]                                      # (TB, 256)
    t3 = (gx3 * jax.nn.sigmoid(xh2).reshape(TB, SLEN, EMB_SIZE)
          * jax.nn.sigmoid(xw2)[:, None, :])

    # GroupNorm(CG, CG): per-(batch, channel) normalization over S
    tm = jnp.mean(t3, axis=1, keepdims=True)
    tv = jnp.mean((t3 - tm) ** 2, axis=1, keepdims=True)
    x1_3 = gng * (t3 - tm) * lax.rsqrt(tv + GN_EPS) + gnb          # (TB, S, 256)

    # conv3x3 on (C, S, 1) with padding=1: only the kw=1 column touches data ->
    # three accumulated dots on zero-padded shifted copies (no 768-wide concat).
    zrow = jnp.zeros((TB, 1, EMB_SIZE), f32)
    gx_prev = jnp.concatenate([zrow, gx3[:, :SLEN - 1, :]], axis=1).reshape(N, EMB_SIZE)
    gx_next = jnp.concatenate([gx3[:, 1:, :], zrow], axis=1).reshape(N, EMB_SIZE)
    x2 = (jnp.dot(gx_prev.astype(bf16), w3a, preferred_element_type=f32)
          + jnp.dot(gx.astype(bf16), w3b, preferred_element_type=f32)
          + jnp.dot(gx_next.astype(bf16), w3c, preferred_element_type=f32) + c3b)
    x2_3 = x2.reshape(TB, SLEN, EMB_SIZE)

    def group_softmax(r):                                # r: (TB, 256)
        # softmax over the 32 channels inside each group; subtracting the per-row
        # max (one constant per row) leaves every per-group softmax unchanged.
        e = jnp.exp(r - jnp.max(r, axis=1, keepdims=True))
        denom = jnp.dot(e.astype(bf16), gsum, preferred_element_type=f32)
        return e * pl.reciprocal(denom, approx=True)

    a1 = group_softmax(jnp.mean(x1_3, axis=1))           # (TB, 256)
    a2 = group_softmax(jnp.mean(x2_3, axis=1))
    # fused cross-attention weight: dot is linear in its LHS -> one gsum matmul
    m3 = x2_3 * a1[:, None, :] + x1_3 * a2[:, None, :]
    w = jnp.dot(m3.reshape(N, EMB_SIZE).astype(bf16), gsum,
                preferred_element_type=f32)              # (N, 256)
    y_ema = gx * jax.nn.sigmoid(w)

    # ---- in_linear + prepend special-token embedding (padded to LPAD rows) ----
    in_w = wC_ref[C_INW:C_INW + EMB_SIZE, :]             # (256, 32)
    row = lambda i: wC_ref[i:i + 1, :]                   # (1, 32)
    emb_lin = jnp.dot(y_ema, in_w, preferred_element_type=f32) + row(C_INB)  # (N, 32)
    sp = wC_ref[C_SP0 + special_val:C_SP0 + special_val + 1, :]   # mode is static
    sp3 = jnp.broadcast_to(sp.reshape(1, 1, D_MODEL), (TB, 1, D_MODEL))
    h_in = jnp.concatenate(
        [sp3, emb_lin.reshape(TB, SLEN, D_MODEL),
         jnp.zeros((TB, LPAD - MAX_LEN, D_MODEL), f32)], axis=1)  # (TB, 16, 32)

    # ---- synthetic 1-layer BERT-style FormerModel ----
    def ln(v, gi, bi):                                   # LayerNorm over lanes (D)
        mrow = jnp.mean(v, axis=-1, keepdims=True)
        c = v - mrow
        var = jnp.mean(c * c, axis=-1, keepdims=True)
        return row(gi) * c * lax.rsqrt(var + LN_EPS) + row(bi)

    pos = wC_ref[C_POS:C_POS + LPAD, :]                  # (16, 32), rows >= 9 are zero
    h0 = ln(h_in + pos + row(C_TOK), C_LNE_G, C_LNE_B)   # (TB, 16, 32) embedding output
    h0_2d = h0.reshape(L, D_MODEL)

    # fused QKV(+O) projection: one (L, 32) @ (32, 128) dot, then lane sub-views
    wqkvo = wB_ref[B_QKVO:B_QKVO + D_MODEL, :]           # [wq|wk|wv|wo] (32, 128)
    bqkvo = wB_ref[B_BIAS:B_BIAS + 1, :]                 # [bq|bk|bv|bo] (1, 128)
    qkv = jnp.dot(h0_2d, wqkvo, preferred_element_type=f32) + bqkvo   # (L, 128)
    q = qkv[:, 0:D_MODEL].reshape(TB, LPAD, D_MODEL)
    k = qkv[:, D_MODEL:2 * D_MODEL].reshape(TB, LPAD, D_MODEL)
    v = qkv[:, 2 * D_MODEL:3 * D_MODEL].reshape(TB, LPAD, D_MODEL)
    wo = wqkvo[:, 3 * D_MODEL:4 * D_MODEL]               # (32, 32)
    bo = bqkvo[:, 3 * D_MODEL:4 * D_MODEL]               # (1, 32)

    # additive attention mask: [special token = 1, user mask, padded keys masked]
    amask = amask_ref[...]                               # (TB, 1, S)
    neg = jnp.concatenate(
        [jnp.zeros((TB, 1, 1), f32), (1.0 - amask) * (-10000.0),
         jnp.full((TB, 1, LPAD - MAX_LEN), -10000.0, f32)], axis=2)   # (TB, 1, 16)

    lane = lax.broadcasted_iota(jnp.int32, (1, 1, D_MODEL), 2)
    ctx = jnp.zeros((TB, LPAD, D_MODEL), f32)
    inv_sqrt_d = 1.0 / math.sqrt(HEAD_DIM)
    for h in range(N_HEADS):
        hm = ((lane >= h * HEAD_DIM) & (lane < (h + 1) * HEAD_DIM)).astype(f32)
        s = jnp.einsum('bqd,bkd->bqk', q * hm, k,
                       preferred_element_type=f32) * inv_sqrt_d + neg
        p = jnp.exp(s - jnp.max(s, axis=-1, keepdims=True))
        p = p * pl.reciprocal(jnp.sum(p, axis=-1, keepdims=True), approx=True)
        ctx = ctx + jnp.einsum('bqk,bkd->bqd', p, v * hm,
                               preferred_element_type=f32)

    attn = jnp.dot(ctx.reshape(L, D_MODEL), wo, preferred_element_type=f32) + bo
    h1 = ln(h0 + attn.reshape(TB, LPAD, D_MODEL), C_LN1_G, C_LN1_B)

    # TODO(synk): HF BERT uses exact (erf) GELU; tanh approximation kept here.
    w1 = wB_ref[B_W1:B_W1 + D_MODEL, :]                  # (32, 128)
    b1 = wB_ref[B_B1:B_B1 + 1, :]                        # (1, 128)
    w2 = wC_ref[C_W2:C_W2 + D_FF, :]                     # (128, 32)
    ff1 = jnp.dot(h1.reshape(L, D_MODEL), w1, preferred_element_type=f32) + b1
    ff = jnp.dot(jax.nn.gelu(ff1, approximate=True), w2,
                 preferred_element_type=f32) + row(C_B2)
    h2 = ln(h1 + ff.reshape(TB, LPAD, D_MODEL), C_LN2_G, C_LN2_B)

    # ---- lane-dense packed output: [embedding output | last hidden | zero pad] ----
    pad = jnp.zeros((TB, MAX_LEN, 2 * D_MODEL), f32)
    out_ref[...] = jnp.concatenate(
        [h0[:, :MAX_LEN, :], h2[:, :MAX_LEN, :], pad], axis=-1)   # (TB, 9, 128)


# =============================== parameters =======================================
def init_params(key):
    ks = iter(jax.random.split(key, 16))
    nrm = lambda shape, s=0.02: jax.random.normal(next(ks), shape, jnp.float32) * s
    zeros = lambda s: jnp.zeros(s, jnp.float32)
    ones = lambda s: jnp.ones(s, jnp.float32)

    # --- raw MidiFormer parameters ---
    word_emb = nrm((N_TOKEN, EMB_SIZE), 1.0)       # nn.Embedding(n_token, 256), N(0,1)
    former_word_emb = nrm((2, D_MODEL))            # former word_embeddings rows 0/1
    c1w, c1b = nrm((CG, CG)), zeros((CG,))         # EMA conv1x1 (out, in)
    conv3, c3b = nrm((CG, CG, 3, 3)), zeros((CG,)) # EMA conv3x3; W=1 -> kw=1 column
    k0, k1, k2 = conv3[:, :, 0, 1], conv3[:, :, 1, 1], conv3[:, :, 2, 1]
    gng, gnb = ones((CG,)), zeros((CG,))           # EMA GroupNorm
    in_w, in_b = nrm((EMB_SIZE, D_MODEL)), zeros((1, D_MODEL))   # y = x @ W + b
    pos, tok = nrm((MAX_LEN, D_MODEL)), nrm((1, D_MODEL))
    wq, wk = nrm((D_MODEL, D_MODEL)), nrm((D_MODEL, D_MODEL))
    wv, wo = nrm((D_MODEL, D_MODEL)), nrm((D_MODEL, D_MODEL))
    w1, b1 = nrm((D_MODEL, D_FF)), zeros((1, D_FF))
    w2 = nrm((D_FF, D_MODEL))

    # --- pack into a handful of lane-dense slabs (few DMAs per kernel launch) ---
    eye = jnp.eye(GROUPS, dtype=jnp.float32)
    bdiag = lambda m: jnp.kron(eye, m)             # repeat the shared group weight 8x
    wA = jnp.concatenate([
        word_emb,                                  # [0, 16)
        bdiag(c1w.T),                              # [16, 272)   conv1x1^T
        bdiag(k0.T), bdiag(k1.T), bdiag(k2.T),     # [272, 1040) conv3x3 taps
        bdiag(jnp.ones((CG, CG), jnp.float32)),    # [1040, 1296) group-sum
    ], axis=0).astype(jnp.bfloat16)                # (1296, 256) bf16

    erows = jnp.stack([jnp.tile(c1b, GROUPS), jnp.tile(c3b, GROUPS),
                       jnp.tile(gng, GROUPS), jnp.tile(gnb, GROUPS)], axis=0)

    wB = jnp.concatenate([
        jnp.concatenate([wq, wk, wv, wo], axis=1), # [0, 32)  [wq|wk|wv|wo]
        w1,                                        # [32, 64)
        zeros((1, 4 * D_MODEL)),                   # 64       [bq|bk|bv|bo]
        b1,                                        # 65
    ], axis=0)                                     # (66, 128) f32

    pos_pad = jnp.concatenate([pos, zeros((LPAD - MAX_LEN, D_MODEL))], axis=0)
    wC = jnp.concatenate([
        in_w,                                      # [0, 256)
        w2,                                        # [256, 384)
        pos_pad,                                   # [384, 400)
        tok,                                       # 400
        former_word_emb,                           # 401, 402 special embeddings 0/1
        ones((1, D_MODEL)), zeros((1, D_MODEL)),   # 403, 404 embedding LayerNorm
        in_b,                                      # 405
        ones((1, D_MODEL)), zeros((1, D_MODEL)),   # 406, 407 post-attn LayerNorm
        zeros((1, D_MODEL)),                       # 408      b2
        ones((1, D_MODEL)), zeros((1, D_MODEL)),   # 409, 410 post-FFN LayerNorm
    ], axis=0)                                     # (411, 32) f32

    return dict(wA=wA, erows=erows, wB=wB, wC=wC)


# ============================ MidiFormer.forward ===================================
def midiformer_forward(params, input_id, attn_mask, mode='mlm', tb_max=64):
    """Returns (last_hidden_state, hidden_states) like output_hidden_states=True."""
    bs, slen = input_id.shape
    assert slen == SLEN
    special_val = 0 if mode == 'mlm' else 1

    # Batch folding: TB sequences per grid step.  TB=64 keeps double-buffered
    # blocks + ~10 live (TB*8, 256) f32 intermediates well inside v7x's scoped
    # VMEM; on v6e/v5e tb_max can be raised (re-sweep per the biggest-tile rule).
    TB = min(bs, tb_max)
    bs_pad = -(-bs // TB) * TB
    if bs_pad != bs:
        padn = bs_pad - bs
        input_id = jnp.concatenate(
            [input_id, jnp.zeros((padn, slen), input_id.dtype)], axis=0)
        attn_mask = jnp.concatenate(
            [attn_mask, jnp.zeros((padn, slen), attn_mask.dtype)], axis=0)
    grid_b = bs_pad // TB

    ids3d = input_id.astype(jnp.int32).reshape(bs_pad, SLEN, 1)
    amask3d = attn_mask.astype(jnp.float32).reshape(bs_pad, 1, SLEN)

    const = lambda a: pl.BlockSpec(a.shape, lambda b: (0, 0))
    packed = pl.pallas_call(
        functools.partial(midiformer_kernel, special_val),
        out_shape=jax.ShapeDtypeStruct((bs_pad, MAX_LEN, 4 * D_MODEL), jnp.float32),
        grid=(grid_b,),
        in_specs=[pl.BlockSpec((TB, SLEN, 1), lambda b: (b, 0, 0)),   # input ids
                  pl.BlockSpec((TB, 1, SLEN), lambda b: (b, 0, 0)),   # attention mask
                  const(params['wA']),        # bf16 embedding table + EMA matrices
                  const(params['erows']),     # EMA bias / GroupNorm rows
                  const(params['wB']),        # 128-lane former weights
                  const(params['wC'])],       # 32-lane former weights / rows
        out_specs=pl.BlockSpec((TB, MAX_LEN, 4 * D_MODEL), lambda b: (b, 0, 0)),
        compiler_params=pltpu.CompilerParams(
            dimension_semantics=("parallel",)),   # batch axis -> both TCs
    )(ids3d, amask3d, params['wA'], params['erows'], params['wB'], params['wC'])

    emb_out = packed[:bs, :, 0:D_MODEL]
    last_hidden = packed[:bs, :, D_MODEL:2 * D_MODEL]
    hidden_states = (emb_out, last_hidden)        # output_hidden_states=True
    return last_hidden, hidden_states


# ==================================== main =========================================
if __name__ == "__main__":
    # vocab with the required special tokens
    e2w = {f'Tok_{i}': i for i in range(N_TOKEN - 2)}
    e2w['Pad_None'] = N_TOKEN - 2
    e2w['Mask_None'] = N_TOKEN - 1
    w2e = {v: k for k, v in e2w.items()}

    key = jax.random.PRNGKey(0)
    pkey, dkey = jax.random.split(key)
    params = init_params(pkey)

    bs, slen = 2, SLEN
    input_id = jax.random.randint(dkey, (bs, slen), 0, N_TOKEN, dtype=jnp.int32)
    attn_mask = jnp.ones((bs, slen), jnp.float32)

    last_hidden, hidden_states = midiformer_forward(params, input_id, attn_mask,
                                                    mode='mlm')
    jax.block_until_ready(last_hidden)

    assert last_hidden.shape == (bs, slen + 1, D_MODEL)
    assert hidden_states[0].shape == (bs, slen + 1, D_MODEL)
    assert bool(jnp.all(jnp.isfinite(last_hidden)))
    print("KERNEL_OK")
</pallas_src>

<mosaic_0001>
module attributes {stable_mosaic.version = 11 : i64} {
  func.func @midiformer_kernel(%arg0: i32, %arg1: memref<2x8x1xi32, #tpu.memory_space<vmem>>, %arg2: memref<2x1x8xf32, #tpu.memory_space<vmem>>, %arg3: memref<1296x256xbf16, #tpu.memory_space<vmem>>, %arg4: memref<4x256xf32, #tpu.memory_space<vmem>>, %arg5: memref<66x128xf32, #tpu.memory_space<vmem>>, %arg6: memref<411x32xf32, #tpu.memory_space<vmem>>, %arg7: memref<2x9x128xf32, #tpu.memory_space<vmem>>) attributes {dimension_semantics = [#tpu.dimension_semantics<parallel>], iteration_bounds = array<i64: 1>, scalar_prefetch = 0 : i64, scratch_operands = 0 : i64, tpu.core_type = #tpu.core_type<tc>, window_params = [{transform_indices = @transform_0, window_bounds = array<i64: 2, 8, 1>}, {transform_indices = @transform_1, window_bounds = array<i64: 2, 1, 8>}, {pipeline_mode = #tpu.pipeline_mode<synchronous>, transform_indices = @transform_2, window_bounds = array<i64: 1296, 256>}, {pipeline_mode = #tpu.pipeline_mode<synchronous>, transform_indices = @transform_3, window_bounds = array<i64: 4, 256>}, {pipeline_mode = #tpu.pipeline_mode<synchronous>, transform_indices = @transform_4, window_bounds = array<i64: 66, 128>}, {pipeline_mode = #tpu.pipeline_mode<synchronous>, transform_indices = @transform_5, window_bounds = array<i64: 411, 32>}, {transform_indices = @transform_6, window_bounds = array<i64: 2, 9, 128>}]} {
    %c0 = arith.constant 0 : index
    %c0_0 = arith.constant 0 : index
    %c0_1 = arith.constant 0 : index
    %0 = vector.load %arg1[%c0, %c0_0, %c0_1] : memref<2x8x1xi32, #tpu.memory_space<vmem>>, vector<2x8x1xi32>
    %1 = tpu.iota {dimensions = array<i32: 2>} : vector<2x8x16xi32>
    %2 = vector.broadcast %0 : vector<2x8x1xi32> to vector<2x8x16xi32>
    %3 = arith.cmpi eq, %1, %2 : vector<2x8x16xi32>
    %4 = arith.extui %3 : vector<2x8x16xi1> to vector<2x8x16xi32>
    %5 = arith.sitofp %4 : vector<2x8x16xi32> to vector<2x8x16xf32>
    %6 = arith.truncf %5 : vector<2x8x16xf32> to vector<2x8x16xbf16>
    %7 = vector.shape_cast %6 : vector<2x8x16xbf16> to vector<16x16xbf16>
    %c0_2 = arith.constant 0 : index
    %c0_3 = arith.constant 0 : index
    %8 = vector.load %arg3[%c0_2, %c0_3] : memref<1296x256xbf16, #tpu.memory_space<vmem>>, vector<16x256xbf16>
    %cst = arith.constant dense<0.000000e+00> : vector<16x256xf32>
    %9 = tpu.matmul %7, %8, %cst {dimension_numbers = #tpu.dot_dimension_numbers<[1], [0], [0], [1], [0, 0, 1, 1], [], []>} : vector<16x16xbf16>, vector<16x256xbf16>, vector<16x256xf32> -> vector<16x256xf32>
    %cst_4 = arith.constant 1.600000e+01 : f32
    %10 = vector.broadcast %cst_4 : f32 to vector<16x256xf32>
    %11 = arith.mulf %9, %10 : vector<16x256xf32>
    %12 = vector.shape_cast %11 : vector<16x256xf32> to vector<2x8x256xf32>
    %cst_5 = arith.constant dense<0.000000e+00> : vector<2x256xf32>
    %13 = vector.multi_reduction <add>, %12, %cst_5 [1] : vector<2x8x256xf32> to vector<2x256xf32>
    %14 = vector.shape_cast %13 : vector<2x256xf32> to vector<2x1x256xf32>
    %cst_6 = arith.constant 8.000000e+00 : f32
    %15 = vector.broadcast %cst_6 : f32 to vector<2x1x256xf32>
    %16 = arith.divf %14, %15 : vector<2x1x256xf32>
    %17 = vector.broadcast %16 : vector<2x1x256xf32> to vector<2x8x256xf32>
    %18 = arith.subf %12, %17 : vector<2x8x256xf32>
    %19 = arith.mulf %18, %18 : vector<2x8x256xf32>
    %cst_7 = arith.constant dense<0.000000e+00> : vector<2x256xf32>
    %20 = vector.multi_reduction <add>, %19, %cst_7 [1] : vector<2x8x256xf32> to vector<2x256xf32>
    %21 = vector.shape_cast %20 : vector<2x256xf32> to vector<2x1x256xf32>
    %cst_8 = arith.constant 7.000000e+00 : f32
    %22 = vector.broadcast %cst_8 : f32 to vector<2x1x256xf32>
    %23 = arith.divf %21, %22 : vector<2x1x256xf32>
    %cst_9 = arith.constant 9.99999974E-5 : f32
    %24 = vector.broadcast %cst_9 : f32 to vector<2x1x256xf32>
    %25 = arith.addf %23, %24 : vector<2x1x256xf32>
    %cst_10 = arith.constant 4.000000e+00 : f32
    %26 = vector.broadcast %cst_10 : f32 to vector<2x1x256xf32>
    %27 = arith.mulf %26, %25 : vector<2x1x256xf32>
    %28 = vector.broadcast %27 : vector<2x1x256xf32> to vector<2x8x256xf32>
    %29 = arith.divf %19, %28 : vector<2x8x256xf32>
    %cst_11 = arith.constant 5.000000e-01 : f32
    %30 = vector.broadcast %cst_11 : f32 to vector<2x8x256xf32>
    %31 = arith.addf %29, %30 : vector<2x8x256xf32>
    %32 = arith.negf %31 : vector<2x8x256xf32>
    %33 = math.exp %32 : vector<2x8x256xf32>
    %cst_12 = arith.constant 1.000000e+00 : f32
    %34 = vector.broadcast %cst_12 : f32 to vector<2x8x256xf32>
    %35 = arith.addf %34, %33 : vector<2x8x256xf32>
    %36 = arith.divf %34, %35 : vector<2x8x256xf32>
    %37 = arith.mulf %12, %36 : vector<2x8x256xf32>
    %38 = vector.shape_cast %37 : vector<2x8x256xf32> to vector<16x256xf32>
    %c16 = arith.constant 16 : index
    %c0_13 = arith.constant 0 : index
    %39 = vector.load %arg3[%c16, %c0_13] : memref<1296x256xbf16, #tpu.memory_space<vmem>>, vector<256x256xbf16>
    %c272 = arith.constant 272 : index
    %c0_14 = arith.constant 0 : index
    %40 = vector.load %arg3[%c272, %c0_14] : memref<1296x256xbf16, #tpu.memory_space<vmem>>, vector<256x256xbf16>
    %c528 = arith.constant 528 : index
    %c0_15 = arith.constant 0 : index
    %41 = vector.load %arg3[%c528, %c0_15] : memref<1296x256xbf16, #tpu.memory_space<vmem>>, vector<256x256xbf16>
    %c784 = arith.constant 784 : index
    %c0_16 = arith.constant 0 : index
    %42 = vector.load %arg3[%c784, %c0_16] : memref<1296x256xbf16, #tpu.memory_space<vmem>>, vector<256x256xbf16>
    %c1040 = arith.constant 1040 : index
    %c0_17 = arith.constant 0 : index
    %43 = vector.load %arg3[%c1040, %c0_17] : memref<1296x256xbf16, #tpu.memory_space<vmem>>, vector<256x256xbf16>
    %c0_18 = arith.constant 0 : index
    %c0_19 = arith.constant 0 : index
    %44 = vector.load %arg4[%c0_18, %c0_19] : memref<4x256xf32, #tpu.memory_space<vmem>>, vector<1x256xf32>
    %c1 = arith.constant 1 : index
    %c0_20 = arith.constant 0 : index
    %45 = vector.load %arg4[%c1, %c0_20] : memref<4x256xf32, #tpu.memory_space<vmem>>, vector<1x256xf32>
    %c2 = arith.constant 2 : index
    %c0_21 = arith.constant 0 : index
    %46 = vector.load %arg4[%c2, %c0_21] : memref<4x256xf32, #tpu.memory_space<vmem>>, vector<1x256xf32>
    %c3 = arith.constant 3 : index
    %c0_22 = arith.constant 0 : index
    %47 = vector.load %arg4[%c3, %c0_22] : memref<4x256xf32, #tpu.memory_space<vmem>>, vector<1x256xf32>
    %cst_23 = arith.constant dense<0.000000e+00> : vector<2x256xf32>
    %48 = vector.multi_reduction <add>, %37, %cst_23 [1] : vector<2x8x256xf32> to vector<2x256xf32>
    %cst_24 = arith.constant 8.000000e+00 : f32
    %49 = vector.broadcast %cst_24 : f32 to vector<2x256xf32>
    %50 = arith.divf %48, %49 : vector<2x256xf32>
    %51 = tpu.concatenate %38, %50 in 0 : vector<16x256xf32>, vector<2x256xf32> -> vector<18x256xf32>
    %52 = arith.truncf %51 : vector<18x256xf32> to vector<18x256xbf16>
    %cst_25 = arith.constant dense<0.000000e+00> : vector<18x256xf32>
    %53 = tpu.matmul %52, %39, %cst_25 {dimension_numbers = #tpu.dot_dimension_numbers<[1], [0], [0], [1], [0, 0, 1, 1], [], []>} : vector<18x256xbf16>, vector<256x256xbf16>, vector<18x256xf32> -> vector<18x256xf32>
    %54 = vector.broadcast %44 : vector<1x256xf32> to vector<18x256xf32>
    %55 = arith.addf %53, %54 : vector<18x256xf32>
    %56 = vector.extract_strided_slice %55 {offsets = [0, 0], sizes = [16, 256], strides = [1, 1]} : vector<18x256xf32> to vector<16x256xf32>
    %57 = vector.extract_strided_slice %55 {offsets = [16, 0], sizes = [2, 256], strides = [1, 1]} : vector<18x256xf32> to vector<2x256xf32>
    %58 = arith.negf %56 : vector<16x256xf32>
    %59 = math.exp %58 : vector<16x256xf32>
    %cst_26 = arith.constant 1.000000e+00 : f32
    %60 = vector.broadcast %cst_26 : f32 to vector<16x256xf32>
    %61 = arith.addf %60, %59 : vector<16x256xf32>
    %62 = arith.divf %60, %61 : vector<16x256xf32>
    %63 = vector.shape_cast %62 : vector<16x256xf32> to vector<2x8x256xf32>
    %64 = arith.mulf %37, %63 : vector<2x8x256xf32>
    %65 = arith.negf %57 : vector<2x256xf32>
    %66 = math.exp %65 : vector<2x256xf32>
    %cst_27 = arith.constant 1.000000e+00 : f32
    %67 = vector.broadcast %cst_27 : f32 to vector<2x256xf32>
    %68 = arith.addf %67, %66 : vector<2x256xf32>
    %69 = arith.divf %67, %68 : vector<2x256xf32>
    %70 = vector.shape_cast %69 : vector<2x256xf32> to vector<2x1x256xf32>
    %71 = vector.broadcast %70 : vector<2x1x256xf32> to vector<2x8x256xf32>
    %72 = arith.mulf %64, %71 : vector<2x8x256xf32>
    %cst_28 = arith.constant dense<0.000000e+00> : vector<2x256xf32>
    %73 = vector.multi_reduction <add>, %72, %cst_28 [1] : vector<2x8x256xf32> to vector<2x256xf32>
    %74 = vector.shape_cast %73 : vector<2x256xf32> to vector<2x1x256xf32>
    %cst_29 = arith.constant 8.000000e+00 : f32
    %75 = vector.broadcast %cst_29 : f32 to vector<2x1x256xf32>
    %76 = arith.divf %74, %75 : vector<2x1x256xf32>
    %77 = vector.broadcast %76 : vector<2x1x256xf32> to vector<2x8x256xf32>
    %78 = arith.subf %72, %77 : vector<2x8x256xf32>
    %79 = arith.mulf %78, %78 : vector<2x8x256xf32>
    %cst_30 = arith.constant dense<0.000000e+00> : vector<2x256xf32>
    %80 = vector.multi_reduction <add>, %79, %cst_30 [1] : vector<2x8x256xf32> to vector<2x256xf32>
    %81 = vector.shape_cast %80 : vector<2x256xf32> to vector<2x1x256xf32>
    %cst_31 = arith.constant 8.000000e+00 : f32
    %82 = vector.broadcast %cst_31 : f32 to vector<2x1x256xf32>
    %83 = arith.divf %81, %82 : vector<2x1x256xf32>
    %84 = vector.broadcast %76 : vector<2x1x256xf32> to vector<2x8x256xf32>
    %85 = arith.subf %72, %84 : vector<2x8x256xf32>
    %86 = vector.shape_cast %46 : vector<1x256xf32> to vector<1x1x256xf32>
    %87 = vector.broadcast %86 : vector<1x1x256xf32> to vector<2x8x256xf32>
    %88 = arith.mulf %87, %85 : vector<2x8x256xf32>
    %cst_32 = arith.constant 9.99999974E-6 : f32
    %89 = vector.broadcast %cst_32 : f32 to vector<2x1x256xf32>
    %90 = arith.addf %83, %89 : vector<2x1x256xf32>
    %91 = math.rsqrt %90 : vector<2x1x256xf32>
    %92 = vector.broadcast %91 : vector<2x1x256xf32> to vector<2x8x256xf32>
    %93 = arith.mulf %88, %92 : vector<2x8x256xf32>
    %94 = vector.shape_cast %47 : vector<1x256xf32> to vector<1x1x256xf32>
    %95 = vector.broadcast %94 : vector<1x1x256xf32> to vector<2x8x256xf32>
    %96 = arith.addf %93, %95 : vector<2x8x256xf32>
    %cst_33 = arith.constant 0.000000e+00 : f32
    %97 = vector.broadcast %cst_33 : f32 to vector<2x1x256xf32>
    %98 = vector.extract_strided_slice %37 {offsets = [0, 0, 0], sizes = [2, 7, 256], strides = [1, 1, 1]} : vector<2x8x256xf32> to vector<2x7x256xf32>
    %99 = tpu.concatenate %97, %98 in 1 : vector<2x1x256xf32>, vector<2x7x256xf32> -> vector<2x8x256xf32>
    %100 = vector.shape_cast %99 : vector<2x8x256xf32> to vector<16x256xf32>
    %101 = vector.extract_strided_slice %37 {offsets = [0, 1, 0], sizes = [2, 7, 256], strides = [1, 1, 1]} : vector<2x8x256xf32> to vector<2x7x256xf32>
    %102 = tpu.concatenate %101, %97 in 1 : vector<2x7x256xf32>, vector<2x1x256xf32> -> vector<2x8x256xf32>
    %103 = vector.shape_cast %102 : vector<2x8x256xf32> to vector<16x256xf32>
    %104 = arith.truncf %100 : vector<16x256xf32> to vector<16x256xbf16>
    %cst_34 = arith.constant dense<0.000000e+00> : vector<16x256xf32>
    %105 = tpu.matmul %104, %40, %cst_34 {dimension_numbers = #tpu.dot_dimension_numbers<[1], [0], [0], [1], [0, 0, 1, 1], [], []>} : vector<16x256xbf16>, vector<256x256xbf16>, vector<16x256xf32> -> vector<16x256xf32>
    %106 = arith.truncf %38 : vector<16x256xf32> to vector<16x256xbf16>
    %cst_35 = arith.constant dense<0.000000e+00> : vector<16x256xf32>
    %107 = tpu.matmul %106, %41, %cst_35 {dimension_numbers = #tpu.dot_dimension_numbers<[1], [0], [0], [1], [0, 0, 1, 1], [], []>} : vector<16x256xbf16>, vector<256x256xbf16>, vector<16x256xf32> -> vector<16x256xf32>
    %108 = arith.addf %105, %107 : vector<16x256xf32>
    %109 = arith.truncf %103 : vector<16x256xf32> to vector<16x256xbf16>
    %cst_36 = arith.constant dense<0.000000e+00> : vector<16x256xf32>
    %110 = tpu.matmul %109, %42, %cst_36 {dimension_numbers = #tpu.dot_dimension_numbers<[1], [0], [0], [1], [0, 0, 1, 1], [], []>} : vector<16x256xbf16>, vector<256x256xbf16>, vector<16x256xf32> -> vector<16x256xf32>
    %111 = arith.addf %108, %110 : vector<16x256xf32>
    %112 = vector.broadcast %45 : vector<1x256xf32> to vector<16x256xf32>
    %113 = arith.addf %111, %112 : vector<16x256xf32>
    %114 = vector.shape_cast %113 : vector<16x256xf32> to vector<2x8x256xf32>
    %cst_37 = arith.constant dense<0.000000e+00> : vector<2x256xf32>
    %115 = vector.multi_reduction <add>, %96, %cst_37 [1] : vector<2x8x256xf32> to vector<2x256xf32>
    %cst_38 = arith.constant 8.000000e+00 : f32
    %116 = vector.broadcast %cst_38 : f32 to vector<2x256xf32>
    %117 = arith.divf %115, %116 : vector<2x256xf32>
    %cst_39 = arith.constant dense<0xFF800000> : vector<2xf32>
    %118 = vector.multi_reduction <maximumf>, %117, %cst_39 [1] : vector<2x256xf32> to vector<2xf32>
    %119 = vector.shape_cast %118 : vector<2xf32> to vector<2x1xf32>
    %120 = vector.broadcast %119 : vector<2x1xf32> to vector<2x256xf32>
    %121 = arith.subf %117, %120 : vector<2x256xf32>
    %122 = math.exp %121 : vector<2x256xf32>
    %123 = arith.truncf %122 : vector<2x256xf32> to vector<2x256xbf16>
    %cst_40 = arith.constant dense<0.000000e+00> : vector<2x256xf32>
    %124 = tpu.matmul %123, %43, %cst_40 {dimension_numbers = #tpu.dot_dimension_numbers<[1], [0], [0], [1], [0, 0, 1, 1], [], []>} : vector<2x256xbf16>, vector<256x256xbf16>, vector<2x256xf32> -> vector<2x256xf32>
    %125 = tpu.reciprocal %124 {approx = true} : vector<2x256xf32> -> vector<2x256xf32>
    %126 = arith.mulf %122, %125 : vector<2x256xf32>
    %cst_41 = arith.constant dense<0.000000e+00> : vector<2x256xf32>
    %127 = vector.multi_reduction <add>, %114, %cst_41 [1] : vector<2x8x256xf32> to vector<2x256xf32>
    %cst_42 = arith.constant 8.000000e+00 : f32
    %128 = vector.broadcast %cst_42 : f32 to vector<2x256xf32>
    %129 = arith.divf %127, %128 : vector<2x256xf32>
    %cst_43 = arith.constant dense<0xFF800000> : vector<2xf32>
    %130 = vector.multi_reduction <maximumf>, %129, %cst_43 [1] : vector<2x256xf32> to vector<2xf32>
    %131 = vector.shape_cast %130 : vector<2xf32> to vector<2x1xf32>
    %132 = vector.broadcast %131 : vector<2x1xf32> to vector<2x256xf32>
    %133 = arith.subf %129, %132 : vector<2x256xf32>
    %134 = math.exp %133 : vector<2x256xf32>
    %135 = arith.truncf %134 : vector<2x256xf32> to vector<2x256xbf16>
    %cst_44 = arith.constant dense<0.000000e+00> : vector<2x256xf32>
    %136 = tpu.matmul %135, %43, %cst_44 {dimension_numbers = #tpu.dot_dimension_numbers<[1], [0], [0], [1], [0, 0, 1, 1], [], []>} : vector<2x256xbf16>, vector<256x256xbf16>, vector<2x256xf32> -> vector<2x256xf32>
    %137 = tpu.reciprocal %136 {approx = true} : vector<2x256xf32> -> vector<2x256xf32>
    %138 = arith.mulf %134, %137 : vector<2x256xf32>
    %139 = vector.shape_cast %126 : vector<2x256xf32> to vector<2x1x256xf32>
    %140 = vector.broadcast %139 : vector<2x1x256xf32> to vector<2x8x256xf32>
    %141 = arith.mulf %114, %140 : vector<2x8x256xf32>
    %142 = vector.shape_cast %138 : vector<2x256xf32> to vector<2x1x256xf32>
    %143 = vector.broadcast %142 : vector<2x1x256xf32> to vector<2x8x256xf32>
    %144 = arith.mulf %96, %143 : vector<2x8x256xf32>
    %145 = arith.addf %141, %144 : vector<2x8x256xf32>
    %146 = vector.shape_cast %145 : vector<2x8x256xf32> to vector<16x256xf32>
    %147 = arith.truncf %146 : vector<16x256xf32> to vector<16x256xbf16>
    %cst_45 = arith.constant dense<0.000000e+00> : vector<16x256xf32>
    %148 = tpu.matmul %147, %43, %cst_45 {dimension_numbers = #tpu.dot_dimension_numbers<[1], [0], [0], [1], [0, 0, 1, 1], [], []>} : vector<16x256xbf16>, vector<256x256xbf16>, vector<16x256xf32> -> vector<16x256xf32>
    %149 = arith.negf %148 : vector<16x256xf32>
    %150 = math.exp %149 : vector<16x256xf32>
    %cst_46 = arith.constant 1.000000e+00 : f32
    %151 = vector.broadcast %cst_46 : f32 to vector<16x256xf32>
    %152 = arith.addf %151, %150 : vector<16x256xf32>
    %153 = arith.divf %151, %152 : vector<16x256xf32>
    %154 = arith.mulf %38, %153 : vector<16x256xf32>
    %c0_47 = arith.constant 0 : index
    %c0_48 = arith.constant 0 : index
    %155 = vector.load %arg6[%c0_47, %c0_48] : memref<411x32xf32, #tpu.memory_space<vmem>>, vector<256x32xf32>
    %cst_49 = arith.constant dense<0.000000e+00> : vector<16x32xf32>
    %156 = tpu.matmul %154, %155, %cst_49 {dimension_numbers = #tpu.dot_dimension_numbers<[1], [0], [0], [1], [0, 0, 1, 1], [], []>} : vector<16x256xf32>, vector<256x32xf32>, vector<16x32xf32> -> vector<16x32xf32>
    %c405 = arith.constant 405 : index
    %c0_50 = arith.constant 0 : index
    %157 = vector.load %arg6[%c405, %c0_50] : memref<411x32xf32, #tpu.memory_space<vmem>>, vector<1x32xf32>
    %158 = vector.broadcast %157 : vector<1x32xf32> to vector<16x32xf32>
    %159 = arith.addf %156, %158 : vector<16x32xf32>
    %c401 = arith.constant 401 : index
    %c0_51 = arith.constant 0 : index
    %160 = vector.load %arg6[%c401, %c0_51] : memref<411x32xf32, #tpu.memory_space<vmem>>, vector<1x32xf32>
    %161 = vector.shape_cast %160 : vector<1x32xf32> to vector<1x1x32xf32>
    %162 = vector.shape_cast %161 : vector<1x1x32xf32> to vector<1x1x32xf32>
    %163 = vector.broadcast %162 : vector<1x1x32xf32> to vector<2x1x32xf32>
    %164 = vector.shape_cast %159 : vector<16x32xf32> to vector<2x8x32xf32>
    %cst_52 = arith.constant 0.000000e+00 : f32
    %165 = vector.broadcast %cst_52 : f32 to vector<2x7x32xf32>
    %166 = tpu.concatenate %163, %164, %165 in 1 : vector<2x1x32xf32>, vector<2x8x32xf32>, vector<2x7x32xf32> -> vector<2x16x32xf32>
    %c384 = arith.constant 384 : index
    %c0_53 = arith.constant 0 : index
    %167 = vector.load %arg6[%c384, %c0_53] : memref<411x32xf32, #tpu.memory_space<vmem>>, vector<16x32xf32>
    %168 = vector.shape_cast %167 : vector<16x32xf32> to vector<1x16x32xf32>
    %169 = vector.broadcast %168 : vector<1x16x32xf32> to vector<2x16x32xf32>
    %170 = arith.addf %166, %169 : vector<2x16x32xf32>
    %c400 = arith.constant 400 : index
    %c0_54 = arith.constant 0 : index
    %171 = vector.load %arg6[%c400, %c0_54] : memref<411x32xf32, #tpu.memory_space<vmem>>, vector<1x32xf32>
    %172 = vector.shape_cast %171 : vector<1x32xf32> to vector<1x1x32xf32>
    %173 = vector.broadcast %172 : vector<1x1x32xf32> to vector<2x16x32xf32>
    %174 = arith.addf %170, %173 : vector<2x16x32xf32>
    %cst_55 = arith.constant dense<0.000000e+00> : vector<2x16xf32>
    %175 = vector.multi_reduction <add>, %174, %cst_55 [2] : vector<2x16x32xf32> to vector<2x16xf32>
    %176 = vector.shape_cast %175 : vector<2x16xf32> to vector<2x16x1xf32>
    %cst_56 = arith.constant 3.200000e+01 : f32
    %177 = vector.broadcast %cst_56 : f32 to vector<2x16x1xf32>
    %178 = arith.divf %176, %177 : vector<2x16x1xf32>
    %179 = vector.broadcast %178 : vector<2x16x1xf32> to vector<2x16x32xf32>
    %180 = arith.subf %174, %179 : vector<2x16x32xf32>
    %181 = arith.mulf %180, %180 : vector<2x16x32xf32>
    %cst_57 = arith.constant dense<0.000000e+00> : vector<2x16xf32>
    %182 = vector.multi_reduction <add>, %181, %cst_57 [2] : vector<2x16x32xf32> to vector<2x16xf32>
    %183 = vector.shape_cast %182 : vector<2x16xf32> to vector<2x16x1xf32>
    %cst_58 = arith.constant 3.200000e+01 : f32
    %184 = vector.broadcast %cst_58 : f32 to vector<2x16x1xf32>
    %185 = arith.divf %183, %184 : vector<2x16x1xf32>
    %c403 = arith.constant 403 : index
    %c0_59 = arith.constant 0 : index
    %186 = vector.load %arg6[%c403, %c0_59] : memref<411x32xf32, #tpu.memory_space<vmem>>, vector<1x32xf32>
    %187 = vector.shape_cast %186 : vector<1x32xf32> to vector<1x1x32xf32>
    %188 = vector.broadcast %187 : vector<1x1x32xf32> to vector<2x16x32xf32>
    %189 = arith.mulf %188, %180 : vector<2x16x32xf32>
    %cst_60 = arith.constant 9.99999996E-13 : f32
    %190 = vector.broadcast %cst_60 : f32 to vector<2x16x1xf32>
    %191 = arith.addf %185, %190 : vector<2x16x1xf32>
    %192 = math.rsqrt %191 : vector<2x16x1xf32>
    %193 = vector.broadcast %192 : vector<2x16x1xf32> to vector<2x16x32xf32>
    %194 = arith.mulf %189, %193 : vector<2x16x32xf32>
    %c404 = arith.constant 404 : index
    %c0_61 = arith.constant 0 : index
    %195 = vector.load %arg6[%c404, %c0_61] : memref<411x32xf32, #tpu.memory_space<vmem>>, vector<1x32xf32>
    %196 = vector.shape_cast %195 : vector<1x32xf32> to vector<1x1x32xf32>
    %197 = vector.broadcast %196 : vector<1x1x32xf32> to vector<2x16x32xf32>
    %198 = arith.addf %194, %197 : vector<2x16x32xf32>
    %199 = vector.shape_cast %198 : vector<2x16x32xf32> to vector<32x32xf32>
    %c0_62 = arith.constant 0 : index
    %c0_63 = arith.constant 0 : index
    %200 = vector.load %arg5[%c0_62, %c0_63] : memref<66x128xf32, #tpu.memory_space<vmem>>, vector<32x128xf32>
    %c64 = arith.constant 64 : index
    %c0_64 = arith.constant 0 : index
    %201 = vector.load %arg5[%c64, %c0_64] : memref<66x128xf32, #tpu.memory_space<vmem>>, vector<1x128xf32>
    %cst_65 = arith.constant dense<0.000000e+00> : vector<32x128xf32>
    %202 = tpu.matmul %199, %200, %cst_65 {dimension_numbers = #tpu.dot_dimension_numbers<[1], [0], [0], [1], [0, 0, 1, 1], [], []>} : vector<32x32xf32>, vector<32x128xf32>, vector<32x128xf32> -> vector<32x128xf32>
    %203 = vector.broadcast %201 : vector<1x128xf32> to vector<32x128xf32>
    %204 = arith.addf %202, %203 : vector<32x128xf32>
    %205 = vector.extract_strided_slice %204 {offsets = [0, 0], sizes = [32, 32], strides = [1, 1]} : vector<32x128xf32> to vector<32x32xf32>
    %206 = vector.shape_cast %205 : vector<32x32xf32> to vector<2x16x32xf32>
    %207 = vector.extract_strided_slice %204 {offsets = [0, 32], sizes = [32, 32], strides = [1, 1]} : vector<32x128xf32> to vector<32x32xf32>
    %208 = vector.shape_cast %207 : vector<32x32xf32> to vector<2x16x32xf32>
    %209 = vector.extract_strided_slice %204 {offsets = [0, 64], sizes = [32, 32], strides = [1, 1]} : vector<32x128xf32> to vector<32x32xf32>
    %210 = vector.shape_cast %209 : vector<32x32xf32> to vector<2x16x32xf32>
    %211 = vector.extract_strided_slice %200 {offsets = [0, 96], sizes = [32, 32], strides = [1, 1]} : vector<32x128xf32> to vector<32x32xf32>
    %212 = vector.extract_strided_slice %201 {offsets = [0, 96], sizes = [1, 32], strides = [1, 1]} : vector<1x128xf32> to vector<1x32xf32>
    %c0_66 = arith.constant 0 : index
    %c0_67 = arith.constant 0 : index
    %c0_68 = arith.constant 0 : index
    %213 = vector.load %arg2[%c0_66, %c0_67, %c0_68] : memref<2x1x8xf32, #tpu.memory_space<vmem>>, vector<2x1x8xf32>
    %cst_69 = arith.constant 0.000000e+00 : f32
    %214 = vector.broadcast %cst_69 : f32 to vector<2x1x1xf32>
    %cst_70 = arith.constant 1.000000e+00 : f32
    %215 = vector.broadcast %cst_70 : f32 to vector<2x1x8xf32>
    %216 = arith.subf %215, %213 : vector<2x1x8xf32>
    %cst_71 = arith.constant -1.000000e+04 : f32
    %217 = vector.broadcast %cst_71 : f32 to vector<2x1x8xf32>
    %218 = arith.mulf %216, %217 : vector<2x1x8xf32>
    %cst_72 = arith.constant -1.000000e+04 : f32
    %219 = vector.broadcast %cst_72 : f32 to vector<2x1x7xf32>
    %220 = tpu.concatenate %214, %218, %219 in 2 : vector<2x1x1xf32>, vector<2x1x8xf32>, vector<2x1x7xf32> -> vector<2x1x16xf32>
    %221 = tpu.iota {dimensions = array<i32: 2>} : vector<1x1x32xi32>
    %cst_73 = arith.constant 0.000000e+00 : f32
    %222 = vector.broadcast %cst_73 : f32 to vector<2x16x32xf32>
    %c0_i32 = arith.constant 0 : i32
    %223 = vector.broadcast %c0_i32 : i32 to vector<1x1x32xi32>
    %224 = arith.cmpi sge, %221, %223 : vector<1x1x32xi32>
    %c16_i32 = arith.constant 16 : i32
    %225 = vector.broadcast %c16_i32 : i32 to vector<1x1x32xi32>
    %226 = arith.cmpi slt, %221, %225 : vector<1x1x32xi32>
    %227 = arith.andi %224, %226 : vector<1x1x32xi1>
    %228 = arith.extui %227 : vector<1x1x32xi1> to vector<1x1x32xi32>
    %229 = arith.sitofp %228 : vector<1x1x32xi32> to vector<1x1x32xf32>
    %230 = vector.broadcast %229 : vector<1x1x32xf32> to vector<2x16x32xf32>
    %231 = arith.mulf %206, %230 : vector<2x16x32xf32>
    "tpu.trace_start"() <{level = 10 : i32, message = "bqd,bkd->bqk"}> : () -> ()
    %cst_74 = arith.constant dense<0.000000e+00> : vector<2x16x16xf32>
    %232 = tpu.matmul %231, %208, %cst_74 {dimension_numbers = #tpu.dot_dimension_numbers<[2], [2], [1], [1], [0, 0, 0, 1, 1, 1], [0], [0]>} : vector<2x16x32xf32>, vector<2x16x32xf32>, vector<2x16x16xf32> -> vector<2x16x16xf32>
    "tpu.trace_stop"() : () -> ()
    %cst_75 = arith.constant 2.500000e-01 : f32
    %233 = vector.broadcast %cst_75 : f32 to vector<2x16x16xf32>
    %234 = arith.mulf %232, %233 : vector<2x16x16xf32>
    %235 = vector.broadcast %220 : vector<2x1x16xf32> to vector<2x16x16xf32>
    %236 = arith.addf %234, %235 : vector<2x16x16xf32>
    %cst_76 = arith.constant dense<0xFF800000> : vector<2x16xf32>
    %237 = vector.multi_reduction <maximumf>, %236, %cst_76 [2] : vector<2x16x16xf32> to vector<2x16xf32>
    %238 = vector.shape_cast %237 : vector<2x16xf32> to vector<2x16x1xf32>
    %239 = vector.broadcast %238 : vector<2x16x1xf32> to vector<2x16x16xf32>
    %240 = arith.subf %236, %239 : vector<2x16x16xf32>
    %241 = math.exp %240 : vector<2x16x16xf32>
    %cst_77 = arith.constant dense<0.000000e+00> : vector<2x16xf32>
    %242 = vector.multi_reduction <add>, %241, %cst_77 [2] : vector<2x16x16xf32> to vector<2x16xf32>
    %243 = vector.shape_cast %242 : vector<2x16xf32> to vector<2x16x1xf32>
    %244 = tpu.reciprocal %243 {approx = true} : vector<2x16x1xf32> -> vector<2x16x1xf32>
    %245 = vector.broadcast %244 : vector<2x16x1xf32> to vector<2x16x16xf32>
    %246 = arith.mulf %241, %245 : vector<2x16x16xf32>
    %247 = vector.broadcast %229 : vector<1x1x32xf32> to vector<2x16x32xf32>
    %248 = arith.mulf %210, %247 : vector<2x16x32xf32>
    "tpu.trace_start"() <{level = 10 : i32, message = "bqk,bkd->bqd"}> : () -> ()
    %cst_78 = arith.constant dense<0.000000e+00> : vector<2x16x32xf32>
    %249 = tpu.matmul %246, %248, %cst_78 {dimension_numbers = #tpu.dot_dimension_numbers<[2], [1], [1], [2], [0, 0, 0, 1, 1, 2], [0], [0]>} : vector<2x16x16xf32>, vector<2x16x32xf32>, vector<2x16x32xf32> -> vector<2x16x32xf32>
    "tpu.trace_stop"() : () -> ()
    %250 = arith.addf %222, %249 : vector<2x16x32xf32>
    %c16_i32_79 = arith.constant 16 : i32
    %251 = vector.broadcast %c16_i32_79 : i32 to vector<1x1x32xi32>
    %252 = arith.cmpi sge, %221, %251 : vector<1x1x32xi32>
    %c32_i32 = arith.constant 32 : i32
    %253 = vector.broadcast %c32_i32 : i32 to vector<1x1x32xi32>
    %254 = arith.cmpi slt, %221, %253 : vector<1x1x32xi32>
    %255 = arith.andi %252, %254 : vector<1x1x32xi1>
    %256 = arith.extui %255 : vector<1x1x32xi1> to vector<1x1x32xi32>
    %257 = arith.sitofp %256 : vector<1x1x32xi32> to vector<1x1x32xf32>
    %258 = vector.broadcast %257 : vector<1x1x32xf32> to vector<2x16x32xf32>
    %259 = arith.mulf %206, %258 : vector<2x16x32xf32>
    "tpu.trace_start"() <{level = 10 : i32, message = "bqd,bkd->bqk"}> : () -> ()
    %cst_80 = arith.constant dense<0.000000e+00> : vector<2x16x16xf32>
    %260 = tpu.matmul %259, %208, %cst_80 {dimension_numbers = #tpu.dot_dimension_numbers<[2], [2], [1], [1], [0, 0, 0, 1, 1, 1], [0], [0]>} : vector<2x16x32xf32>, vector<2x16x32xf32>, vector<2x16x16xf32> -> vector<2x16x16xf32>
    "tpu.trace_stop"() : () -> ()
    %cst_81 = arith.constant 2.500000e-01 : f32
    %261 = vector.broadcast %cst_81 : f32 to vector<2x16x16xf32>
    %262 = arith.mulf %260, %261 : vector<2x16x16xf32>
    %263 = vector.broadcast %220 : vector<2x1x16xf32> to vector<2x16x16xf32>
    %264 = arith.addf %262, %263 : vector<2x16x16xf32>
    %cst_82 = arith.constant dense<0xFF800000> : vector<2x16xf32>
    %265 = vector.multi_reduction <maximumf>, %264, %cst_82 [2] : vector<2x16x16xf32> to vector<2x16xf32>
    %266 = vector.shape_cast %265 : vector<2x16xf32> to vector<2x16x1xf32>
    %267 = vector.broadcast %266 : vector<2x16x1xf32> to vector<2x16x16xf32>
    %268 = arith.subf %264, %267 : vector<2x16x16xf32>
    %269 = math.exp %268 : vector<2x16x16xf32>
    %cst_83 = arith.constant dense<0.000000e+00> : vector<2x16xf32>
    %270 = vector.multi_reduction <add>, %269, %cst_83 [2] : vector<2x16x16xf32> to vector<2x16xf32>
    %271 = vector.shape_cast %270 : vector<2x16xf32> to vector<2x16x1xf32>
    %272 = tpu.reciprocal %271 {approx = true} : vector<2x16x1xf32> -> vector<2x16x1xf32>
    %273 = vector.broadcast %272 : vector<2x16x1xf32> to vector<2x16x16xf32>
    %274 = arith.mulf %269, %273 : vector<2x16x16xf32>
    %275 = vector.broadcast %257 : vector<1x1x32xf32> to vector<2x16x32xf32>
    %276 = arith.mulf %210, %275 : vector<2x16x32xf32>
    "tpu.trace_start"() <{level = 10 : i32, message = "bqk,bkd->bqd"}> : () -> ()
    %cst_84 = arith.constant dense<0.000000e+00> : vector<2x16x32xf32>
    %277 = tpu.matmul %274, %276, %cst_84 {dimension_numbers = #tpu.dot_dimension_numbers<[2], [1], [1], [2], [0, 0, 0, 1, 1, 2], [0], [0]>} : vector<2x16x16xf32>, vector<2x16x32xf32>, vector<2x16x32xf32> -> vector<2x16x32xf32>
    "tpu.trace_stop"() : () -> ()
    %278 = arith.addf %250, %277 : vector<2x16x32xf32>
    %279 = vector.shape_cast %278 : vector<2x16x32xf32> to vector<32x32xf32>
    %cst_85 = arith.constant dense<0.000000e+00> : vector<32x32xf32>
    %280 = tpu.matmul %279, %211, %cst_85 {dimension_numbers = #tpu.dot_dimension_numbers<[1], [0], [0], [1], [0, 0, 1, 1], [], []>} : vector<32x32xf32>, vector<32x32xf32>, vector<32x32xf32> -> vector<32x32xf32>
    %281 = vector.broadcast %212 : vector<1x32xf32> to vector<32x32xf32>
    %282 = arith.addf %280, %281 : vector<32x32xf32>
    %283 = vector.shape_cast %282 : vector<32x32xf32> to vector<2x16x32xf32>
    %284 = arith.addf %198, %283 : vector<2x16x32xf32>
    %cst_86 = arith.constant dense<0.000000e+00> : vector<2x16xf32>
    %285 = vector.multi_reduction <add>, %284, %cst_86 [2] : vector<2x16x32xf32> to vector<2x16xf32>
    %286 = vector.shape_cast %285 : vector<2x16xf32> to vector<2x16x1xf32>
    %cst_87 = arith.constant 3.200000e+01 : f32
    %287 = vector.broadcast %cst_87 : f32 to vector<2x16x1xf32>
    %288 = arith.divf %286, %287 : vector<2x16x1xf32>
    %289 = vector.broadcast %288 : vector<2x16x1xf32> to vector<2x16x32xf32>
    %290 = arith.subf %284, %289 : vector<2x16x32xf32>
    %291 = arith.mulf %290, %290 : vector<2x16x32xf32>
    %cst_88 = arith.constant dense<0.000000e+00> : vector<2x16xf32>
    %292 = vector.multi_reduction <add>, %291, %cst_88 [2] : vector<2x16x32xf32> to vector<2x16xf32>
    %293 = vector.shape_cast %292 : vector<2x16xf32> to vector<2x16x1xf32>
    %cst_89 = arith.constant 3.200000e+01 : f32
    %294 = vector.broadcast %cst_89 : f32 to vector<2x16x1xf32>
    %295 = arith.divf %293, %294 : vector<2x16x1xf32>
    %c406 = arith.constant 406 : index
    %c0_90 = arith.constant 0 : index
    %296 = vector.load %arg6[%c406, %c0_90] : memref<411x32xf32, #tpu.memory_space<vmem>>, vector<1x32xf32>
    %297 = vector.shape_cast %296 : vector<1x32xf32> to vector<1x1x32xf32>
    %298 = vector.broadcast %297 : vector<1x1x32xf32> to vector<2x16x32xf32>
    %299 = arith.mulf %298, %290 : vector<2x16x32xf32>
    %cst_91 = arith.constant 9.99999996E-13 : f32
    %300 = vector.broadcast %cst_91 : f32 to vector<2x16x1xf32>
    %301 = arith.addf %295, %300 : vector<2x16x1xf32>
    %302 = math.rsqrt %301 : vector<2x16x1xf32>
    %303 = vector.broadcast %302 : vector<2x16x1xf32> to vector<2x16x32xf32>
    %304 = arith.mulf %299, %303 : vector<2x16x32xf32>
    %c407 = arith.constant 407 : index
    %c0_92 = arith.constant 0 : index
    %305 = vector.load %arg6[%c407, %c0_92] : memref<411x32xf32, #tpu.memory_space<vmem>>, vector<1x32xf32>
    %306 = vector.shape_cast %305 : vector<1x32xf32> to vector<1x1x32xf32>
    %307 = vector.broadcast %306 : vector<1x1x32xf32> to vector<2x16x32xf32>
    %308 = arith.addf %304, %307 : vector<2x16x32xf32>
    %c32 = arith.constant 32 : index
    %c0_93 = arith.constant 0 : index
    %309 = vector.load %arg5[%c32, %c0_93] : memref<66x128xf32, #tpu.memory_space<vmem>>, vector<32x128xf32>
    %c65 = arith.constant 65 : index
    %c0_94 = arith.constant 0 : index
    %310 = vector.load %arg5[%c65, %c0_94] : memref<66x128xf32, #tpu.memory_space<vmem>>, vector<1x128xf32>
    %c256 = arith.constant 256 : index
    %c0_95 = arith.constant 0 : index
    %311 = vector.load %arg6[%c256, %c0_95] : memref<411x32xf32, #tpu.memory_space<vmem>>, vector<128x32xf32>
    %312 = vector.shape_cast %308 : vector<2x16x32xf32> to vector<32x32xf32>
    %cst_96 = arith.constant dense<0.000000e+00> : vector<32x128xf32>
    %313 = tpu.matmul %312, %309, %cst_96 {dimension_numbers = #tpu.dot_dimension_numbers<[1], [0], [0], [1], [0, 0, 1, 1], [], []>} : vector<32x32xf32>, vector<32x128xf32>, vector<32x128xf32> -> vector<32x128xf32>
    %314 = vector.broadcast %310 : vector<1x128xf32> to vector<32x128xf32>
    %315 = arith.addf %313, %314 : vector<32x128xf32>
    %316 = arith.mulf %315, %315 : vector<32x128xf32>
    %317 = arith.mulf %315, %316 : vector<32x128xf32>
    %cst_97 = arith.constant 4.471500e-02 : f32
    %318 = vector.broadcast %cst_97 : f32 to vector<32x128xf32>
    %319 = arith.mulf %318, %317 : vector<32x128xf32>
    %320 = arith.addf %315, %319 : vector<32x128xf32>
    %cst_98 = arith.constant 0.797884583 : f32
    %321 = vector.broadcast %cst_98 : f32 to vector<32x128xf32>
    %322 = arith.mulf %321, %320 : vector<32x128xf32>
    %323 = math.tanh %322 : vector<32x128xf32>
    %cst_99 = arith.constant 1.000000e+00 : f32
    %324 = vector.broadcast %cst_99 : f32 to vector<32x128xf32>
    %325 = arith.addf %324, %323 : vector<32x128xf32>
    %cst_100 = arith.constant 5.000000e-01 : f32
    %326 = vector.broadcast %cst_100 : f32 to vector<32x128xf32>
    %327 = arith.mulf %326, %325 : vector<32x128xf32>
    %328 = arith.mulf %315, %327 : vector<32x128xf32>
    %cst_101 = arith.constant dense<0.000000e+00> : vector<32x32xf32>
    %329 = tpu.matmul %328, %311, %cst_101 {dimension_numbers = #tpu.dot_dimension_numbers<[1], [0], [0], [1], [0, 0, 1, 1], [], []>} : vector<32x128xf32>, vector<128x32xf32>, vector<32x32xf32> -> vector<32x32xf32>
    %c408 = arith.constant 408 : index
    %c0_102 = arith.constant 0 : index
    %330 = vector.load %arg6[%c408, %c0_102] : memref<411x32xf32, #tpu.memory_space<vmem>>, vector<1x32xf32>
    %331 = vector.broadcast %330 : vector<1x32xf32> to vector<32x32xf32>
    %332 = arith.addf %329, %331 : vector<32x32xf32>
    %333 = vector.shape_cast %332 : vector<32x32xf32> to vector<2x16x32xf32>
    %334 = arith.addf %308, %333 : vector<2x16x32xf32>
    %cst_103 = arith.constant dense<0.000000e+00> : vector<2x16xf32>
    %335 = vector.multi_reduction <add>, %334, %cst_103 [2] : vector<2x16x32xf32> to vector<2x16xf32>
    %336 = vector.shape_cast %335 : vector<2x16xf32> to vector<2x16x1xf32>
    %cst_104 = arith.constant 3.200000e+01 : f32
    %337 = vector.broadcast %cst_104 : f32 to vector<2x16x1xf32>
    %338 = arith.divf %336, %337 : vector<2x16x1xf32>
    %339 = vector.broadcast %338 : vector<2x16x1xf32> to vector<2x16x32xf32>
    %340 = arith.subf %334, %339 : vector<2x16x32xf32>
    %341 = arith.mulf %340, %340 : vector<2x16x32xf32>
    %cst_105 = arith.constant dense<0.000000e+00> : vector<2x16xf32>
    %342 = vector.multi_reduction <add>, %341, %cst_105 [2] : vector<2x16x32xf32> to vector<2x16xf32>
    %343 = vector.shape_cast %342 : vector<2x16xf32> to vector<2x16x1xf32>
    %cst_106 = arith.constant 3.200000e+01 : f32
    %344 = vector.broadcast %cst_106 : f32 to vector<2x16x1xf32>
    %345 = arith.divf %343, %344 : vector<2x16x1xf32>
    %c409 = arith.constant 409 : index
    %c0_107 = arith.constant 0 : index
    %346 = vector.load %arg6[%c409, %c0_107] : memref<411x32xf32, #tpu.memory_space<vmem>>, vector<1x32xf32>
    %347 = vector.shape_cast %346 : vector<1x32xf32> to vector<1x1x32xf32>
    %348 = vector.broadcast %347 : vector<1x1x32xf32> to vector<2x16x32xf32>
    %349 = arith.mulf %348, %340 : vector<2x16x32xf32>
    %cst_108 = arith.constant 9.99999996E-13 : f32
    %350 = vector.broadcast %cst_108 : f32 to vector<2x16x1xf32>
    %351 = arith.addf %345, %350 : vector<2x16x1xf32>
    %352 = math.rsqrt %351 : vector<2x16x1xf32>
    %353 = vector.broadcast %352 : vector<2x16x1xf32> to vector<2x16x32xf32>
    %354 = arith.mulf %349, %353 : vector<2x16x32xf32>
    %c410 = arith.constant 410 : index
    %c0_109 = arith.constant 0 : index
    %355 = vector.load %arg6[%c410, %c0_109] : memref<411x32xf32, #tpu.memory_space<vmem>>, vector<1x32xf32>
    %356 = vector.shape_cast %355 : vector<1x32xf32> to vector<1x1x32xf32>
    %357 = vector.broadcast %356 : vector<1x1x32xf32> to vector<2x16x32xf32>
    %358 = arith.addf %354, %357 : vector<2x16x32xf32>
    %cst_110 = arith.constant 0.000000e+00 : f32
    %359 = vector.broadcast %cst_110 : f32 to vector<2x9x64xf32>
    %360 = vector.extract_strided_slice %198 {offsets = [0, 0, 0], sizes = [2, 9, 32], strides = [1, 1, 1]} : vector<2x16x32xf32> to vector<2x9x32xf32>
    %361 = vector.extract_strided_slice %358 {offsets = [0, 0, 0], sizes = [2, 9, 32], strides = [1, 1, 1]} : vector<2x16x32xf32> to vector<2x9x32xf32>
    %362 = tpu.concatenate %360, %361, %359 in 2 : vector<2x9x32xf32>, vector<2x9x32xf32>, vector<2x9x64xf32> -> vector<2x9x128xf32>
    %c0_111 = arith.constant 0 : index
    %c0_112 = arith.constant 0 : index
    %c0_113 = arith.constant 0 : index
    %363 = vector.load %arg7[%c0_111, %c0_112, %c0_113] : memref<2x9x128xf32, #tpu.memory_space<vmem>>, vector<2x9x128xf32>
    tpu.vector_store %arg7[%c0_111, %c0_112, %c0_113], %362 {strides = array<i32>} : memref<2x9x128xf32, #tpu.memory_space<vmem>>, vector<2x9x128xf32>,
    return
  }
  func.func @transform_0(%arg0: i32) -> (i32, i32, i32) {
    %c0_i32 = arith.constant 0 : i32
    %c0_i32_0 = arith.constant 0 : i32
    %c0_i32_1 = arith.constant 0 : i32
    return %arg0, %c0_i32, %c0_i32_0 : i32, i32, i32
  }
  func.func @transform_1(%arg0: i32) -> (i32, i32, i32) {
    %c0_i32 = arith.constant 0 : i32
    %c0_i32_0 = arith.constant 0 : i32
    %c0_i32_1 = arith.constant 0 : i32
    return %arg0, %c0_i32, %c0_i32_0 : i32, i32, i32
  }
  func.func @transform_2(%arg0: i32) -> (i32, i32) {
    %c0_i32 = arith.constant 0 : i32
    %c0_i32_0 = arith.constant 0 : i32
    %c0_i32_1 = arith.constant 0 : i32
    return %c0_i32, %c0_i32_0 : i32, i32
  }
  func.func @transform_3(%arg0: i32) -> (i32, i32) {
    %c0_i32 = arith.constant 0 : i32
    %c0_i32_0 = arith.constant 0 : i32
    %c0_i32_1 = arith.constant 0 : i32
    return %c0_i32, %c0_i32_0 : i32, i32
  }
  func.func @transform_4(%arg0: i32) -> (i32, i32) {
    %c0_i32 = arith.constant 0 : i32
    %c0_i32_0 = arith.constant 0 : i32
    %c0_i32_1 = arith.constant 0 : i32
    return %c0_i32, %c0_i32_0 : i32, i32
  }
  func.func @transform_5(%arg0: i32) -> (i32, i32) {
    %c0_i32 = arith.constant 0 : i32
    %c0_i32_0 = arith.constant 0 : i32
    %c0_i32_1 = arith.constant 0 : i32
    return %c0_i32, %c0_i32_0 : i32, i32
  }
  func.func @transform_6(%arg0: i32) -> (i32, i32, i32) {
    %c0_i32 = arith.constant 0 : i32
    %c0_i32_0 = arith.constant 0 : i32
    %c0_i32_1 = arith.constant 0 : i32
    return %arg0, %c0_i32, %c0_i32_0 : i32, i32, i32
  }
}

</mosaic_0001>

<bundles_post_ra>
// kernel: tpu_custom_call.1
= control target key start
LH: loop header
LB: loop body
LE: loop exit
PB: predicated region body
PF: predicated region fallthrough
CT: control target
= control target key end

     0   :  { %11 = vsyncpa [#allocation3], 0  ;;  %s4739_s21 = smov [#allocation2]   ;;  %s5723_s0 = inlined_call_operand.vmem [shape: s32[2,8,1], index: 0, kind: input, shape index: {}]   ;;  %s5724_s1 = inlined_call_operand.vmem [shape: f32[2,1,8], index: 1, kind: input, shape index: {}]   ;;  %s5725_s2 = inlined_call_operand.hbm [shape: bf16[1296,256], index: 2, kind: input, shape index: {}]   ;;  %s5726_s3 = inlined_call_operand.vmem [shape: f32[4,256], index: 3, kind: input, shape index: {}]   ;;  %s5727_s4 = inlined_call_operand.vmem [shape: f32[66,128], index: 4, kind: input, shape index: {}]   ;;  %s5728_s5 = inlined_call_operand.vmem [shape: f32[411,32], index: 5, kind: input, shape index: {}]   ;;  %s5729_s6 = inlined_call_operand.vmem [shape: f32[2,9,128], index: 6, kind: output, shape index: {}]  }
   0x1   :  { %s21_s22 = sshll.u32 %s4739_s21, 4  ;;  %s22_s22 = int_to_ptr.vmem [resolvable:$true] %s21_s22 }
   0x2   :  { %s4725_s23 = scalar_lea.vmem %s22_s22, 20736  ;;  %p4730_p1 = scmp.lt.s32.totalorder %s22_s22, %s22_s22 }
   0x3   :  { %p4726_p0 = scmp.ne.s32.totalorder %s22_s22, %s4725_s23  ;;  %p4731_p2 = scmp.lt.s32.totalorder %s4725_s23, %s4725_s23 }
   0x5   :  { %p4732_p3 = por %p4731_p2, %p4730_p1 }
   0x7   :  { %p4733_p4 = pnand %p4732_p3, %p4726_p0 }
   0x9   :  { %4736 = shalt.err (!%p4733_p4)
}
   0xa   :  { %s4740_s24 = smov 128   ;;  %s4741_s25 = smov 8  }
   0xb   :  { %27 = dma.hbm_to_vmem [thread:$0]  %s5725_s2, 20736, %s22_s22, [#allocation3], %s4740_s24, %s4740_s24, %s4741_s25  }
   0xc   :  { %4737 = dma.done.wait [#allocation3], 20736  }
   0xd   :  { %4738 = vsyncadd [#allocation3], 4294946560  ;;  %v4742_v0 = vmov 0   ;;  %v38_v1 = vld [vmem:[%s5723_s0] sm:$0xff]  ;;  %v39_v2 = vld [vmem:[%s5723_s0 + $0x8] sm:$0xff]  ;;  %v40_v5 = vlaneseq  ;;  %v5730_v9 = vmov 0.0  }
   0xe   :  { %4313 = vset.pattern.permute.xlu0 %v4742_v0  ;;  %109 = vmatprep.mubr.bf16.mxu0 %v4742_v0  ;;  %v4314_v3 = vld [vmem:[#allocation2 + $0x4] ss:$8 sps:$4 sm:$0xff]   ;;  %v4316_v4 = vld [vmem:[#allocation2] ss:$8 sps:$4 sm:$0xff]   ;;  %vm73_vm2 = vcmask 130048   ;;  %vm888_vm3 = vcmask 1046528  }
   0xf   :  { %43 = vperm.xlu0 %4313, %v38_v1   ;;  %91 = vmatprep.subr.bf16.mxu0 %v4314_v3  ;;  %v4794_v6 = vand.u32 127, %v40_v5  ;;  %v4317_v13 = vld [vmem:[#allocation2 + $0x84] ss:$8 sps:$4 sm:$0xff]   ;;  %v4319_v15 = vld [vmem:[#allocation2 + $0x280] ss:$8 sps:$4 sm:$0xff]   ;;  %vm4846_vm4 = vmpackc.low %vm888_vm3, %vm888_vm3  ;;  %vm437_vm5 = vcmask 1041409  }
  0x10   :  { %92 = vmatpush1.bf16.msra.mxu0 %v4316_v4  ;;  %v4321_v14 = vld [vmem:[#allocation2 + $0x284] ss:$8 sps:$4 sm:$0xff]   ;;  %v4322_v16 = vld [vmem:[#allocation2 + $0x80] ss:$8 sps:$4 sm:$0xff]   ;;  %617 = vmatprep.subr.bf16.mxu1 %v4317_v13  ;;  %v4323_v17 = vld [vmem:[#allocation2 + $0x74] ss:$8 sps:$4 sm:$0xff]  }
  0x11   :  { %5742 = vst [vmem:[#allocation5_spill] sm:$0xff] %v4794_v6  ;;  %1055 = vmatprep.subr.bf16.mxu0 %v4321_v14  ;;  %618 = vmatpush1.bf16.msra.mxu1 %v4322_v16  ;;  %v4327_v18 = vld [vmem:[#allocation2 + $0x274] ss:$8 sps:$4 sm:$0xff]   ;;  %v4325_v19 = vld [vmem:[#allocation2 + $0x270] ss:$8 sps:$4 sm:$0xff]   ;;  %vm875_vm6 = vcmask 1040384  }
  0x12   :  { %v4328_v20 = vld [vmem:[#allocation2 + $0x70] ss:$8 sps:$4 sm:$0xff]   ;;  %619 = vmatprep.subr.bf16.mxu1 %v4323_v17  ;;  %v4329_v21 = vld [vmem:[#allocation2 + $0x64] ss:$8 sps:$4 sm:$0xff]   ;;  %v4331_v23 = vld [vmem:[#allocation2 + $0x260] ss:$8 sps:$4 sm:$0xff]  }
  0x13   :  { %46 = vperm.xlu0 %4313, %v39_v2   ;;  %v4333_v22 = vld [vmem:[#allocation2 + $0x264] ss:$8 sps:$4 sm:$0xff]   ;;  %v4334_v24 = vld [vmem:[#allocation2 + $0x60] ss:$8 sps:$4 sm:$0xff]   ;;  %v4335_v25 = vld [vmem:[#allocation2 + $0x54] ss:$8 sps:$4 sm:$0xff]  }
  0x14   :  { %v4339_v26 = vld [vmem:[#allocation2 + $0x254] ss:$8 sps:$4 sm:$0xff]   ;;  %v4337_v27 = vld [vmem:[#allocation2 + $0x250] ss:$8 sps:$4 sm:$0xff]   ;;  %v4341_v29 = vld [vmem:[#allocation2 + $0x44] ss:$8 sps:$4 sm:$0xff]  }
  0x15   :  { %620 = vmatpush1.bf16.msra.mxu1 %v4328_v20  ;;  %v4340_v28 = vld [vmem:[#allocation2 + $0x50] ss:$8 sps:$4 sm:$0xff]   ;;  %v4345_v30 = vld [vmem:[#allocation2 + $0x244] ss:$8 sps:$4 sm:$0xff]   ;;  %v4343_v31 = vld [vmem:[#allocation2 + $0x240] ss:$8 sps:$4 sm:$0xff]  }
  0x16   :  { %621 = vmatprep.subr.bf16.mxu1 %v4329_v21  ;;  %v4346_v32 = vld [vmem:[#allocation2 + $0x40] ss:$8 sps:$4 sm:$0xff]   ;;  %v4347_v33 = vld [vmem:[#allocation2 + $0x34] ss:$8 sps:$4 sm:$0xff]   ;;  %v4349_v35 = vld [vmem:[#allocation2 + $0x230] ss:$8 sps:$4 sm:$0xff]  }
  0x17   :  { %v4351_v34 = vld [vmem:[#allocation2 + $0x234] ss:$8 sps:$4 sm:$0xff]   ;;  %v4352_v36 = vld [vmem:[#allocation2 + $0x30] ss:$8 sps:$4 sm:$0xff]   ;;  %v4353_v37 = vld [vmem:[#allocation2 + $0x24] ss:$8 sps:$4 sm:$0xff]  }
  0x18   :  { %v4357_v38 = vld [vmem:[#allocation2 + $0x224] ss:$8 sps:$4 sm:$0xff]   ;;  %v4355_v39 = vld [vmem:[#allocation2 + $0x220] ss:$8 sps:$4 sm:$0xff]   ;;  %v4359_v41 = vld [vmem:[#allocation2 + $0x14] ss:$8 sps:$4 sm:$0xff]  }
  0x19   :  { %622 = vmatpush1.bf16.msra.mxu1 %v4334_v24  ;;  %v4358_v40 = vld [vmem:[#allocation2 + $0x20] ss:$8 sps:$4 sm:$0xff]   ;;  %v4363_v42 = vld [vmem:[#allocation2 + $0x214] ss:$8 sps:$4 sm:$0xff]   ;;  %v4361_v43 = vld [vmem:[#allocation2 + $0x210] ss:$8 sps:$4 sm:$0xff]  }
  0x1a   :  { %623 = vmatprep.subr.bf16.mxu1 %v4335_v25  ;;  %v4364_v44 = vld [vmem:[#allocation2 + $0x10] ss:$8 sps:$4 sm:$0xff]   ;;  %v4365_v45 = vld [vmem:[#allocation2 + $0x104] ss:$8 sps:$4 sm:$0xff]   ;;  %v4367_v47 = vld [vmem:[#allocation2 + $0x300] ss:$8 sps:$4 sm:$0xff]  }
  0x1b   :  { %v4369_v46 = vld [vmem:[#allocation2 + $0x304] ss:$8 sps:$4 sm:$0xff]   ;;  %v4370_v48 = vld [vmem:[#allocation2 + $0x100] ss:$8 sps:$4 sm:$0xff]   ;;  %v4371_v49 = vld [vmem:[#allocation2 + $0xf4] ss:$8 sps:$4 sm:$0xff]  }
  0x1c   :  { %v4375_v50 = vld [vmem:[#allocation2 + $0x2f4] ss:$8 sps:$4 sm:$0xff]   ;;  %v4373_v51 = vld [vmem:[#allocation2 + $0x2f0] ss:$8 sps:$4 sm:$0xff]   ;;  %v4377_v53 = vld [vmem:[#allocation2 + $0xe4] ss:$8 sps:$4 sm:$0xff]  }
  0x1d   :  { %624 = vmatpush1.bf16.msra.mxu1 %v4340_v28  ;;  %v4376_v52 = vld [vmem:[#allocation2 + $0xf0] ss:$8 sps:$4 sm:$0xff]   ;;  %v4381_v54 = vld [vmem:[#allocation2 + $0x2e4] ss:$8 sps:$4 sm:$0xff]   ;;  %v4379_v55 = vld [vmem:[#allocation2 + $0x2e0] ss:$8 sps:$4 sm:$0xff]  }
  0x1e   :  { %625 = vmatprep.subr.bf16.mxu1 %v4341_v29  ;;  %v4382_v56 = vld [vmem:[#allocation2 + $0xe0] ss:$8 sps:$4 sm:$0xff]   ;;  %v4383_v57 = vld [vmem:[#allocation2 + $0xd4] ss:$8 sps:$4 sm:$0xff]   ;;  %v4385_v59 = vld [vmem:[#allocation2 + $0x2d0] ss:$8 sps:$4 sm:$0xff]  }
  0x1f   :  { %v4387_v58 = vld [vmem:[#allocation2 + $0x2d4] ss:$8 sps:$4 sm:$0xff]   ;;  %v4388_v60 = vld [vmem:[#allocation2 + $0xd0] ss:$8 sps:$4 sm:$0xff]   ;;  %v4389_v61 = vld [vmem:[#allocation2 + $0xc4] ss:$8 sps:$4 sm:$0xff]  }
  0x20   :  { %v4393_v62 = vld [vmem:[#allocation2 + $0x2c4] ss:$8 sps:$4 sm:$0xff]   ;;  %v4391_v63 = vld [vmem:[#allocation2 + $0x2c0] ss:$8 sps:$4 sm:$0xff]   ;;  %v4395_v1 = vld [vmem:[#allocation2 + $0xb4] ss:$8 sps:$4 sm:$0xff]  }
  0x21   :  { %626 = vmatpush1.bf16.msra.mxu1 %v4346_v32  ;;  %v4394_v0 = vld [vmem:[#allocation2 + $0xc0] ss:$8 sps:$4 sm:$0xff]   ;;  %v4399_v2 = vld [vmem:[#allocation2 + $0x2b4] ss:$8 sps:$4 sm:$0xff]   ;;  %v4397_v3 = vld [vmem:[#allocation2 + $0x2b0] ss:$8 sps:$4 sm:$0xff]  }
  0x22   :  { %627 = vmatprep.subr.bf16.mxu1 %v4347_v33  ;;  %v4400_v4 = vld [vmem:[#allocation2 + $0xb0] ss:$8 sps:$4 sm:$0xff]   ;;  %v4411_v13 = vld [vmem:[#allocation2 + $0x294] ss:$8 sps:$4 sm:$0xff]   ;;  %v4415_v16 = vld [vmem:[#allocation2 + $0x184] ss:$8 sps:$4 sm:$0xff]  }
  0x23   :  { %v4409_v14 = vld [vmem:[#allocation2 + $0x290] ss:$8 sps:$4 sm:$0xff]   ;;  %v4418_v17 = vld [vmem:[#allocation2 + $0x384] ss:$8 sps:$4 sm:$0xff]   ;;  %vm4856_vm7 = vmneg %vm875_vm6  ;;  %vm1561_vm9 = vcmask 1041408   ;;  %vm2205_vm10 = vcmask 261120  }
  0x24   :  { %vm3921_vm8 = vmpackc.low %vm4856_vm7, %vm4856_vm7  ;;  %s4745_s20 = smov 96   ;;  %s4746_s25 = smov 1   ;;  %vm2405_vm15 = vcmask 7168  }
  0x25   :  { %628 = vmatpush1.bf16.msra.mxu1 %v4352_v36  ;;  %s4748_s26 = smov 32  }
  0x26   :  { %629 = vmatprep.subr.bf16.mxu1 %v4353_v37 }
  0x29   :  { %630 = vmatpush1.bf16.msra.mxu1 %v4358_v40 }
  0x2a   :  { %631 = vmatprep.subr.bf16.mxu1 %v4359_v41 }
  0x2d   :  { %632 = vmatpush1.bf16.msra.mxu1 %v4364_v44 }
  0x2e   :  { %633 = vmatprep.subr.bf16.mxu1 %v4365_v45 }
  0x31   :  { %634 = vmatpush2.bf16.msra.mxu1 %v4370_v48 }
  0x32   :  { %635 = vmatprep.subr.bf16.mxu1 %v4371_v49 }
  0x35   :  { %636 = vmatpush2.bf16.msra.mxu1 %v4376_v52 }
  0x36   :  { %637 = vmatprep.subr.bf16.mxu1 %v4377_v53 }
  0x39   :  { %638 = vmatpush2.bf16.msra.mxu1 %v4382_v56 }
  0x3a   :  { %639 = vmatprep.subr.bf16.mxu1 %v4383_v57 }
  0x3d   :  { %640 = vmatpush2.bf16.msra.mxu1 %v4388_v60 }
  0x3e   :  { %641 = vmatprep.subr.bf16.mxu1 %v4389_v61 }
  0x41   :  { %642 = vmatpush2.bf16.msra.mxu1 %v4394_v0 }
  0x42   :  { %643 = vmatprep.subr.bf16.mxu1 %v4395_v1 }
  0x45   :  { %644 = vmatpush2.bf16.msra.mxu1 %v4400_v4 }
  0x8a   :  { %v44_v7 = vpop.permute.xlu0 %43 }
  0x8b   :  { %vm48_vm0 = vcmp.eq.s32.totalorder %v4794_v6, %v44_v7  ;;  %v4401_v7 = vld [vmem:[#allocation2 + $0xa4] ss:$8 sps:$4 sm:$0xff]  }
  0x8c   :  { %v3804_v10 = vsel %vm48_vm0, 1.0, %v5730_v9  ;;  %645 = vmatprep.subr.bf16.mxu1 %v4401_v7  ;;  %vm2408_vm0 = vcmask 72704  }
  0x8e   :  { %v47_v8 = vpop.permute.xlu0 %46 }
  0x8f   :  { %vm49_vm1 = vcmp.eq.s32.totalorder %v4794_v6, %v47_v8  ;;  %v4405_v8 = vld [vmem:[#allocation2 + $0x2a4] ss:$8 sps:$4 sm:$0xff]  }
  0x90   :  { %v3805_v11 = vsel %vm49_vm1, 1.0, %v5730_v9  ;;  %vm3790_vm1 = vcmask 523264  }
  0x91   :  { %v4052_v12 = vpack.c.bf16 %v3805_v11, %v3804_v10  ;;  %v4403_v10 = vld [vmem:[#allocation2 + $0x2a0] ss:$8 sps:$4 sm:$0xff]  }
  0x92   :  { %v4406_v11 = vld [vmem:[#allocation2 + $0xa0] ss:$8 sps:$4 sm:$0xff]  }
  0x93   :  { %3809 = vmatmul.mubr.msk.bf16.vlgmr.msra.gmra.mxu0 %vm73_vm2, %v4052_v12  ;;  %646 = vmatpush2.bf16.msra.mxu1 %v4406_v11  ;;  %v4407_v12 = vld [vmem:[#allocation2 + $0x94] ss:$8 sps:$4 sm:$0xff]  }
  0x94   :  { %1056 = vmatpush1.bf16.msra.mxu0 %v4319_v15  ;;  %v4412_v15 = vld [vmem:[#allocation2 + $0x90] ss:$8 sps:$4 sm:$0xff]   ;;  %647 = vmatprep.subr.bf16.mxu1 %v4407_v12 }
  0x95   :  { %1057 = vmatprep.subr.bf16.mxu0 %v4327_v18 }
  0x97   :  { %648 = vmatpush2.bf16.msra.mxu1 %v4412_v15 }
  0x98   :  { %1058 = vmatpush1.bf16.msra.mxu0 %v4325_v19  ;;  %1258 = vmatprep.subr.bf16.mxu1 %v4415_v16 }
  0x99   :  { %1059 = vmatprep.subr.bf16.mxu0 %v4333_v22 }
  0x9c   :  { %1060 = vmatpush1.bf16.msra.mxu0 %v4331_v23 }
  0x9d   :  { %1061 = vmatprep.subr.bf16.mxu0 %v4339_v26 }
  0xa0   :  { %1062 = vmatpush1.bf16.msra.mxu0 %v4337_v27 }
  0xa1   :  { %1063 = vmatprep.subr.bf16.mxu0 %v4345_v30 }
  0xa4   :  { %1064 = vmatpush1.bf16.msra.mxu0 %v4343_v31 }
  0xa5   :  { %1065 = vmatprep.subr.bf16.mxu0 %v4351_v34 }
  0xa8   :  { %1066 = vmatpush1.bf16.msra.mxu0 %v4349_v35 }
  0xa9   :  { %1067 = vmatprep.subr.bf16.mxu0 %v4357_v38 }
  0xac   :  { %1068 = vmatpush1.bf16.msra.mxu0 %v4355_v39 }
  0xad   :  { %1069 = vmatprep.subr.bf16.mxu0 %v4363_v42 }
  0xb0   :  { %1070 = vmatpush1.bf16.msra.mxu0 %v4361_v43 }
  0xb1   :  { %1071 = vmatprep.subr.bf16.mxu0 %v4369_v46 }
  0xb4   :  { %1072 = vmatpush2.bf16.msra.mxu0 %v4367_v47 }
  0xb5   :  { %1073 = vmatprep.subr.bf16.mxu0 %v4375_v50 }
  0xb8   :  { %1074 = vmatpush2.bf16.msra.mxu0 %v4373_v51 }
  0xb9   :  { %1075 = vmatprep.subr.bf16.mxu0 %v4381_v54 }
  0xbc   :  { %1076 = vmatpush2.bf16.msra.mxu0 %v4379_v55 }
  0xbd   :  { %1077 = vmatprep.subr.bf16.mxu0 %v4387_v58 }
  0xc0   :  { %1078 = vmatpush2.bf16.msra.mxu0 %v4385_v59 }
  0xc1   :  { %1079 = vmatprep.subr.bf16.mxu0 %v4393_v62 }
  0xc4   :  { %1080 = vmatpush2.bf16.msra.mxu0 %v4391_v63 }
  0xc5   :  { %1081 = vmatprep.subr.bf16.mxu0 %v4399_v2 }
  0xc8   :  { %1082 = vmatpush2.bf16.msra.mxu0 %v4397_v3 }
  0xc9   :  { %1083 = vmatprep.subr.bf16.mxu0 %v4405_v8 }
  0xcc   :  { %1084 = vmatpush2.bf16.msra.mxu0 %v4403_v10 }
  0xcd   :  { %1085 = vmatprep.subr.bf16.mxu0 %v4411_v13 }
  0xd0   :  { %1086 = vmatpush2.bf16.msra.mxu0 %v4409_v14 }
  0xd1   :  { %1463 = vmatprep.subr.bf16.mxu0 %v4418_v17 }
 0x153   :  { %v111_v18 = vpop.f32.mrf.mxu0 }
 0x154   :  { %v4801_v19 = vmul.f32 16.0, %v111_v18 }
 0x155   :  { %v113_v20 = vpop.f32.mrf.mxu0 }
 0x156   :  { %v124_v21 = vrot.slane %v4801_v19, 4  ;;  %v4804_v22 = vmul.f32 16.0, %v113_v20 }
 0x157   :  { %v115_v23 = vpop.f32.mrf.mxu0 }
 0x158   :  { %v125_v24 = vadd.f32 %v124_v21, %v4801_v19  ;;  %v130_v25 = vrot.slane %v4804_v22, 4  ;;  %v4808_v26 = vmul.f32 16.0, %v115_v23 }
 0x159   :  { %v117_v27 = vpop.f32.mrf.mxu0 }
 0x15a   :  { %v126_v28 = vrot.slane %v125_v24, 2  ;;  %v131_v29 = vadd.f32 %v130_v25, %v4804_v22  ;;  %v136_v30 = vrot.slane %v4808_v26, 4  ;;  %v4812_v31 = vmul.f32 16.0, %v117_v27 }
 0x15c   :  { %v127_v32 = vadd.f32 %v126_v28, %v125_v24  ;;  %v132_v33 = vrot.slane %v131_v29, 2  ;;  %v137_v34 = vadd.f32 %v136_v30, %v4808_v26  ;;  %v142_v35 = vrot.slane %v4812_v31, 4 }
 0x15e   :  { %v128_v36 = vrot.slane %v127_v32, 1  ;;  %v133_v37 = vadd.f32 %v132_v33, %v131_v29  ;;  %v138_v38 = vrot.slane %v137_v34, 2  ;;  %v143_v39 = vadd.f32 %v142_v35, %v4812_v31 }
 0x160   :  { %v129_v40 = vadd.f32 %v128_v36, %v127_v32  ;;  %v134_v41 = vrot.slane %v133_v37, 1  ;;  %v139_v42 = vadd.f32 %v138_v38, %v137_v34  ;;  %v144_v43 = vrot.slane %v143_v39, 2 }
 0x162   :  { %v149_v44 = vmul.f32 0.125, %v129_v40  ;;  %v135_v45 = vadd.f32 %v134_v41, %v133_v37  ;;  %v140_v46 = vrot.slane %v139_v42, 1  ;;  %v145_v47 = vadd.f32 %v144_v43, %v143_v39 }
 0x164   :  { %v153_v48 = vsub.f32 %v4801_v19, %v149_v44  ;;  %v150_v49 = vmul.f32 0.125, %v135_v45  ;;  %v141_v50 = vadd.f32 %v140_v46, %v139_v42  ;;  %v146_v51 = vrot.slane %v145_v47, 1 }
 0x166   :  { %v157_v52 = vmul.f32 %v153_v48, %v153_v48  ;;  %v154_v53 = vsub.f32 %v4804_v22, %v150_v49  ;;  %v151_v54 = vmul.f32 0.125, %v141_v50  ;;  %v147_v55 = vadd.f32 %v146_v51, %v145_v47 }
 0x168   :  { %v161_v56 = vrot.slane %v157_v52, 4  ;;  %v158_v57 = vmul.f32 %v154_v53, %v154_v53  ;;  %v155_v58 = vsub.f32 %v4808_v26, %v151_v54  ;;  %v152_v59 = vmul.f32 0.125, %v147_v55 }
 0x16a   :  { %v162_v60 = vadd.f32 %v161_v56, %v157_v52  ;;  %v167_v61 = vrot.slane %v158_v57, 4  ;;  %v159_v62 = vmul.f32 %v155_v58, %v155_v58  ;;  %v156_v63 = vsub.f32 %v4812_v31, %v152_v59 }
 0x16c   :  { %v163_v0 = vrot.slane %v162_v60, 2  ;;  %v168_v1 = vadd.f32 %v167_v61, %v158_v57  ;;  %v173_v2 = vrot.slane %v159_v62, 4  ;;  %v160_v3 = vmul.f32 %v156_v63, %v156_v63 }
 0x16e   :  { %v164_v4 = vadd.f32 %v163_v0, %v162_v60  ;;  %v169_v7 = vrot.slane %v168_v1, 2  ;;  %v174_v8 = vadd.f32 %v173_v2, %v159_v62  ;;  %v179_v10 = vrot.slane %v160_v3, 4 }
 0x170   :  { %v165_v11 = vrot.slane %v164_v4, 1  ;;  %v170_v12 = vadd.f32 %v169_v7, %v168_v1  ;;  %v175_v13 = vrot.slane %v174_v8, 2  ;;  %v180_v14 = vadd.f32 %v179_v10, %v160_v3 }
 0x172   :  { %v166_v15 = vadd.f32 %v165_v11, %v164_v4  ;;  %v171_v16 = vrot.slane %v170_v12, 1  ;;  %v176_v17 = vadd.f32 %v175_v13, %v174_v8  ;;  %v181_v18 = vrot.slane %v180_v14, 2 }
 0x174   :  { %v186_v20 = vmul.f32 0.14285715, %v166_v15  ;;  %v172_v21 = vadd.f32 %v171_v16, %v170_v12  ;;  %v177_v23 = vrot.slane %v176_v17, 1  ;;  %v182_v24 = vadd.f32 %v181_v18, %v180_v14  ;;  %v4413_v16 = vld [vmem:[#allocation2 + $0x180] ss:$8 sps:$4 sm:$0xff]  }
 0x175   :  { %v4416_v18 = vld [vmem:[#allocation2 + $0x380] ss:$8 sps:$4 sm:$0xff]  }
 0x176   :  { %v190_v25 = vadd.f32 0.0001, %v186_v20  ;;  %v187_v27 = vmul.f32 0.14285715, %v172_v21  ;;  %v178_v28 = vadd.f32 %v177_v23, %v176_v17  ;;  %v183_v29 = vrot.slane %v182_v24, 1 }
 0x178   :  { %v194_v30 = vmul.f32 4.0, %v190_v25  ;;  %v191_v32 = vadd.f32 0.0001, %v187_v27  ;;  %v188_v33 = vmul.f32 0.14285715, %v178_v28  ;;  %v184_v34 = vadd.f32 %v183_v29, %v182_v24 }
 0x179   :  { %v4421_v24 = vld [vmem:[#allocation2 + $0x174] ss:$8 sps:$4 sm:$0xff]  }
 0x17a   :  { %4557 = vrcp.f32 %v194_v30  ;;  %v195_v35 = vmul.f32 4.0, %v191_v32  ;;  %v192_v36 = vadd.f32 0.0001, %v188_v33  ;;  %v189_v37 = vmul.f32 0.14285715, %v184_v34 }
 0x17b   :  { %v4424_v30 = vld [vmem:[#allocation2 + $0x374] ss:$8 sps:$4 sm:$0xff]  }
 0x17c   :  { %4559 = vrcp.f32 %v195_v35  ;;  %v196_v38 = vmul.f32 4.0, %v192_v36  ;;  %v193_v39 = vadd.f32 0.0001, %v189_v37  ;;  %v4419_v36 = vld [vmem:[#allocation2 + $0x170] ss:$8 sps:$4 sm:$0xff]  }
 0x17d   :  { %v4422_v37 = vld [vmem:[#allocation2 + $0x370] ss:$8 sps:$4 sm:$0xff]  }
 0x17e   :  { %4561 = vrcp.f32 %v196_v38  ;;  %v197_v40 = vmul.f32 4.0, %v193_v39 }
 0x180   :  { %4563 = vrcp.f32 %v197_v40  ;;  %v4427_v40 = vld [vmem:[#allocation2 + $0x164] ss:$8 sps:$4 sm:$0xff]  }
 0x187   :  { %v4558_v41 = vpop.eup %4557 }
 0x188   :  { %v199_v42 = vmul.f32 %v4558_v41, %v157_v52  ;;  %v4430_v41 = vld [vmem:[#allocation2 + $0x364] ss:$8 sps:$4 sm:$0xff]  }
 0x189   :  { %v4560_v43 = vpop.eup %4559 }
 0x18a   :  { %v206_v44 = vadd.f32 0.5, %v199_v42  ;;  %v201_v45 = vmul.f32 %v4560_v43, %v158_v57 }
 0x18b   :  { %v4562_v46 = vpop.eup %4561 }
 0x18c   :  { %v3810_v47 = vmul.f32 -1.442695, %v206_v44  ;;  %v207_v48 = vadd.f32 0.5, %v201_v45  ;;  %v203_v49 = vmul.f32 %v4562_v46, %v159_v62  ;;  %v4425_v46 = vld [vmem:[#allocation2 + $0x160] ss:$8 sps:$4 sm:$0xff]  }
 0x18d   :  { %v4564_v50 = vpop.eup %4563 }
 0x18e   :  { %4565 = vpow2.f32 %v3810_v47  ;;  %v3811_v51 = vmul.f32 -1.442695, %v207_v48  ;;  %v208_v53 = vadd.f32 0.5, %v203_v49  ;;  %v205_v54 = vmul.f32 %v4564_v50, %v160_v3  ;;  %v4428_v47 = vld [vmem:[#allocation2 + $0x360] ss:$8 sps:$4 sm:$0xff]  }
 0x18f   :  { %v4433_v50 = vld [vmem:[#allocation2 + $0x154] ss:$8 sps:$4 sm:$0xff]  }
 0x190   :  { %4567 = vpow2.f32 %v3811_v51  ;;  %v3812_v55 = vmul.f32 -1.442695, %v208_v53  ;;  %v209_v56 = vadd.f32 0.5, %v205_v54  ;;  %v4436_v51 = vld [vmem:[#allocation2 + $0x354] ss:$8 sps:$4 sm:$0xff]  }
 0x192   :  { %4569 = vpow2.f32 %v3812_v55  ;;  %v3813_v58 = vmul.f32 -1.442695, %v209_v56 }
 0x194   :  { %4571 = vpow2.f32 %v3813_v58  ;;  %v4431_v58 = vld [vmem:[#allocation2 + $0x150] ss:$8 sps:$4 sm:$0xff]  }
 0x19b   :  { %v4566_v59 = vpop.eup %4565 }
 0x19c   :  { %v222_v52 = vadd.f32 1.0, %v4566_v59  ;;  %v4434_v59 = vld [vmem:[#allocation2 + $0x350] ss:$8 sps:$4 sm:$0xff]  }
 0x19d   :  { %v4568_v60 = vpop.eup %4567 }
 0x19e   :  { %4573 = vrcp.f32 %v222_v52  ;;  %v223_v57 = vadd.f32 1.0, %v4568_v60 }
 0x19f   :  { %v4570_v61 = vpop.eup %4569 }
 0x1a0   :  { %4575 = vrcp.f32 %v223_v57  ;;  %v224_v63 = vadd.f32 1.0, %v4570_v61  ;;  %v4439_v61 = vld [vmem:[#allocation2 + $0x144] ss:$8 sps:$4 sm:$0xff]  }
 0x1a1   :  { %v4572_v62 = vpop.eup %4571 }
 0x1a2   :  { %4577 = vrcp.f32 %v224_v63  ;;  %v225_v0 = vadd.f32 1.0, %v4572_v62 }
 0x1a4   :  { %4579 = vrcp.f32 %v225_v0 }
 0x1ab   :  { %v4574_v1 = vpop.eup %4573 }
 0x1ac   :  { %v4822_v2 = vmul.f32 %v4574_v1, %v4801_v19  ;;  %v4442_v1 = vld [vmem:[#allocation2 + $0x344] ss:$8 sps:$4 sm:$0xff]  }
 0x1ad   :  { %v4576_v3 = vpop.eup %4575 }
 0x1ae   :  { %5743 = vst [vmem:[#allocation6_spill] sm:$0xff] %v4822_v2  ;;  %v4825_v4 = vmul.f32 %v4576_v3, %v4804_v22  ;;  %v405_v7 = vrot.slane %v4822_v2, 4 }
 0x1af   :  { %v4578_v8 = vpop.eup %4577 }
 0x1b0   :  { %5744 = vst [vmem:[#allocation7_spill] sm:$0xff] %v4825_v4  ;;  %v4829_v10 = vmul.f32 %v4578_v8, %v4808_v26  ;;  %v411_v11 = vrot.slane %v4825_v4, 4  ;;  %v406_v12 = vadd.f32 %v405_v7, %v4822_v2  ;;  %v881_v22 = vrot.slane %v4825_v4, 1 }
 0x1b1   :  { %v4580_v13 = vpop.eup %4579  ;;  %v868_v7 = vrot.slane %v4825_v4, 7 }
 0x1b2   :  { %5745 = vst [vmem:[#allocation8_spill] sm:$0xff] %v4829_v10  ;;  %v4834_v14 = vmul.f32 %v4580_v13, %v4812_v31  ;;  %v412_v19 = vadd.f32 %v411_v11, %v4825_v4  ;;  %v407_v15 = vrot.slane %v406_v12, 2  ;;  %v417_v17 = vrot.slane %v4829_v10, 4  ;;  %v4437_v11 = vld [vmem:[#allocation2 + $0x140] ss:$8 sps:$4 sm:$0xff]  }
 0x1b3   :  { %v442_v31 = vpack.c.bf16 %v4829_v10, %v4822_v2 }
 0x1b4   :  { %5746 = vst [vmem:[#allocation9_spill] sm:$0xff] %v4834_v14  ;;  %v443_v26 = vpack.c.bf16 %v4834_v14, %v4825_v4  ;;  %v883_v20 = vrot.slane %v4834_v14, 1  ;;  %v413_v21 = vrot.slane %v412_v19, 2  ;;  %v423_v23 = vrot.slane %v4834_v14, 4 }
 0x1b5   :  { %v408_v25 = vadd.f32 %v407_v15, %v406_v12  ;;  %v418_v27 = vadd.f32 %v417_v17, %v4829_v10  ;;  %v870_v63 = vrot.slane %v4834_v14, 7  ;;  %v4440_v12 = vld [vmem:[#allocation2 + $0x340] ss:$8 sps:$4 sm:$0xff]   ;;  %v4448_v15 = vld [vmem:[#allocation2 + $0x334] ss:$8 sps:$4 sm:$0xff]  }
 0x1b6   :  { %649 = vmatprep.mubr.bf16.mxu1 %v443_v26  ;;  %1087 = vmatprep.mubr.bf16.mxu0 %v443_v26  ;;  %v3962_v29 = vpack.c.bf16 %v883_v20, %v881_v22  ;;  %v414_v32 = vadd.f32 %v413_v21, %v412_v19  ;;  %v424_v33 = vadd.f32 %v423_v23, %v4834_v14  ;;  %v4445_v19 = vld [vmem:[#allocation2 + $0x134] ss:$8 sps:$4 sm:$0xff]   ;;  %v4446_v22 = vld [vmem:[#allocation2 + $0x330] ss:$8 sps:$4 sm:$0xff]   ;;  %v4451_v17 = vld [vmem:[#allocation2 + $0x124] ss:$8 sps:$4 sm:$0xff]  }
 0x1b7   :  { %650 = vmatmul.mubr.bf16.vlgmr.msra.gmra.mxu1 %v442_v31  ;;  %1088 = vmatmul.mubr.bf16.vlgmr.msra.gmra.mxu0 %v442_v31  ;;  %v409_v34 = vrot.slane %v408_v25, 1  ;;  %v419_v35 = vrot.slane %v418_v27, 2  ;;  %v3922_v13 = vpack.c.bf16 %v870_v63, %v868_v7  ;;  %v4454_v26 = vld [vmem:[#allocation2 + $0x324] ss:$8 sps:$4 sm:$0xff]   ;;  %v4452_v20 = vld [vmem:[#allocation2 + $0x320] ss:$8 sps:$4 sm:$0xff]  }
 0x1b8   :  { %1259 = vmatpush1.bf16.msra.mxu1 %v4413_v16  ;;  %1464 = vmatpush1.bf16.msra.mxu0 %v4416_v18  ;;  %v415_v38 = vrot.slane %v414_v32, 1  ;;  %v425_v39 = vrot.slane %v424_v33, 2  ;;  %v4443_v16 = vld [vmem:[#allocation2 + $0x130] ss:$8 sps:$4 sm:$0xff]   ;;  %v4449_v18 = vld [vmem:[#allocation2 + $0x120] ss:$8 sps:$4 sm:$0xff]  }
 0x1b9   :  { %3963 = vmatprep.mubr.msk.bf16.mxu0 %vm4846_vm4, %v3962_v29  ;;  %1260 = vmatprep.subr.bf16.mxu1 %v4421_v24  ;;  %v420_v42 = vadd.f32 %v419_v35, %v418_v27  ;;  %v410_v44 = vadd.f32 %v409_v34, %v408_v25  ;;  %v4457_v21 = vld [vmem:[#allocation2 + $0x114] ss:$8 sps:$4 sm:$0xff]   ;;  %v4455_v31 = vld [vmem:[#allocation2 + $0x110] ss:$8 sps:$4 sm:$0xff]   ;;  %v4463_v25 = vld [vmem:[#allocation2 + $0x204] ss:$8 sps:$4 sm:$0xff]  }
 0x1ba   :  { %1465 = vmatprep.subr.bf16.mxu0 %v4424_v30  ;;  %v426_v43 = vadd.f32 %v425_v39, %v424_v33  ;;  %v416_v48 = vadd.f32 %v415_v38, %v414_v32  ;;  %v4460_v23 = vld [vmem:[#allocation2 + $0x314] ss:$8 sps:$4 sm:$0xff]   ;;  %v4458_v24 = vld [vmem:[#allocation2 + $0x310] ss:$8 sps:$4 sm:$0xff]   ;;  %v4466_v27 = vld [vmem:[#allocation2 + $0x404] ss:$8 sps:$4 sm:$0xff]  }
 0x1bb   :  { %v421_v45 = vrot.slane %v420_v42, 1  ;;  %v429_v55 = vmul.f32 0.125, %v410_v44  ;;  %v4461_v29 = vld [vmem:[#allocation2 + $0x200] ss:$8 sps:$4 sm:$0xff]   ;;  %v4469_v32 = vld [vmem:[#allocation2 + $0x1f4] ss:$8 sps:$4 sm:$0xff]  }
 0x1bc   :  { %1261 = vmatpush1.bf16.msra.mxu1 %v4419_v36  ;;  %1466 = vmatpush1.bf16.msra.mxu0 %v4422_v37  ;;  %v427_v49 = vrot.slane %v426_v43, 1  ;;  %v430_v52 = vmul.f32 0.125, %v416_v48  ;;  %v4464_v30 = vld [vmem:[#allocation2 + $0x400] ss:$8 sps:$4 sm:$0xff]   ;;  %v4472_v33 = vld [vmem:[#allocation2 + $0x3f4] ss:$8 sps:$4 sm:$0xff]  }
 0x1bd   :  { %1262 = vmatprep.subr.bf16.mxu1 %v4427_v40  ;;  %1467 = vmatprep.subr.bf16.mxu0 %v4430_v41  ;;  %v422_v53 = vadd.f32 %v421_v45, %v420_v42  ;;  %v4467_v34 = vld [vmem:[#allocation2 + $0x1f0] ss:$8 sps:$4 sm:$0xff]   ;;  %v4475_v36 = vld [vmem:[#allocation2 + $0x1e4] ss:$8 sps:$4 sm:$0xff]   ;;  %v4473_v38 = vld [vmem:[#allocation2 + $0x1e0] ss:$8 sps:$4 sm:$0xff]  }
 0x1be   :  { %v428_v54 = vadd.f32 %v427_v49, %v426_v43  ;;  %v4470_v35 = vld [vmem:[#allocation2 + $0x3f0] ss:$8 sps:$4 sm:$0xff]   ;;  %v4478_v37 = vld [vmem:[#allocation2 + $0x3e4] ss:$8 sps:$4 sm:$0xff]   ;;  %v4476_v39 = vld [vmem:[#allocation2 + $0x3e0] ss:$8 sps:$4 sm:$0xff]  }
 0x1bf   :  { %v431_v56 = vmul.f32 0.125, %v422_v53  ;;  %v4481_v40 = vld [vmem:[#allocation2 + $0x1d4] ss:$8 sps:$4 sm:$0xff]   ;;  %v4479_v42 = vld [vmem:[#allocation2 + $0x1d0] ss:$8 sps:$4 sm:$0xff]   ;;  %v867_v63 = vrot.slane %v4822_v2, 7 }
 0x1c0   :  { %1263 = vmatpush1.bf16.msra.mxu1 %v4425_v46  ;;  %1468 = vmatpush1.bf16.msra.mxu0 %v4428_v47  ;;  %v432_v60 = vmul.f32 0.125, %v428_v54  ;;  %v4484_v41 = vld [vmem:[#allocation2 + $0x3d4] ss:$8 sps:$4 sm:$0xff]   ;;  %v4482_v43 = vld [vmem:[#allocation2 + $0x3d0] ss:$8 sps:$4 sm:$0xff]   ;;  %v4882_v7 = vshrl.u32 %v40_v5, 7 }
 0x1c1   :  { %1264 = vmatprep.subr.bf16.mxu1 %v4433_v50  ;;  %1469 = vmatprep.subr.bf16.mxu0 %v4436_v51  ;;  %v438_v57 = vsel %vm437_vm5, %v431_v56, %v429_v55  ;;  %v4487_v44 = vld [vmem:[#allocation2 + $0x1c4] ss:$8 sps:$4 sm:$0xff]   ;;  %v4485_v46 = vld [vmem:[#allocation2 + $0x1c0] ss:$8 sps:$4 sm:$0xff]   ;;  %v4493_v48 = vld [vmem:[#allocation2 + $0x1b4] ss:$8 sps:$4 sm:$0xff]  }
 0x1c2   :  { %v439_v0 = vsel %vm437_vm5, %v432_v60, %v430_v52  ;;  %v444_v8 = vpack.c.bf16 %v438_v57, %v438_v57  ;;  %v4490_v45 = vld [vmem:[#allocation2 + $0x3c4] ss:$8 sps:$4 sm:$0xff]   ;;  %v4488_v47 = vld [vmem:[#allocation2 + $0x3c0] ss:$8 sps:$4 sm:$0xff]   ;;  %v4496_v49 = vld [vmem:[#allocation2 + $0x3b4] ss:$8 sps:$4 sm:$0xff]  }
 0x1c3   :  { %v445_v3 = vpack.c.bf16 %v439_v0, %v439_v0  ;;  %v4491_v50 = vld [vmem:[#allocation2 + $0x1b0] ss:$8 sps:$4 sm:$0xff]   ;;  %v4499_v53 = vld [vmem:[#allocation2 + $0x1a4] ss:$8 sps:$4 sm:$0xff]   ;;  %v4497_v55 = vld [vmem:[#allocation2 + $0x1a0] ss:$8 sps:$4 sm:$0xff]  }
 0x1c4   :  { %1265 = vmatpush1.bf16.msra.mxu1 %v4431_v58  ;;  %1470 = vmatpush1.bf16.msra.mxu0 %v4434_v59  ;;  %v4494_v51 = vld [vmem:[#allocation2 + $0x3b0] ss:$8 sps:$4 sm:$0xff]   ;;  %v4502_v54 = vld [vmem:[#allocation2 + $0x3a4] ss:$8 sps:$4 sm:$0xff]   ;;  %v4500_v56 = vld [vmem:[#allocation2 + $0x3a0] ss:$8 sps:$4 sm:$0xff]  }
 0x1c5   :  { %659 = vmatprep.mubr.bf16.mxu1 %v445_v3  ;;  %1266 = vmatprep.subr.bf16.mxu1 %v4439_v61  ;;  %v4505_v58 = vld [vmem:[#allocation2 + $0x194] ss:$8 sps:$4 sm:$0xff]   ;;  %v4503_v52 = vld [vmem:[#allocation2 + $0x190] ss:$8 sps:$4 sm:$0xff]   ;;  %v869_v57 = vrot.slane %v4829_v10, 7  ;;  %v882_v61 = vrot.slane %v4829_v10, 1 }
 0x1c6   :  { %660 = vmatmul.mubr.bf16.gmra.mxu1 %v444_v8  ;;  %1471 = vmatprep.subr.bf16.mxu0 %v4442_v1  ;;  %v4508_v59 = vld [vmem:[#allocation2 + $0x394] ss:$8 sps:$4 sm:$0xff]   ;;  %v4506_v60 = vld [vmem:[#allocation2 + $0x390] ss:$8 sps:$4 sm:$0xff]   ;;  %v880_v0 = vrot.slane %v4822_v2, 1 }
 0x1c7   :  { %3923 = vmatprep.mubr.msk.bf16.mxu1 %vm3921_vm8, %v3922_v13  ;;  %v3927_v1 = vpack.c.bf16 %v869_v57, %v867_v63  ;;  %v398_v13 = vld [vmem:[%s5726_s3] ss:$4 sm:$0x3]  ;;  %v4952_v57 = vld [vmem:[#allocation2 + $0x410] ss:$8 sps:$4 sm:$0xff]  }
 0x1c8   :  { %1267 = vmatpush1.bf16.msra.mxu1 %v4437_v11  ;;  %1472 = vmatpush1.bf16.msra.mxu0 %v4440_v12  ;;  %v3965_v3 = vpack.c.bf16 %v882_v61, %v880_v0  ;;  %v4885_v11 = vsub.s32 0, %v4882_v7  ;;  %v4888_v12 = vsub.s32 1, %v4882_v7  ;;  %v4956_v63 = vld [vmem:[#allocation2 + $0x504] ss:$8 sps:$4 sm:$0xff]   ;;  %v4744_v0 = vmov 1966171168  }
 0x1c9   :  { %1268 = vmatprep.subr.bf16.mxu1 %v4445_v19  ;;  %1473 = vmatprep.subr.bf16.mxu0 %v4448_v15 }
 0x1ca   :  { %v450_v19 = vrot.slane %v398_v13, %v4885_v11  ;;  %v454_v28 = vrot.slane %v398_v13, %v4888_v12 }
 0x1cc   :  { %1269 = vmatpush1.bf16.msra.mxu1 %v4443_v16  ;;  %1474 = vmatpush1.bf16.msra.mxu0 %v4446_v22  ;;  %v4895_v22 = vld [vmem:[#allocation2 + $0x480] ss:$8 sps:$4 sm:$0xff]  }
 0x1cd   :  { %1270 = vmatprep.subr.bf16.mxu1 %v4451_v17  ;;  %1475 = vmatprep.subr.bf16.mxu0 %v4454_v26  ;;  %v4897_v17 = vld [vmem:[#allocation2 + $0x484] ss:$8 sps:$4 sm:$0xff]  }
 0x1d0   :  { %1271 = vmatpush1.bf16.msra.mxu1 %v4449_v18  ;;  %1476 = vmatpush1.bf16.msra.mxu0 %v4452_v20  ;;  %v4899_v18 = vld [vmem:[#allocation2 + $0x474] ss:$8 sps:$4 sm:$0xff]  }
 0x1d1   :  { %1272 = vmatprep.subr.bf16.mxu1 %v4457_v21  ;;  %1477 = vmatprep.subr.bf16.mxu0 %v4460_v23  ;;  %v4904_v23 = vld [vmem:[#allocation2 + $0x470] ss:$8 sps:$4 sm:$0xff]  }
 0x1d4   :  { %1273 = vmatpush1.bf16.msra.mxu1 %v4455_v31  ;;  %1478 = vmatpush1.bf16.msra.mxu0 %v4458_v24 }
 0x1d5   :  { %1274 = vmatprep.subr.bf16.mxu1 %v4463_v25  ;;  %1479 = vmatprep.subr.bf16.mxu0 %v4466_v27  ;;  %v4908_v27 = vld [vmem:[#allocation2 + $0x464] ss:$8 sps:$4 sm:$0xff]  }
 0x1d8   :  { %1275 = vmatpush2.bf16.msra.mxu1 %v4461_v29  ;;  %1480 = vmatpush2.bf16.msra.mxu0 %v4464_v30 }
 0x1d9   :  { %1276 = vmatprep.subr.bf16.mxu1 %v4469_v32  ;;  %1481 = vmatprep.subr.bf16.mxu0 %v4472_v33 }
 0x1dc   :  { %1277 = vmatpush2.bf16.msra.mxu1 %v4467_v34  ;;  %1482 = vmatpush2.bf16.msra.mxu0 %v4470_v35  ;;  %v4912_v35 = vld [vmem:[#allocation2 + $0x460] ss:$8 sps:$4 sm:$0xff]  }
 0x1dd   :  { %1278 = vmatprep.subr.bf16.mxu1 %v4475_v36  ;;  %1483 = vmatprep.subr.bf16.mxu0 %v4478_v37 }
 0x1e0   :  { %1279 = vmatpush2.bf16.msra.mxu1 %v4473_v38  ;;  %1484 = vmatpush2.bf16.msra.mxu0 %v4476_v39  ;;  %v4916_v38 = vld [vmem:[#allocation2 + $0x454] ss:$8 sps:$4 sm:$0xff]  }
 0x1e1   :  { %1280 = vmatprep.subr.bf16.mxu1 %v4481_v40  ;;  %1485 = vmatprep.subr.bf16.mxu0 %v4484_v41  ;;  %v4920_v41 = vld [vmem:[#allocation2 + $0x450] ss:$8 sps:$4 sm:$0xff]  }
 0x1e4   :  { %1281 = vmatpush2.bf16.msra.mxu1 %v4479_v42  ;;  %1486 = vmatpush2.bf16.msra.mxu0 %v4482_v43  ;;  %v4924_v42 = vld [vmem:[#allocation2 + $0x444] ss:$8 sps:$4 sm:$0xff]   ;;  %v4928_v43 = vld [vmem:[#allocation2 + $0x440] ss:$8 sps:$4 sm:$0xff]  }
 0x1e5   :  { %1282 = vmatprep.subr.bf16.mxu1 %v4487_v44  ;;  %1487 = vmatprep.subr.bf16.mxu0 %v4490_v45  ;;  %v4932_v44 = vld [vmem:[#allocation2 + $0x434] ss:$8 sps:$4 sm:$0xff]   ;;  %v4936_v45 = vld [vmem:[#allocation2 + $0x430] ss:$8 sps:$4 sm:$0xff]  }
 0x1e8   :  { %1283 = vmatpush2.bf16.msra.mxu1 %v4485_v46  ;;  %1488 = vmatpush2.bf16.msra.mxu0 %v4488_v47  ;;  %v4940_v47 = vld [vmem:[#allocation2 + $0x424] ss:$8 sps:$4 sm:$0xff]  }
 0x1e9   :  { %1284 = vmatprep.subr.bf16.mxu1 %v4493_v48  ;;  %1489 = vmatprep.subr.bf16.mxu0 %v4496_v49 }
 0x1ec   :  { %1285 = vmatpush2.bf16.msra.mxu1 %v4491_v50  ;;  %1490 = vmatpush2.bf16.msra.mxu0 %v4494_v51 }
 0x1ed   :  { %1286 = vmatprep.subr.bf16.mxu1 %v4499_v53  ;;  %1491 = vmatprep.subr.bf16.mxu0 %v4502_v54  ;;  %v4944_v53 = vld [vmem:[#allocation2 + $0x420] ss:$8 sps:$4 sm:$0xff]  }
 0x1f0   :  { %1287 = vmatpush2.bf16.msra.mxu1 %v4497_v55  ;;  %1492 = vmatpush2.bf16.msra.mxu0 %v4500_v56  ;;  %v4948_v55 = vld [vmem:[#allocation2 + $0x414] ss:$8 sps:$4 sm:$0xff]  }
 0x1f1   :  { %1288 = vmatprep.subr.bf16.mxu1 %v4505_v58  ;;  %1493 = vmatprep.subr.bf16.mxu0 %v4508_v59 }
 0x1f4   :  { %1289 = vmatpush2.bf16.msra.mxu1 %v4503_v52  ;;  %1494 = vmatpush2.bf16.msra.mxu0 %v4506_v60 }
 0x1f5   :  { %1763 = vmatprep.subr.bf16.mxu1 %v4897_v17  ;;  %1895 = vmatprep.subr.bf16.mxu0 %v4897_v17 }
 0x1f7   :  { %3928 = vmatmul.mubr.msk.bf16.vlgmr.msra.gmra.mxu1 %vm3921_vm8, %v3927_v1  ;;  %3966 = vmatmul.mubr.msk.bf16.vlgmr.msra.gmra.mxu0 %vm4846_vm4, %v3965_v3  ;;  %v712_v1 = vunpack.c.l.s4 %v4744_v0  ;;  %v4960_v3 = vld [vmem:[#allocation2 + $0x500] ss:$8 sps:$4 sm:$0xff]  }
 0x1f8   :  { %1764 = vmatpush1.bf16.msra.mxu1 %v4895_v22  ;;  %1896 = vmatpush1.bf16.msra.mxu0 %v4895_v22 }
 0x1f9   :  { %1765 = vmatprep.subr.bf16.mxu1 %v4899_v18  ;;  %1897 = vmatprep.subr.bf16.mxu0 %v4899_v18 }
 0x1fc   :  { %1766 = vmatpush1.bf16.msra.mxu1 %v4904_v23  ;;  %1898 = vmatpush1.bf16.msra.mxu0 %v4904_v23 }
 0x1fd   :  { %1767 = vmatprep.subr.bf16.mxu1 %v4908_v27  ;;  %1899 = vmatprep.subr.bf16.mxu0 %v4908_v27 }
 0x200   :  { %1768 = vmatpush1.bf16.msra.mxu1 %v4912_v35  ;;  %1900 = vmatpush1.bf16.msra.mxu0 %v4912_v35 }
 0x201   :  { %1769 = vmatprep.subr.bf16.mxu1 %v4916_v38  ;;  %1901 = vmatprep.subr.bf16.mxu0 %v4916_v38 }
 0x204   :  { %1770 = vmatpush1.bf16.msra.mxu1 %v4920_v41  ;;  %1902 = vmatpush1.bf16.msra.mxu0 %v4920_v41 }
 0x205   :  { %1771 = vmatprep.subr.bf16.mxu1 %v4924_v42  ;;  %1903 = vmatprep.subr.bf16.mxu0 %v4924_v42 }
 0x208   :  { %1772 = vmatpush1.bf16.msra.mxu1 %v4928_v43  ;;  %1904 = vmatpush1.bf16.msra.mxu0 %v4928_v43 }
 0x209   :  { %1773 = vmatprep.subr.bf16.mxu1 %v4932_v44  ;;  %1905 = vmatprep.subr.bf16.mxu0 %v4932_v44 }
 0x20c   :  { %1774 = vmatpush1.bf16.msra.mxu1 %v4936_v45  ;;  %1906 = vmatpush1.bf16.msra.mxu0 %v4936_v45 }
 0x20d   :  { %1775 = vmatprep.subr.bf16.mxu1 %v4940_v47  ;;  %1907 = vmatprep.subr.bf16.mxu0 %v4940_v47 }
 0x210   :  { %1776 = vmatpush1.bf16.msra.mxu1 %v4944_v53  ;;  %1908 = vmatpush1.bf16.msra.mxu0 %v4944_v53 }
 0x211   :  { %1777 = vmatprep.subr.bf16.mxu1 %v4948_v55  ;;  %1909 = vmatprep.subr.bf16.mxu0 %v4948_v55 }
 0x214   :  { %1778 = vmatpush1.bf16.msra.mxu1 %v4952_v57  ;;  %1910 = vmatpush1.bf16.msra.mxu0 %v4952_v57 }
 0x215   :  { %1779 = vmatprep.subr.bf16.mxu1 %v4956_v63  ;;  %1911 = vmatprep.subr.bf16.mxu0 %v4956_v63 }
 0x218   :  { %1780 = vmatpush2.bf16.msra.mxu1 %v4960_v3  ;;  %1912 = vmatpush2.bf16.msra.mxu0 %v4960_v3 }
 0x277   :  { %v651_v8 = vpop.f32.mrf.mxu1 }
 0x278   :  { %v652_v16 = vadd.f32 %v651_v8, %v450_v19  ;;  %v713_v8 = vunpack.c.0.s8 %v712_v1 }
 0x279   :  { %v653_v62 = vpop.f32.mrf.mxu1 }
 0x27a   :  { %v654_v5 = vadd.f32 %v653_v62, %v454_v28  ;;  %v3849_v21 = vmul.f32 -1.442695, %v652_v16  ;;  %v716_v62 = vsub.s32 %v713_v8, %v4882_v7 }
 0x27b   :  { %v655_v15 = vpop.f32.mrf.mxu1 }
 0x27c   :  { %v656_v20 = vadd.f32 %v655_v15, %v450_v19  ;;  %v3850_v31 = vmul.f32 -1.442695, %v654_v5  ;;  %4581 = vpow2.f32 %v3849_v21 }
 0x27d   :  { %v657_v26 = vpop.f32.mrf.mxu1 }
 0x27e   :  { %v658_v24 = vadd.f32 %v657_v26, %v454_v28  ;;  %v3851_v30 = vmul.f32 -1.442695, %v656_v20  ;;  %4583 = vpow2.f32 %v3850_v31 }
 0x280   :  { %v3852_v36 = vmul.f32 -1.442695, %v658_v24 }
 0x286   :  { %v661_v25 = vpop.f32.mrf.mxu1 }
 0x287   :  { %v662_v29 = vadd.f32 %v661_v25, %v450_v19 }
 0x288   :  { %v663_v32 = vpop.f32.mrf.mxu1 }
 0x289   :  { %v3853_v33 = vmul.f32 -1.442695, %v662_v29  ;;  %v664_v34 = vadd.f32 %v663_v32, %v454_v28  ;;  %v4582_v46 = vpop.eup %4581 }
 0x28a   :  { %v665_v37 = vpop.f32.mrf.mxu1  ;;  %v680_v58 = vadd.f32 1.0, %v4582_v46 }
 0x28b   :  { %4585 = vpow2.f32 %v3853_v33  ;;  %v3854_v39 = vmul.f32 -1.442695, %v664_v34  ;;  %v4584_v48 = vpop.eup %4583 }
 0x28c   :  { %4587 = vpow2.f32 %v3851_v30  ;;  %v666_v40 = vpop.f32.mrf.mxu1  ;;  %v681_v52 = vadd.f32 1.0, %v4584_v48 }
 0x28d   :  { %4589 = vpow2.f32 %v3854_v39 }
 0x28e   :  { %4591 = vpow2.f32 %v3852_v36 }
 0x298   :  { %v4586_v49 = vpop.eup %4585 }
 0x299   :  { %v4588_v50 = vpop.eup %4587  ;;  %v702_v51 = vadd.f32 1.0, %v4586_v49 }
 0x29a   :  { %v4590_v54 = vpop.eup %4589  ;;  %v682_v60 = vadd.f32 1.0, %v4588_v50 }
 0x29b   :  { %v4592_v56 = vpop.eup %4591  ;;  %v703_v59 = vadd.f32 1.0, %v4590_v54  ;;  %4593 = vrcp.f32 %v702_v51 }
 0x29c   :  { %v683_v61 = vadd.f32 1.0, %v4592_v56 }
 0x29d   :  { %4595 = vrcp.f32 %v703_v59 }
 0x29e   :  { %4597 = vrcp.f32 %v680_v58 }
 0x29f   :  { %4599 = vrcp.f32 %v681_v52 }
 0x2a0   :  { %4601 = vrcp.f32 %v682_v60 }
 0x2a1   :  { %4603 = vrcp.f32 %v683_v61  ;;  %v4976_v61 = vpop.f32.mrf.mxu0 }
 0x2a8   :  { %v4594_v13 = vpop.eup %4593 }
 0x2aa   :  { %v4596_v19 = vpop.eup %4595 }
 0x2ab   :  { %v710_v28 = vcombine.low %v4594_v13, %v4596_v19  ;;  %v4598_v15 = vpop.eup %4597 }
 0x2ac   :  { %v4600_v16 = vpop.eup %4599  ;;  %v692_v24 = vmul.f32 %v4598_v15, %v4822_v2 }
 0x2ad   :  { %v717_v5 = vrot.slane %v710_v28, %v716_v62  ;;  %v4602_v26 = vpop.eup %4601  ;;  %v693_v25 = vmul.f32 %v4600_v16, %v4825_v4  ;;  %v1091_v16 = vpop.f32.mrf.mxu0 }
 0x2ae   :  { %v4604_v20 = vpop.eup %4603  ;;  %v694_v7 = vmul.f32 %v4602_v26, %v4829_v10 }
 0x2af   :  { %v718_v21 = vcombine.high %v717_v5, %v717_v5  ;;  %v725_v31 = vrot.slane %v717_v5, %v716_v62  ;;  %v695_v33 = vmul.f32 %v4604_v20, %v4834_v14 }
 0x2b1   :  { %v732_v29 = vrot.slane %v718_v21, %v716_v62  ;;  %v736_v30 = vrot.slane %v725_v31, %v4885_v11  ;;  %v740_v32 = vrot.slane %v725_v31, %v4888_v12 }
 0x2b3   :  { %v744_v34 = vrot.slane %v732_v29, %v4885_v11  ;;  %v748_v36 = vrot.slane %v732_v29, %v4888_v12  ;;  %v753_v37 = vmul.f32 %v736_v30, %v692_v24  ;;  %v754_v39 = vmul.f32 %v740_v32, %v693_v25  ;;  %v1093_v30 = vpop.f32.mrf.mxu0 }
 0x2b5   :  { %v755_v40 = vmul.f32 %v744_v34, %v694_v7  ;;  %v756_v46 = vmul.f32 %v748_v36, %v695_v33  ;;  %v757_v48 = vrot.slane %v753_v37, 4  ;;  %v763_v49 = vrot.slane %v754_v39, 4 }
 0x2b7   :  { %v758_v50 = vadd.f32 %v757_v48, %v753_v37  ;;  %v764_v51 = vadd.f32 %v763_v49, %v754_v39  ;;  %v769_v54 = vrot.slane %v755_v40, 4  ;;  %v775_v56 = vrot.slane %v756_v46, 4  ;;  %v1292_v32 = vpop.f32.mrf.mxu1 }
 0x2b9   :  { %v759_v58 = vrot.slane %v758_v50, 2  ;;  %v765_v59 = vrot.slane %v764_v51, 2  ;;  %v770_v52 = vadd.f32 %v769_v54, %v755_v40  ;;  %v776_v60 = vadd.f32 %v775_v56, %v756_v46  ;;  %v1095_v54 = vpop.f32.mrf.mxu0  ;;  %v1294_v56 = vpop.f32.mrf.mxu1 }
 0x2bb   :  { %v760_v0 = vadd.f32 %v759_v58, %v758_v50  ;;  %v766_v1 = vadd.f32 %v765_v59, %v764_v51  ;;  %v771_v8 = vrot.slane %v770_v52, 2  ;;  %v777_v13 = vrot.slane %v776_v60, 2 }
 0x2bd   :  { %v761_v62 = vrot.slane %v760_v0, 1  ;;  %v767_v19 = vrot.slane %v766_v1, 1  ;;  %v772_v28 = vadd.f32 %v771_v8, %v770_v52  ;;  %v778_v15 = vadd.f32 %v777_v13, %v776_v60 }
 0x2bf   :  { %v762_v5 = vadd.f32 %v761_v62, %v760_v0  ;;  %v768_v26 = vadd.f32 %v767_v19, %v766_v1  ;;  %v773_v20 = vrot.slane %v772_v28, 1  ;;  %v779_v21 = vrot.slane %v778_v15, 1  ;;  %v1296_v1 = vpop.f32.mrf.mxu1 }
 0x2c1   :  { %v774_v31 = vadd.f32 %v773_v20, %v772_v28  ;;  %v780_v24 = vadd.f32 %v779_v21, %v778_v15  ;;  %v781_v25 = vmul.f32 0.125, %v762_v5  ;;  %v782_v29 = vmul.f32 0.125, %v768_v26  ;;  %v1298_v21 = vpop.f32.mrf.mxu1 }
 0x2c3   :  { %v783_v7 = vmul.f32 0.125, %v774_v31  ;;  %v784_v33 = vmul.f32 0.125, %v780_v24  ;;  %v4978_v34 = vsub.f32 %v753_v37, %v781_v25  ;;  %v4980_v36 = vsub.f32 %v754_v39, %v782_v29 }
 0x2c5   :  { %v4982_v48 = vsub.f32 %v755_v40, %v783_v7  ;;  %v4984_v49 = vsub.f32 %v756_v46, %v784_v33  ;;  %v789_v50 = vmul.f32 %v4978_v34, %v4978_v34  ;;  %v790_v51 = vmul.f32 %v4980_v36, %v4980_v36  ;;  %v1497_v40 = vpop.f32.mrf.mxu0 }
 0x2c7   :  { %v791_v58 = vmul.f32 %v4982_v48, %v4982_v48  ;;  %v792_v37 = vmul.f32 %v4984_v49, %v4984_v49  ;;  %v793_v39 = vrot.slane %v789_v50, 4  ;;  %v799_v59 = vrot.slane %v790_v51, 4  ;;  %v1499_v28 = vpop.f32.mrf.mxu0 }
 0x2c9   :  { %v794_v52 = vadd.f32 %v793_v39, %v789_v50  ;;  %v800_v46 = vadd.f32 %v799_v59, %v790_v51  ;;  %v805_v60 = vrot.slane %v791_v58, 4  ;;  %v811_v0 = vrot.slane %v792_v37, 4  ;;  %v1501_v7 = vpop.f32.mrf.mxu0 }
 0x2ca   :  { %v1299_v59 = vadd.f32 %v1298_v21, %v1095_v54 }
 0x2cb   :  { %v795_v8 = vrot.slane %v794_v52, 2  ;;  %v801_v13 = vrot.slane %v800_v46, 2  ;;  %v806_v62 = vadd.f32 %v805_v60, %v791_v58  ;;  %v812_v19 = vadd.f32 %v811_v0, %v792_v37 }
 0x2cc   :  { %v1295_v60 = vadd.f32 %v1294_v56, %v1091_v16  ;;  %v3815_v56 = vld [vmem:[%s5726_s3 + $0x2] ss:$4 sm:$0x3] }
 0x2cd   :  { %v796_v15 = vadd.f32 %v795_v8, %v794_v52  ;;  %v802_v5 = vadd.f32 %v801_v13, %v800_v46  ;;  %v807_v26 = vrot.slane %v806_v62, 2  ;;  %v813_v20 = vrot.slane %v812_v19, 2  ;;  %v1503_v46 = vpop.f32.mrf.mxu0 }
 0x2ce   :  { %v1297_v52 = vadd.f32 %v1296_v1, %v1093_v30 }
 0x2cf   :  { %v797_v31 = vrot.slane %v796_v15, 1  ;;  %v803_v24 = vrot.slane %v802_v5, 1  ;;  %v808_v25 = vadd.f32 %v807_v26, %v806_v62  ;;  %v814_v29 = vadd.f32 %v813_v20, %v812_v19  ;;  %v3814_v19 = vld [vmem:[%s5726_s3 + $0x1] ss:$4 sm:$0x3] }
 0x2d0   :  { %v1293_v62 = vadd.f32 %v1292_v32, %v4976_v61  ;;  %v1507_v26 = vadd.f32 %v1499_v28, %v1295_v60  ;;  %v1518_v20 = vrot.slane %v3814_v19, %v4888_v12  ;;  %v1508_v16 = vadd.f32 %v1501_v7, %v1297_v52 }
 0x2d1   :  { %v798_v33 = vadd.f32 %v797_v31, %v796_v15  ;;  %v804_v50 = vadd.f32 %v803_v24, %v802_v5  ;;  %v809_v51 = vrot.slane %v808_v25, 1  ;;  %v815_v39 = vrot.slane %v814_v29, 1  ;;  %v3816_v31 = vld [vmem:[%s5726_s3 + $0x3] ss:$4 sm:$0x3] }
 0x2d2   :  { %v1509_v15 = vadd.f32 %v1503_v46, %v1299_v59  ;;  %v5002_v61 = vadd.f32 %v1518_v20, %v1507_v26  ;;  %v829_v24 = vrot.slane %v3815_v56, %v4888_v12 }
 0x2d3   :  { %v810_v9 = vadd.f32 %v809_v51, %v808_v25  ;;  %v816_v6 = vadd.f32 %v815_v39, %v814_v29  ;;  %v817_v58 = vmul.f32 0.125, %v798_v33  ;;  %v818_v37 = vmul.f32 0.125, %v804_v50 }
 0x2d4   :  { %v5000_v30 = vadd.f32 %v1518_v20, %v1509_v15  ;;  %5752 = vst [vmem:[#allocation11_spill] sm:$0xff] %v5002_v61  ;;  %v852_v33 = vrot.slane %v3816_v31, %v4885_v11  ;;  %v833_v59 = vmul.f32 %v829_v24, %v4980_v36 }
 0x2d5   :  { %v819_v0 = vmul.f32 0.125, %v810_v9  ;;  %v820_v8 = vmul.f32 0.125, %v816_v6  ;;  %v836_v13 = vadd.f32 1e-05, %v817_v58  ;;  %v837_v10 = vadd.f32 1e-05, %v818_v37 }
 0x2d6   :  { %v1506_v9 = vadd.f32 %v1497_v40, %v1293_v62  ;;  %v1514_v6 = vrot.slane %v3814_v19, %v4885_v11  ;;  %5751 = vst [vmem:[#allocation10_spill] sm:$0xff] %v5000_v30  ;;  %v1836_v28 = vrot.slane %v5000_v30, 4  ;;  %v1824_v40 = vrot.slane %v5002_v61, 4 }
 0x2d7   :  { %v838_v5 = vadd.f32 1e-05, %v819_v0  ;;  %v839_v54 = vadd.f32 1e-05, %v820_v8  ;;  %4605 = vrsqrt.f32 %v836_v13  ;;  %v856_v58 = vrot.slane %v3816_v31, %v4888_v12 }
 0x2d8   :  { %4607 = vrsqrt.f32 %v837_v10  ;;  %v5004_v32 = vadd.f32 %v1514_v6, %v1508_v16  ;;  %v5009_v1 = vadd.f32 %v1514_v6, %v1506_v9  ;;  %v825_v10 = vrot.slane %v3815_v56, %v4885_v11 }
 0x2d9   :  { %4609 = vrsqrt.f32 %v838_v5  ;;  %v1837_v29 = vadd.f32 %v1836_v28, %v5000_v30  ;;  %v1825_v51 = vadd.f32 %v1824_v40, %v5002_v61 }
 0x2da   :  { %4611 = vrsqrt.f32 %v839_v54  ;;  %5753 = vst [vmem:[#allocation12_spill] sm:$0xff] %v5009_v1  ;;  %v1830_v21 = vrot.slane %v5004_v32, 4  ;;  %v1818_v25 = vrot.slane %v5009_v1, 4  ;;  %v832_v7 = vmul.f32 %v825_v10, %v4978_v34 }
 0x2db   :  { %v834_v60 = vmul.f32 %v825_v10, %v4982_v48  ;;  %v1838_v8 = vrot.slane %v1837_v29, 2  ;;  %v835_v34 = vmul.f32 %v829_v24, %v4984_v49  ;;  %v1826_v5 = vrot.slane %v1825_v51, 2 }
 0x2dc   :  { %v1831_v39 = vadd.f32 %v1830_v21, %v5004_v32  ;;  %v1819_v0 = vadd.f32 %v1818_v25, %v5009_v1 }
 0x2dd   :  { %v1839_v16 = vadd.f32 %v1838_v8, %v1837_v29  ;;  %v1827_v28 = vadd.f32 %v1826_v5, %v1825_v51 }
 0x2de   :  { %v1832_v54 = vrot.slane %v1831_v39, 2  ;;  %v1820_v20 = vrot.slane %v1819_v0, 2 }
 0x2e0   :  { %v1833_v10 = vadd.f32 %v1832_v54, %v1831_v39  ;;  %v1821_v25 = vadd.f32 %v1820_v20, %v1819_v0 }
 0x2e4   :  { %v4606_v50 = vpop.eup %4605 }
 0x2e5   :  { %v4608_v37 = vpop.eup %4607  ;;  %v844_v52 = vmul.f32 %v4606_v50, %v832_v7 }
 0x2e6   :  { %v4610_v46 = vpop.eup %4609  ;;  %v845_v13 = vmul.f32 %v4608_v37, %v833_v59 }
 0x2e7   :  { %v4612_v62 = vpop.eup %4611  ;;  %v846_v19 = vmul.f32 %v4610_v46, %v834_v60  ;;  %v5030_v15 = vadd.f32 %v852_v33, %v844_v52  ;;  %v1828_v60 = vrot.slane %v1827_v28, 1  ;;  %v1834_v52 = vrot.slane %v1833_v10, 1 }
 0x2e8   :  { %v847_v36 = vmul.f32 %v4612_v62, %v835_v34  ;;  %v5032_v26 = vadd.f32 %v856_v58, %v845_v13  ;;  %v1822_v34 = vrot.slane %v1821_v25, 1 }
 0x2e9   :  { %v5034_v12 = vadd.f32 %v852_v33, %v846_v19  ;;  %v1525_v48 = vrot.slane %v5030_v15, 4  ;;  %v1840_v33 = vrot.slane %v1839_v16, 1  ;;  %v1829_v54 = vadd.f32 %v1828_v60, %v1827_v28 }
 0x2ea   :  { %v5037_v9 = vadd.f32 %v856_v58, %v847_v36  ;;  %v1531_v49 = vrot.slane %v5032_v26, 4  ;;  %v1835_v36 = vadd.f32 %v1834_v52, %v1833_v10  ;;  %v5074_v52 = vld [vmem:[#allocation2 + $0x4f4] ss:$8 sps:$4 sm:$0xff]  }
 0x2eb   :  { %v1526_v6 = vadd.f32 %v1525_v48, %v5030_v15  ;;  %v1537_v56 = vrot.slane %v5034_v12, 4  ;;  %v1841_v13 = vadd.f32 %v1840_v33, %v1839_v16  ;;  %v5056_v16 = vmul.f32 0.125, %v1829_v54  ;;  %1781 = vmatprep.subr.bf16.mxu1 %v5074_v52  ;;  %1913 = vmatprep.subr.bf16.mxu0 %v5074_v52  ;;  %v5115_v54 = vld [vmem:[#allocation2 + $0x4a0] ss:$8 sps:$4 sm:$0xff]  }
 0x2ec   :  { %5754 = vst [vmem:[#allocation13_spill] sm:$0xff] %v5037_v9  ;;  %v1532_v40 = vadd.f32 %v1531_v49, %v5032_v26  ;;  %v1543_v21 = vrot.slane %v5037_v9, 4  ;;  %v1823_v49 = vadd.f32 %v1822_v34, %v1821_v25  ;;  %v5092_v34 = vld [vmem:[#allocation2 + $0x4d4] ss:$8 sps:$4 sm:$0xff]  }
 0x2ed   :  { %v1527_v31 = vrot.slane %v1526_v6, 2  ;;  %v1538_v24 = vadd.f32 %v1537_v56, %v5034_v12 }
 0x2ee   :  { %v1533_v7 = vrot.slane %v1532_v40, 2  ;;  %v1544_v29 = vadd.f32 %v1543_v21, %v5037_v9 }
 0x2ef   :  { %v1528_v50 = vadd.f32 %v1527_v31, %v1526_v6  ;;  %v1539_v59 = vrot.slane %v1538_v24, 2  ;;  %v5046_v6 = vmul.f32 0.125, %v1841_v13  ;;  %v5094_v13 = vld [vmem:[#allocation2 + $0x4c4] ss:$8 sps:$4 sm:$0xff]  }
 0x2f0   :  { %v1534_v58 = vadd.f32 %v1533_v7, %v1532_v40  ;;  %v1545_v37 = vrot.slane %v1544_v29, 2  ;;  %v5066_v7 = vmul.f32 0.125, %v1823_v49 }
 0x2f1   :  { %v1529_v51 = vrot.slane %v1528_v50, 1  ;;  %v1540_v39 = vadd.f32 %v1539_v59, %v1538_v24  ;;  %v5058_v24 = vmul.f32 0.125, %v1835_v36  ;;  %v5119_v36 = vld [vmem:[#allocation2 + $0x494] ss:$8 sps:$4 sm:$0xff]  }
 0x2f2   :  { %v1535_v46 = vrot.slane %v1534_v58, 1  ;;  %v1546_v8 = vadd.f32 %v1545_v37, %v1544_v29  ;;  %v1851_v29 = vsel %vm437_vm5, %v5046_v6, %v5056_v16 }
 0x2f3   :  { %v1530_v62 = vadd.f32 %v1529_v51, %v1528_v50  ;;  %v1541_v19 = vrot.slane %v1540_v39, 1  ;;  %v1850_v59 = vsel %vm437_vm5, %v5058_v24, %v5066_v7  ;;  %v5076_v51 = vld [vmem:[#allocation2 + $0x4f0] ss:$8 sps:$4 sm:$0xff]  }
 0x2f4   :  { %v1536_v5 = vadd.f32 %v1535_v46, %v1534_v58  ;;  %v1547_v0 = vrot.slane %v1546_v8, 1  ;;  %v1855_v58 = vsel %vm1561_vm9, %v1851_v29, -inf  ;;  %v1854_v37 = vsel %vm1561_vm9, %v1850_v59, -inf  ;;  %1782 = vmatpush2.bf16.msra.mxu1 %v5076_v51  ;;  %1914 = vmatpush2.bf16.msra.mxu0 %v5076_v51  ;;  %v5084_v46 = vld [vmem:[#allocation2 + $0x4e0] ss:$8 sps:$4 sm:$0xff]  }
 0x2f5   :  { %v1542_v48 = vadd.f32 %v1541_v19, %v1540_v39  ;;  %v5048_v56 = vmul.f32 0.125, %v1530_v62  ;;  %v1856_v60 = vmax.f32 %v1854_v37, %v1855_v58  ;;  %v5082_v39 = vld [vmem:[#allocation2 + $0x4e4] ss:$8 sps:$4 sm:$0xff]   ;;  %v5099_v62 = vld [vmem:[#allocation2 + $0x4c0] ss:$8 sps:$4 sm:$0xff]  }
 0x2f6   :  { %v1548_v20 = vadd.f32 %v1547_v0, %v1546_v8  ;;  %v5052_v21 = vmul.f32 0.125, %v1536_v5  ;;  %1783 = vmatprep.subr.bf16.mxu1 %v5082_v39  ;;  %1915 = vmatprep.subr.bf16.mxu0 %v5082_v39  ;;  %v5090_v8 = vld [vmem:[#allocation2 + $0x4d0] ss:$8 sps:$4 sm:$0xff]   ;;  %v5103_v19 = vld [vmem:[#allocation2 + $0x4b4] ss:$8 sps:$4 sm:$0xff]  }
 0x2f7   :  { %v5050_v40 = vmul.f32 0.125, %v1542_v48  ;;  %v5107_v5 = vld [vmem:[#allocation2 + $0x4b0] ss:$8 sps:$4 sm:$0xff]   ;;  %v5111_v0 = vld [vmem:[#allocation2 + $0x4a4] ss:$8 sps:$4 sm:$0xff]  }
 0x2f8   :  { %v5054_v31 = vmul.f32 0.125, %v1548_v20  ;;  %1784 = vmatpush2.bf16.msra.mxu1 %v5084_v46  ;;  %1916 = vmatpush2.bf16.msra.mxu0 %v5084_v46  ;;  %v5123_v48 = vld [vmem:[#allocation2 + $0x490] ss:$8 sps:$4 sm:$0xff]  }
 0x2f9   :  { %v1557_v28 = vsel %vm437_vm5, %v5050_v40, %v5048_v56  ;;  %1785 = vmatprep.subr.bf16.mxu1 %v5092_v34  ;;  %1917 = vmatprep.subr.bf16.mxu0 %v5092_v34 }
 0x2fa   :  { %v1558_v10 = vsel %vm437_vm5, %v5054_v31, %v5052_v21  ;;  %v1562_v25 = vsel %vm1561_vm9, %v1557_v28, -inf }
 0x2fb   :  { %v1563_v33 = vsel %vm1561_vm9, %v1558_v10, -inf }
 0x2fc   :  { %v1564_v50 = vmax.f32 %v1562_v25, %v1563_v33  ;;  %1786 = vmatpush2.bf16.msra.mxu1 %v5090_v8  ;;  %1918 = vmatpush2.bf16.msra.mxu0 %v5090_v8 }
 0x2fd   :  { %1787 = vmatprep.subr.bf16.mxu1 %v5094_v13  ;;  %1919 = vmatprep.subr.bf16.mxu0 %v5094_v13 }
 0x2fe   :  { %1565 = vmax.xlane.f32.xlu1 %v1564_v50 }
 0x300   :  { %1788 = vmatpush2.bf16.msra.mxu1 %v5099_v62  ;;  %1920 = vmatpush2.bf16.msra.mxu0 %v5099_v62 }
 0x301   :  { %1789 = vmatprep.subr.bf16.mxu1 %v5103_v19  ;;  %1921 = vmatprep.subr.bf16.mxu0 %v5103_v19 }
 0x302   :  { %1857 = vmax.xlane.f32.xlu1 %v1856_v60 }
 0x304   :  { %1790 = vmatpush2.bf16.msra.mxu1 %v5107_v5  ;;  %1922 = vmatpush2.bf16.msra.mxu0 %v5107_v5 }
 0x305   :  { %1791 = vmatprep.subr.bf16.mxu1 %v5111_v0  ;;  %1923 = vmatprep.subr.bf16.mxu0 %v5111_v0 }
 0x308   :  { %1792 = vmatpush2.bf16.msra.mxu1 %v5115_v54  ;;  %1924 = vmatpush2.bf16.msra.mxu0 %v5115_v54 }
 0x309   :  { %1793 = vmatprep.subr.bf16.mxu1 %v5119_v36  ;;  %1925 = vmatprep.subr.bf16.mxu0 %v5119_v36 }
 0x30c   :  { %1794 = vmatpush2.bf16.msra.mxu1 %v5123_v48  ;;  %1926 = vmatpush2.bf16.msra.mxu0 %v5123_v48 }
 0x30d   :  { %1996 = vmatprep.subr.bf16.mxu1 %v4897_v17 }
 0x387   :  { %v1566_v20 = vpop.xlane.xlu1 %1565 }
 0x388   :  { %v1568_v49 = vrot.slane %v1566_v20, 1  ;;  %v1571_v28 = vsub.f32 %v5048_v56, %v1566_v20  ;;  %v1572_v10 = vsub.f32 %v5052_v21, %v1566_v20 }
 0x38a   :  { %v1573_v25 = vsub.f32 %v5050_v40, %v1568_v49  ;;  %v1574_v29 = vsub.f32 %v5054_v31, %v1568_v49  ;;  %v1575_v33 = vmul.f32 1.442695, %v1571_v28  ;;  %v1577_v50 = vmul.f32 1.442695, %v1572_v10 }
 0x38b   :  { %v1858_v59 = vpop.xlane.xlu1 %1857 }
 0x38c   :  { %4613 = vpow2.f32 %v1575_v33  ;;  %v1579_v58 = vmul.f32 1.442695, %v1573_v25  ;;  %v1581_v37 = vmul.f32 1.442695, %v1574_v29  ;;  %v1860_v60 = vrot.slane %v1858_v59, 1 }
 0x38d   :  { %4615 = vpow2.f32 %v1577_v50  ;;  %v1863_v17 = vsub.f32 %v5066_v7, %v1858_v59  ;;  %v1864_v14 = vsub.f32 %v5056_v16, %v1858_v59 }
 0x38e   :  { %4617 = vpow2.f32 %v1579_v58  ;;  %v1865_v56 = vsub.f32 %v5058_v24, %v1860_v60  ;;  %v1866_v21 = vsub.f32 %v5046_v6, %v1860_v60 }
 0x38f   :  { %4619 = vpow2.f32 %v1581_v37  ;;  %v1867_v40 = vmul.f32 1.442695, %v1863_v17  ;;  %v1869_v31 = vmul.f32 1.442695, %v1864_v14 }
 0x390   :  { %v1871_v20 = vmul.f32 1.442695, %v1865_v56  ;;  %v1873_v49 = vmul.f32 1.442695, %v1866_v21 }
 0x391   :  { %4621 = vpow2.f32 %v1867_v40 }
 0x392   :  { %4623 = vpow2.f32 %v1869_v31 }
 0x393   :  { %4625 = vpow2.f32 %v1871_v20 }
 0x394   :  { %4627 = vpow2.f32 %v1873_v49 }
 0x399   :  { %v5139_v28 = vpop.eup %4613 }
 0x39a   :  { %v5141_v10 = vpop.eup %4615  ;;  %v1583_v6 = vpack.c.bf16 %v5139_v28, %v5139_v28 }
 0x39b   :  { %v5143_v7 = vpop.eup %4617  ;;  %v1584_v24 = vpack.c.bf16 %v5141_v10, %v5141_v10 }
 0x39c   :  { %v5145_v16 = vpop.eup %4619  ;;  %v1585_v14 = vpack.c.bf16 %v5143_v7, %v5143_v7  ;;  %v1591_v37 = vunpack.c.l.b16 %v1583_v6 }
 0x39d   :  { %v1586_v25 = vpack.c.bf16 %v5145_v16, %v5145_v16  ;;  %v1592_v56 = vunpack.c.l.b16 %v1584_v24 }
 0x39e   :  { %v5155_v29 = vpop.eup %4621  ;;  %v1593_v33 = vunpack.c.l.b16 %v1585_v14 }
 0x39f   :  { %v5157_v50 = vpop.eup %4623  ;;  %v1594_v59 = vunpack.c.l.b16 %v1586_v25  ;;  %v1875_v40 = vpack.c.bf16 %v5155_v29, %v5155_v29 }
 0x3a0   :  { %v5159_v58 = vpop.eup %4625  ;;  %v1595_v60 = vrot.slane %v1593_v33, 7  ;;  %v1876_v49 = vpack.c.bf16 %v5157_v50, %v5157_v50 }
 0x3a1   :  { %v5161_v17 = vpop.eup %4627  ;;  %v1597_v21 = vrot.slane %v1594_v59, 7  ;;  %v1877_v31 = vpack.c.bf16 %v5159_v58, %v5159_v58  ;;  %v1883_v2 = vunpack.c.l.b16 %v1875_v40 }
 0x3a2   :  { %v1596_v20 = vsel %vm437_vm5, %v1595_v60, %v1591_v37  ;;  %v1878_v14 = vpack.c.bf16 %v5161_v17, %v5161_v17  ;;  %v1884_v1 = vunpack.c.l.b16 %v1876_v49  ;;  %v2096_v49 = vld [vmem:[%s5728_s5 + $0xe8] sm:$0xff] }
 0x3a3   :  { %v1598_v6 = vsel %vm437_vm5, %v1597_v21, %v1592_v56  ;;  %v1599_v25 = vpack.c.b16 %v1596_v20, %v1596_v20  ;;  %v1885_v33 = vunpack.c.l.b16 %v1877_v31  ;;  %v2081_v20 = vld [vmem:[%s5728_s5 + $0x70] sm:$0xff] }
 0x3a4   :  { %v1600_v24 = vpack.c.b16 %v1598_v6, %v1598_v6  ;;  %v1886_v59 = vunpack.c.l.b16 %v1878_v14  ;;  %v2080_v14 = vld [vmem:[%s5728_s5 + $0x68] sm:$0xff]  ;;  %v2095_v6 = vld [vmem:[%s5728_s5 + $0xe0] sm:$0xff] }
 0x3a5   :  { %v1887_v4 = vrot.slane %v1885_v33, 7  ;;  %v2094_v33 = vld [vmem:[%s5728_s5 + $0xd8] sm:$0xff] }
 0x3a6   :  { %1795 = vmatprep.mubr.bf16.mxu1 %v1600_v24  ;;  %v1889_v9 = vrot.slane %v1886_v59, 7  ;;  %v2078_v24 = vld [vmem:[%s5728_s5 + $0x58] sm:$0xff]  ;;  %v2093_v59 = vld [vmem:[%s5728_s5 + $0xd0] sm:$0xff] }
 0x3a7   :  { %1796 = vmatmul.mubr.bf16.vlgmr.msra.gmra.mxu1 %v1599_v25  ;;  %v1888_v37 = vsel %vm437_vm5, %v1887_v4, %v1883_v2  ;;  %v2079_v25 = vld [vmem:[%s5728_s5 + $0x60] sm:$0xff] }
 0x3a8   :  { %v1890_v60 = vsel %vm437_vm5, %v1889_v9, %v1884_v1  ;;  %v1891_v30 = vpack.c.b16 %v1888_v37, %v1888_v37  ;;  %1997 = vmatpush1.bf16.msra.mxu1 %v4895_v22  ;;  %v2077_v37 = vld [vmem:[%s5728_s5 + $0x50] sm:$0xff] }
 0x3a9   :  { %v1892_v61 = vpack.c.b16 %v1890_v60, %v1890_v60  ;;  %1998 = vmatprep.subr.bf16.mxu1 %v4899_v18  ;;  %v2092_v60 = vld [vmem:[%s5728_s5 + $0xc8] sm:$0xff] }
 0x3ab   :  { %1927 = vmatprep.mubr.bf16.mxu0 %v1892_v61 }
 0x3ac   :  { %1928 = vmatmul.mubr.bf16.vlgmr.msra.gmra.mxu0 %v1891_v30  ;;  %1999 = vmatpush1.bf16.msra.mxu1 %v4904_v23 }
 0x3ad   :  { %2000 = vmatprep.subr.bf16.mxu1 %v4908_v27 }
 0x3b0   :  { %2001 = vmatpush1.bf16.msra.mxu1 %v4912_v35 }
 0x3b1   :  { %2002 = vmatprep.subr.bf16.mxu1 %v4916_v38 }
 0x3b4   :  { %2003 = vmatpush1.bf16.msra.mxu1 %v4920_v41 }
 0x3b5   :  { %2004 = vmatprep.subr.bf16.mxu1 %v4924_v42 }
 0x3b8   :  { %2005 = vmatpush1.bf16.msra.mxu1 %v4928_v43 }
 0x3b9   :  { %2006 = vmatprep.subr.bf16.mxu1 %v4932_v44 }
 0x3bc   :  { %2007 = vmatpush1.bf16.msra.mxu1 %v4936_v45 }
 0x3bd   :  { %2008 = vmatprep.subr.bf16.mxu1 %v4940_v47 }
 0x3c0   :  { %2009 = vmatpush1.bf16.msra.mxu1 %v4944_v53 }
 0x3c1   :  { %2010 = vmatprep.subr.bf16.mxu1 %v4948_v55 }
 0x3c4   :  { %2011 = vmatpush1.bf16.msra.mxu1 %v4952_v57 }
 0x3c5   :  { %2012 = vmatprep.subr.bf16.mxu1 %v4956_v63 }
 0x3c8   :  { %2013 = vmatpush2.bf16.msra.mxu1 %v4960_v3 }
 0x3c9   :  { %2014 = vmatprep.subr.bf16.mxu1 %v5074_v52 }
 0x3cc   :  { %2015 = vmatpush2.bf16.msra.mxu1 %v5076_v51 }
 0x3cd   :  { %2016 = vmatprep.subr.bf16.mxu1 %v5082_v39 }
 0x3d0   :  { %2017 = vmatpush2.bf16.msra.mxu1 %v5084_v46 }
 0x3d1   :  { %2018 = vmatprep.subr.bf16.mxu1 %v5092_v34 }
 0x3d4   :  { %2019 = vmatpush2.bf16.msra.mxu1 %v5090_v8 }
 0x3d5   :  { %2020 = vmatprep.subr.bf16.mxu1 %v5094_v13 }
 0x3d8   :  { %2021 = vmatpush2.bf16.msra.mxu1 %v5099_v62 }
 0x3d9   :  { %2022 = vmatprep.subr.bf16.mxu1 %v5103_v19 }
 0x3dc   :  { %2023 = vmatpush2.bf16.msra.mxu1 %v5107_v5 }
 0x3dd   :  { %2024 = vmatprep.subr.bf16.mxu1 %v5111_v0 }
 0x3e0   :  { %2025 = vmatpush2.bf16.msra.mxu1 %v5115_v54 }
 0x3e1   :  { %2026 = vmatprep.subr.bf16.mxu1 %v5119_v36 }
 0x3e4   :  { %2027 = vmatpush2.bf16.msra.mxu1 %v5123_v48  ;;  %v5755_v48 = vld [vmem:[#allocation11_spill] sm:$0xff] }
 0x467   :  { %v1797_v2 = vpop.f32.mrf.mxu1 }
 0x468   :  { %4629 = vrcp.f32 %v1797_v2  ;;  %v2076_v2 = vld [vmem:[%s5728_s5 + $0x48] sm:$0xff] }
 0x469   :  { %v1799_v4 = vpop.f32.mrf.mxu1 }
 0x46a   :  { %4631 = vrcp.f32 %v1799_v4  ;;  %v2091_v4 = vld [vmem:[%s5728_s5 + $0xc0] sm:$0xff] }
 0x46b   :  { %v1801_v22 = vpop.f32.mrf.mxu1 }
 0x46c   :  { %v1929_v18 = vpop.f32.mrf.mxu0  ;;  %v2075_v22 = vld [vmem:[%s5728_s5 + $0x40] sm:$0xff] }
 0x46d   :  { %4633 = vrcp.f32 %v1929_v18  ;;  %v1802_v23 = vpop.f32.mrf.mxu1  ;;  %v2090_v18 = vld [vmem:[%s5728_s5 + $0xb8] sm:$0xff] }
 0x46e   :  { %v1931_v27 = vpop.f32.mrf.mxu0  ;;  %v2074_v23 = vld [vmem:[%s5728_s5 + $0x38] sm:$0xff] }
 0x46f   :  { %4635 = vrcp.f32 %v1931_v27  ;;  %v2089_v27 = vld [vmem:[%s5728_s5 + $0xb0] sm:$0xff] }
 0x470   :  { %v1933_v35 = vpop.f32.mrf.mxu0 }
 0x471   :  { %v2073_v35 = vld [vmem:[%s5728_s5 + $0x30] sm:$0xff] }
 0x472   :  { %v1934_v38 = vpop.f32.mrf.mxu0 }
 0x473   :  { %v2088_v38 = vld [vmem:[%s5728_s5 + $0xa8] sm:$0xff] }
 0x475   :  { %v4630_v41 = vpop.eup %4629 }
 0x476   :  { %v1808_v42 = vrot.slane %v4630_v41, 1  ;;  %v1814_v30 = vmul.f32 %v4630_v41, %v5139_v28  ;;  %v2072_v41 = vld [vmem:[%s5728_s5 + $0x28] sm:$0xff] }
 0x477   :  { %v4632_v43 = vpop.eup %4631 }
 0x478   :  { %v1809_v44 = vrot.slane %v4632_v43, 1  ;;  %v1815_v47 = vmul.f32 %v4632_v43, %v5141_v10  ;;  %v1816_v53 = vmul.f32 %v5143_v7, %v1808_v42  ;;  %v1953_v62 = vrot.slane %v1814_v30, %v4885_v11  ;;  %v5756_v10 = vld [vmem:[#allocation10_spill] sm:$0xff]  ;;  %v2087_v42 = vld [vmem:[%s5728_s5 + $0xa0] sm:$0xff] }
 0x479   :  { %v2071_v43 = vld [vmem:[%s5728_s5 + $0x20] sm:$0xff] }
 0x47a   :  { %v4634_v45 = vpop.eup %4633  ;;  %v1817_v63 = vmul.f32 %v5145_v16, %v1809_v44  ;;  %v1957_v52 = vrot.slane %v1815_v47, %v4885_v11  ;;  %v1961_v51 = vrot.slane %v1816_v53, %v4885_v11  ;;  %v5757_v16 = vld [vmem:[#allocation13_spill] sm:$0xff]  ;;  %v2086_v44 = vld [vmem:[%s5728_s5 + $0x98] sm:$0xff] }
 0x47b   :  { %v1940_v55 = vrot.slane %v4634_v45, 1  ;;  %v1946_v57 = vmul.f32 %v4634_v45, %v5155_v29  ;;  %v2070_v45 = vld [vmem:[%s5728_s5 + $0x18] sm:$0xff]  ;;  %v2085_v47 = vld [vmem:[%s5728_s5 + $0x90] sm:$0xff] }
 0x47c   :  { %v4636_v3 = vpop.eup %4635  ;;  %v1965_v8 = vrot.slane %v1817_v63, %v4885_v11  ;;  %v1968_v54 = vmul.f32 %v1961_v51, %v5004_v32  ;;  %v1967_v28 = vmul.f32 %v1957_v52, %v5755_v48  ;;  %v2098_v32 = vld [vmem:[%s5728_s5 + $0xf8] sm:$0xff]  ;;  %v2069_v53 = vld [vmem:[%s5728_s5 + $0x10] sm:$0xff]  ;;  %v2083_v63 = vld [vmem:[%s5728_s5 + $0x80] sm:$0xff] }
 0x47d   :  { %v1941_v61 = vrot.slane %v4636_v3, 1  ;;  %v1947_v1 = vmul.f32 %v4636_v3, %v5157_v50  ;;  %v1948_v9 = vmul.f32 %v5159_v58, %v1940_v55  ;;  %v1973_v39 = vrot.slane %v1946_v57, %v4885_v11  ;;  %v5758_v50 = vld [vmem:[#allocation12_spill] sm:$0xff]  ;;  %4053 = vmatprep.subr.mxu0 %v2098_v32  ;;  %v2067_v3 = vld [vmem:[%s5728_s5] sm:$0xff] }
 0x47e   :  { %v1969_v7 = vmul.f32 %v1965_v8, %v5756_v10  ;;  %v1966_v58 = vmul.f32 %v1953_v62, %v5758_v50  ;;  %v2084_v55 = vld [vmem:[%s5728_s5 + $0x88] sm:$0xff] }
 0x47f   :  { %v1949_v46 = vmul.f32 %v5161_v17, %v1941_v61  ;;  %v1977_v34 = vrot.slane %v1947_v1, %v4885_v11  ;;  %v1981_v13 = vrot.slane %v1948_v9, %v4885_v11  ;;  %v1986_v36 = vmul.f32 %v1973_v39, %v5030_v15  ;;  %v2082_v15 = vld [vmem:[%s5728_s5 + $0x78] sm:$0xff]  ;;  %v2068_v57 = vld [vmem:[%s5728_s5 + $0x8] sm:$0xff] }
 0x480   :  { %4054 = vmatpush3.msra.mxu0 %v2082_v15 }
 0x481   :  { %v1985_v19 = vrot.slane %v1949_v46, %v4885_v11  ;;  %v1987_v5 = vmul.f32 %v1977_v34, %v5032_v26  ;;  %v1988_v0 = vmul.f32 %v1981_v13, %v5034_v12  ;;  %v1990_v40 = vadd.f32 %v1986_v36, %v1966_v58  ;;  %v2097_v12 = vld [vmem:[%s5728_s5 + $0xf0] sm:$0xff] }
 0x482   :  { %4055 = vmatprep.subr.mxu0 %v2097_v12  ;;  %v5761_v58 = vld [vmem:[#allocation9_spill] sm:$0xff] }
 0x483   :  { %v1989_v29 = vmul.f32 %v1985_v19, %v5757_v16  ;;  %v1992_v17 = vadd.f32 %v1988_v0, %v1968_v54  ;;  %v1991_v56 = vadd.f32 %v1987_v5, %v1967_v28  ;;  %4056 = vmatpush3.msra.mxu0 %v2081_v20  ;;  %v5759_v28 = vld [vmem:[#allocation7_spill] sm:$0xff] }
 0x484   :  { %4057 = vmatprep.subr.mxu0 %v2096_v49  ;;  %v2179_v49 = vld [vmem:[%s5728_s5 + $0x191] sm:$0x1] }
 0x485   :  { %v1993_v21 = vadd.f32 %v1989_v29, %v1969_v7  ;;  %v1994_v26 = vpack.c.bf16 %v1992_v17, %v1990_v40  ;;  %4058 = vmatpush3.msra.mxu0 %v2080_v14  ;;  %v5760_v7 = vld [vmem:[#allocation6_spill] sm:$0xff] }
 0x486   :  { %4059 = vmatprep.subr.mxu0 %v2095_v6 }
 0x487   :  { %v1995_v31 = vpack.c.bf16 %v1993_v21, %v1991_v56  ;;  %4060 = vmatpush3.msra.mxu0 %v2079_v25  ;;  %v5762_v56 = vld [vmem:[#allocation8_spill] sm:$0xff] }
 0x488   :  { %4061 = vmatprep.subr.mxu0 %v2094_v33  ;;  %v2191_v25 = vld [vmem:[%s5728_s5 + $0x188] sm:$0xff]  ;;  %v2190_v33 = vld [vmem:[%s5728_s5 + $0x180] sm:$0xff] }
 0x489   :  { %2028 = vmatprep.mubr.bf16.mxu1 %v1995_v31  ;;  %4062 = vmatpush3.msra.mxu0 %v2078_v24  ;;  %v4003_v31 = vld [vmem:[%s5728_s5 + $0x195] ss:$0 sm:$0xff] }
 0x48a   :  { %2029 = vmatmul.mubr.bf16.vlgmr.msra.gmra.mxu1 %v1994_v26  ;;  %4063 = vmatprep.subr.mxu0 %v2093_v59 }
 0x48b   :  { %4064 = vmatpush3.msra.mxu0 %v2077_v37  ;;  %v4004_v37 = vld [vmem:[%s5728_s5 + $0x190] ss:$0 sm:$0xff] }
 0x48c   :  { %4065 = vmatprep.subr.mxu0 %v2092_v60 }
 0x48d   :  { %4066 = vmatpush3.msra.mxu0 %v2076_v2 }
 0x48e   :  { %4067 = vmatprep.subr.mxu0 %v2091_v4 }
 0x48f   :  { %4068 = vmatpush3.msra.mxu0 %v2075_v22 }
 0x490   :  { %4069 = vmatprep.subr.mxu0 %v2090_v18 }
 0x491   :  { %4070 = vmatpush3.msra.mxu0 %v2074_v23 }
 0x492   :  { %4071 = vmatprep.subr.mxu0 %v2089_v27 }
 0x493   :  { %4072 = vmatpush3.msra.mxu0 %v2073_v35 }
 0x494   :  { %4073 = vmatprep.subr.mxu0 %v2088_v38 }
 0x495   :  { %4074 = vmatpush3.msra.mxu0 %v2072_v41 }
 0x496   :  { %4075 = vmatprep.subr.mxu0 %v2087_v42 }
 0x497   :  { %4076 = vmatpush3.msra.mxu0 %v2071_v43 }
 0x498   :  { %4077 = vmatprep.subr.mxu0 %v2086_v44 }
 0x499   :  { %4078 = vmatpush3.msra.mxu0 %v2070_v45 }
 0x49a   :  { %4079 = vmatprep.subr.mxu0 %v2085_v47 }
 0x49b   :  { %4080 = vmatpush3.msra.mxu0 %v2069_v53 }
 0x49c   :  { %4081 = vmatprep.subr.mxu0 %v2084_v55 }
 0x49d   :  { %4082 = vmatpush3.msra.mxu0 %v2068_v57 }
 0x49e   :  { %4083 = vmatprep.subr.mxu0 %v2083_v63 }
 0x49f   :  { %4084 = vmatpush3.msra.mxu0 %v2067_v3 }
 0x54a   :  { %v2030_v30 = vpop.f32.mrf.mxu1 }
 0x54b   :  { %v3999_v61 = vmul.f32 -1.442695, %v2030_v30 }
 0x54c   :  { %v2032_v1 = vpop.f32.mrf.mxu1 }
 0x54d   :  { %4637 = vpow2.f32 %v3999_v61  ;;  %v4000_v9 = vmul.f32 -1.442695, %v2032_v1 }
 0x54e   :  { %v2034_v52 = vpop.f32.mrf.mxu1 }
 0x54f   :  { %4639 = vpow2.f32 %v4000_v9  ;;  %v4001_v51 = vmul.f32 -1.442695, %v2034_v52 }
 0x550   :  { %v2036_v39 = vpop.f32.mrf.mxu1 }
 0x551   :  { %4641 = vpow2.f32 %v4001_v51  ;;  %v4002_v46 = vmul.f32 -1.442695, %v2036_v39 }
 0x553   :  { %4643 = vpow2.f32 %v4002_v46 }
 0x55a   :  { %v4638_v8 = vpop.eup %4637 }
 0x55b   :  { %v2051_v34 = vadd.f32 1.0, %v4638_v8 }
 0x55c   :  { %v4640_v13 = vpop.eup %4639 }
 0x55d   :  { %v2052_v62 = vadd.f32 1.0, %v4640_v13  ;;  %4645 = vrcp.f32 %v2051_v34 }
 0x55e   :  { %v4642_v19 = vpop.eup %4641 }
 0x55f   :  { %4647 = vrcp.f32 %v2052_v62  ;;  %v2053_v5 = vadd.f32 1.0, %v4642_v19 }
 0x560   :  { %v4644_v0 = vpop.eup %4643 }
 0x561   :  { %v2054_v54 = vadd.f32 1.0, %v4644_v0  ;;  %4649 = vrcp.f32 %v2053_v5 }
 0x563   :  { %4651 = vrcp.f32 %v2054_v54 }
 0x56a   :  { %v4646_v36 = vpop.eup %4645 }
 0x56b   :  { %v2063_v16 = vmul.f32 %v4646_v36, %v5760_v7  ;;  %v5360_v36 = vld [vmem:[%s5727_s4 + $0x18] sm:$0xff] }
 0x56c   :  { %v4648_v48 = vpop.eup %4647  ;;  %4167 = vmatprep.subr.mxu0 %v5360_v36 }
 0x56d   :  { %v2064_v10 = vmul.f32 %v4648_v48, %v5759_v28  ;;  %v5367_v48 = vld [vmem:[%s5727_s4 + $0x10] sm:$0xff]  ;;  %v5373_v28 = vld [vmem:[%s5727_s4 + $0x8] sm:$0xff] }
 0x56e   :  { %v4650_v29 = vpop.eup %4649 }
 0x56f   :  { %2168 = vmatprep.mubr.f32.mxu0 %v2064_v10  ;;  %v2065_v21 = vmul.f32 %v4650_v29, %v5762_v56  ;;  %v5380_v10 = vld [vmem:[%s5727_s4] sm:$0xff] }
 0x570   :  { %v4652_v50 = vpop.eup %4651  ;;  %2169 = vmatmul.mubr.f32.vlgmr.msra.gmra.mxu0 %v2063_v16 }
 0x571   :  { %v2066_v17 = vmul.f32 %v4652_v50, %v5761_v58  ;;  %4168 = vmatpush3.msra.mxu0 %v5360_v36 }
 0x572   :  { %4169 = vmatprep.subr.mxu0 %v5367_v48 }
 0x573   :  { %2173 = vmatprep.mubr.f32.mxu0 %v2066_v17  ;;  %4170 = vmatpush3.msra.mxu0 %v5367_v48 }
 0x574   :  { %2174 = vmatmul.mubr.f32.gmra.mxu0 %v2065_v21  ;;  %4171 = vmatprep.subr.mxu0 %v5373_v28 }
 0x575   :  { %4172 = vmatpush3.msra.mxu0 %v5373_v28 }
 0x576   :  { %4173 = vmatprep.subr.mxu0 %v5380_v10 }
 0x577   :  { %4174 = vmatpush3.msra.mxu0 %v5380_v10 }
 0x630   :  { %v4085_v40 = vpop.f32.mrf.mxu0 }
 0x632   :  { %v4086_v26 = vpop.f32.mrf.mxu0 }
 0x633   :  { %v4087_v32 = vadd.f32 %v4086_v26, %v4085_v40 }
 0x634   :  { %v4088_v15 = vpop.f32.mrf.mxu0 }
 0x635   :  { %v2171_v12 = vadd.f32 %v4087_v32, %v4003_v31  ;;  %v4005_v32 = vld [vmem:[%s5728_s5 + $0x193] ss:$0 sm:$0xff] }
 0x636   :  { %v4089_v20 = vpop.f32.mrf.mxu0 }
 0x637   :  { %v2182_v14 = vrot.slane %v2171_v12, 7  ;;  %v4090_v6 = vadd.f32 %v4089_v20, %v4088_v15 }
 0x639   :  { %v2188_v24 = vsel %vm875_vm6, %v2182_v14, 0.0  ;;  %v2176_v59 = vadd.f32 %v4090_v6, %v4003_v31  ;;  %v2186_v60 = vsel %vm875_vm6, %v2179_v49, %v2182_v14 }
 0x63a   :  { %v2193_v2 = vadd.f32 %v2191_v25, %v2188_v24  ;;  %v2192_v4 = vadd.f32 %v2190_v33, %v2186_v60 }
 0x63b   :  { %v2183_v22 = vrot.slane %v2176_v59, 7 }
 0x63c   :  { %v2202_v18 = vadd.f32 %v4004_v37, %v2193_v2  ;;  %v2201_v23 = vadd.f32 %v4004_v37, %v2192_v4 }
 0x63d   :  { %v2189_v27 = vsel %vm875_vm6, %v2183_v22, 0.0  ;;  %v2187_v35 = vsel %vm875_vm6, %v2179_v49, %v2183_v22  ;;  %v4006_v49 = vld [vmem:[%s5728_s5 + $0x194] ss:$0 sm:$0xff] }
 0x63e   :  { %v2209_v38 = vsel %vm2205_vm10, %v2202_v18, 0.0  ;;  %v2206_v41 = vsel %vm2205_vm10, %v2201_v23, 0.0  ;;  %v2194_v42 = vadd.f32 %v2190_v33, %v2187_v35  ;;  %v2195_v43 = vadd.f32 %v2191_v25, %v2189_v27  ;;  %v5410_v35 = vld [vmem:[%s5727_s4 + $0x40] ss:$0 sm:$0xff] }
 0x63f   :  { %2210 = vadd.xlane.f32.xlu1 %v2209_v38  ;;  %2207 = vadd.xlane.f32.xlu0 %v2206_v41  ;;  %v5763_v41 = vld [vmem:[#allocation5_spill] sm:$0xff] }
 0x640   :  { %v2203_v44 = vadd.f32 %v4004_v37, %v2194_v42  ;;  %v2204_v47 = vadd.f32 %v4004_v37, %v2195_v43  ;;  %vm2412_vm11 = vcmp.lt.s32.totalorder %v5763_v41, 16  ;;  %vm2670_vm12 = vcmp.ge.s32.totalorder %v5763_v41, 16 }
 0x641   :  { %vm2671_vm13 = vcmp.lt.s32.totalorder %v5763_v41, 32 }
 0x642   :  { %v2212_v45 = vsel %vm2205_vm10, %v2203_v44, 0.0  ;;  %v2215_v53 = vsel %vm2205_vm10, %v2204_v47, 0.0  ;;  %vm2672_vm14 = vmand %vm2670_vm12, %vm2671_vm13 }
 0x643   :  { %2213 = vadd.xlane.f32.xlu1 %v2212_v45  ;;  %v5764_v45 = vmov 0.0  }
 0x647   :  { %2216 = vadd.xlane.f32.xlu1 %v2215_v53 }
 0x6c8   :  { %v2211_v55 = vpop.xlane.xlu1 %2210  ;;  %v2208_v57 = vpop.xlane.xlu0 %2207 }
 0x6c9   :  { %v2220_v63 = vmul.f32 0.03125, %v2211_v55  ;;  %v2219_v3 = vmul.f32 0.03125, %v2208_v57 }
 0x6cb   :  { %v2224_v30 = vsub.f32 %v2202_v18, %v2220_v63  ;;  %v2223_v61 = vsub.f32 %v2201_v23, %v2219_v3 }
 0x6cc   :  { %v2214_v1 = vpop.xlane.xlu1 %2213 }
 0x6cd   :  { %v2221_v9 = vmul.f32 0.03125, %v2214_v1  ;;  %v2227_v52 = vmul.f32 %v2223_v61, %v2223_v61  ;;  %v2228_v46 = vmul.f32 %v2224_v30, %v2224_v30  ;;  %v2252_v12 = vmul.f32 %v4005_v32, %v2223_v61  ;;  %v2384_v61 = vld [vmem:[%s5724_s1 + $0x1] sm:$0x1] }
 0x6ce   :  { %v2253_v6 = vmul.f32 %v4005_v32, %v2224_v30  ;;  %v2383_v30 = vld [vmem:[%s5724_s1] sm:$0x1]  ;;  %s4747_s1 = smov 64  }
 0x6cf   :  { %v2225_v51 = vsub.f32 %v2203_v44, %v2221_v9  ;;  %v2231_v39 = vsel %vm2205_vm10, %v2227_v52, 0.0  ;;  %v2234_v62 = vsel %vm2205_vm10, %v2228_v46, 0.0  ;;  %v2385_v1 = vsub.f32 1.0, %v2383_v30 }
 0x6d0   :  { %v2217_v8 = vpop.xlane.xlu1 %2216  ;;  %2232 = vadd.xlane.f32.xlu1 %v2231_v39  ;;  %v2386_v9 = vsub.f32 1.0, %v2384_v61 }
 0x6d1   :  { %v2222_v34 = vmul.f32 0.03125, %v2217_v8  ;;  %v2229_v19 = vmul.f32 %v2225_v51, %v2225_v51  ;;  %v2254_v59 = vmul.f32 %v4005_v32, %v2225_v51  ;;  %v2387_v52 = vmul.f32 -10000.0, %v2385_v1 }
 0x6d2   :  { %v2388_v51 = vmul.f32 -10000.0, %v2386_v9 }
 0x6d3   :  { %v2226_v13 = vsub.f32 %v2204_v47, %v2222_v34  ;;  %v2237_v5 = vsel %vm2205_vm10, %v2229_v19, 0.0  ;;  %v5421_v47 = vsel %vm2412_vm11, 1.0, %v5764_v45  ;;  %v2394_v39 = vrot.slane %v2387_v52, %v4885_v11 }
 0x6d4   :  { %2235 = vadd.xlane.f32.xlu1 %v2234_v62  ;;  %v2398_v46 = vrot.slane %v2388_v51, %v4885_v11 }
 0x6d5   :  { %v2230_v0 = vmul.f32 %v2226_v13, %v2226_v13  ;;  %v2255_v4 = vmul.f32 %v4005_v32, %v2226_v13 }
 0x6d7   :  { %v2240_v54 = vsel %vm2205_vm10, %v2230_v0, 0.0  ;;  %v5460_v0 = vsel %vm2672_vm14, 1.0, %v5764_v45 }
 0x6d8   :  { %2238 = vadd.xlane.f32.xlu1 %v2237_v5 }
 0x6dc   :  { %2241 = vadd.xlane.f32.xlu1 %v2240_v54 }
 0x759   :  { %v2233_v7 = vpop.xlane.xlu1 %2232 }
 0x75a   :  { %v2243_v16 = vmul.f32 0.03125, %v2233_v7 }
 0x75c   :  { %v2256_v29 = vadd.f32 1e-12, %v2243_v16 }
 0x75d   :  { %v2236_v50 = vpop.xlane.xlu1 %2235 }
 0x75e   :  { %4653 = vrsqrt.f32 %v2256_v29  ;;  %v2244_v58 = vmul.f32 0.03125, %v2236_v50 }
 0x760   :  { %v2257_v17 = vadd.f32 1e-12, %v2244_v58 }
 0x761   :  { %v2239_v56 = vpop.xlane.xlu1 %2238 }
 0x762   :  { %4655 = vrsqrt.f32 %v2257_v17  ;;  %v2245_v21 = vmul.f32 0.03125, %v2239_v56 }
 0x764   :  { %v2258_v40 = vadd.f32 1e-12, %v2245_v21 }
 0x765   :  { %v2242_v31 = vpop.xlane.xlu1 %2241 }
 0x766   :  { %4657 = vrsqrt.f32 %v2258_v40  ;;  %v2246_v26 = vmul.f32 0.03125, %v2242_v31 }
 0x768   :  { %v2259_v15 = vadd.f32 1e-12, %v2246_v26 }
 0x76a   :  { %4659 = vrsqrt.f32 %v2259_v15 }
 0x76b   :  { %v4654_v20 = vpop.eup %4653 }
 0x76c   :  { %v2264_v14 = vmul.f32 %v4654_v20, %v2252_v12 }
 0x76e   :  { %v5391_v25 = vadd.f32 %v4006_v49, %v2264_v14 }
 0x76f   :  { %v4656_v33 = vpop.eup %4655 }
 0x770   :  { %v2265_v24 = vmul.f32 %v4656_v33, %v2253_v6  ;;  %4175 = vmatprep.mubr.msk.f32.mxu0 %vm2205_vm10, %v5391_v25 }
 0x772   :  { %v5395_v37 = vadd.f32 %v4006_v49, %v2265_v24 }
 0x773   :  { %v4658_v60 = vpop.eup %4657 }
 0x774   :  { %4176 = vmatmul.mubr.msk.f32.vlgmr.msra.gmra.mxu0 %vm2205_vm10, %v5395_v37  ;;  %v2266_v2 = vmul.f32 %v4658_v60, %v2254_v59 }
 0x776   :  { %v5399_v22 = vadd.f32 %v4006_v49, %v2266_v2 }
 0x777   :  { %v4660_v18 = vpop.eup %4659 }
 0x778   :  { %4178 = vmatprep.mubr.msk.f32.mxu0 %vm2205_vm10, %v5399_v22  ;;  %v2267_v23 = vmul.f32 %v4660_v18, %v2255_v4 }
 0x77a   :  { %v5403_v27 = vadd.f32 %v4006_v49, %v2267_v23 }
 0x77c   :  { %4179 = vmatmul.mubr.msk.f32.gmra.mxu0 %vm2205_vm10, %v5403_v27 }
 0x834   :  { %v4177_v38 = vpop.f32.mrf.mxu0 }
 0x835   :  { %v5414_v42 = vadd.f32 %v4177_v38, %v5410_v35 }
 0x836   :  { %v2364_v43 = vpop.f32.mrf.mxu0 }
 0x837   :  { %v5417_v44 = vadd.f32 %v5410_v35, %v2364_v43  ;;  %2424 = vrot.lane.b32.xlu1 %v5414_v42, %s4745_s20  ;;  %v2417_v13 = vmul.f32 %v5421_v47, %v5414_v42  ;;  %v2676_v16 = vmul.f32 %v5460_v0, %v5414_v42 }
 0x839   :  { %2422 = vrot.lane.b32.xlu0 %v5417_v44, %s4745_s20  ;;  %v2416_v53 = vmul.f32 %v5421_v47, %v5417_v44  ;;  %v2675_v7 = vmul.f32 %v5460_v0, %v5417_v44 }
 0x83b   :  { %4185 = vmatprep.mubr.msk.f32.mxu0 %vm2205_vm10, %v2416_v53 }
 0x83c   :  { %v4180_v55 = vpop.f32.mrf.mxu0 }
 0x83d   :  { %v5428_v57 = vadd.f32 %v4180_v55, %v5410_v35  ;;  %2399 = vrot.lane.b32.xlu0 %v2394_v39, %s4746_s25 }
 0x83e   :  { %v2374_v63 = vpop.f32.mrf.mxu0 }
 0x83f   :  { %2515 = vrot.lane.b32.xlu1 %v5428_v57, %s4745_s20  ;;  %v5432_v3 = vadd.f32 %v5410_v35, %v2374_v63  ;;  %v2419_v54 = vmul.f32 %v5421_v47, %v5428_v57  ;;  %v2678_v50 = vmul.f32 %v5460_v0, %v5428_v57 }
 0x841   :  { %v2418_v19 = vmul.f32 %v5421_v47, %v5432_v3  ;;  %v2677_v29 = vmul.f32 %v5460_v0, %v5432_v3 }
 0x843   :  { %2513 = vrot.lane.b32.xlu1 %v5432_v3, %s4745_s20 }
 0x847   :  { %2401 = vrot.lane.b32.xlu1 %v2398_v46, %s4746_s25 }
 0x8a9   :  { %v2425_v8 = vpop.permute.xlu1 %2424 }
 0x8aa   :  { %4181 = vmatprep.subr.msk.mxu0 %vm2205_vm10, %v2425_v8 }
 0x8ab   :  { %v2423_v34 = vpop.permute.xlu0 %2422  ;;  %4182 = vmatpush3.xpose.msk.msra.mxu0 %vm2205_vm10, %v2425_v8 }
 0x8ac   :  { %4183 = vmatprep.subr.msk.mxu0 %vm2205_vm10, %v2423_v34 }
 0x8af   :  { %4184 = vmatpush3.xpose.msk.msra.mxu0 %vm2205_vm10, %v2423_v34  ;;  %v2400_v58 = vpop.permute.xlu0 %2399 }
 0x8b0   :  { %v2406_v17 = vsel %vm2405_vm15, 0.0, %v2400_v58 }
 0x8b1   :  { %v2516_v62 = vpop.permute.xlu1 %2515  ;;  %v2409_v56 = vsel %vm2408_vm0, %v2406_v17, -10000.0 }
 0x8b2   :  { %4186 = vmatmul.mubr.msk.f32.vlgmr.msra.gmra.mxu0 %vm2205_vm10, %v2417_v13  ;;  %4188 = vmatprep.subr.msk.mxu0 %vm2205_vm10, %v2516_v62  ;;  %v2609_v31 = vrot.slane %v2409_v56, %v4885_v11 }
 0x8b3   :  { %4189 = vmatpush3.xpose.msk.msra.mxu0 %vm2205_vm10, %v2516_v62  ;;  %4192 = vmatprep.mubr.msk.f32.mxu0 %vm2205_vm10, %v2418_v19 }
 0x8b5   :  { %v2514_v5 = vpop.permute.xlu1 %2513 }
 0x8b6   :  { %4190 = vmatprep.subr.msk.mxu0 %vm2205_vm10, %v2514_v5 }
 0x8b7   :  { %4191 = vmatpush3.xpose.msk.msra.mxu0 %vm2205_vm10, %v2514_v5 }
 0x8b8   :  { %4195 = vmatprep.subr.msk.mxu0 %vm2205_vm10, %v2425_v8 }
 0x8b9   :  { %v2402_v20 = vpop.permute.xlu1 %2401 }
 0x8ba   :  { %4193 = vmatmul.mubr.msk.f32.vlgmr.msra.gmra.mxu0 %vm2205_vm10, %v2419_v54  ;;  %v2407_v33 = vsel %vm2405_vm15, 0.0, %v2402_v20 }
 0x8bb   :  { %4196 = vmatpush3.xpose.msk.msra.mxu0 %vm2205_vm10, %v2425_v8  ;;  %4199 = vmatprep.mubr.msk.f32.mxu0 %vm2205_vm10, %v2675_v7  ;;  %v2410_v4 = vsel %vm2408_vm0, %v2407_v33, -10000.0 }
 0x8bc   :  { %4197 = vmatprep.subr.msk.mxu0 %vm2205_vm10, %v2423_v34  ;;  %v2613_v43 = vrot.slane %v2410_v4, %v4885_v11 }
 0x8bf   :  { %4198 = vmatpush3.xpose.msk.msra.mxu0 %vm2205_vm10, %v2423_v34 }
 0x8c0   :  { %4202 = vmatprep.subr.msk.mxu0 %vm2205_vm10, %v2516_v62 }
 0x8c2   :  { %4200 = vmatmul.mubr.msk.f32.vlgmr.msra.gmra.mxu0 %vm2205_vm10, %v2676_v16 }
 0x8c3   :  { %4203 = vmatpush3.xpose.msk.msra.mxu0 %vm2205_vm10, %v2516_v62  ;;  %4206 = vmatprep.mubr.msk.f32.mxu0 %vm2205_vm10, %v2677_v29 }
 0x8c4   :  { %4204 = vmatprep.subr.msk.mxu0 %vm2205_vm10, %v2514_v5 }
 0x8c7   :  { %4205 = vmatpush3.xpose.msk.msra.mxu0 %vm2205_vm10, %v2514_v5 }
 0x8ca   :  { %4207 = vmatmul.mubr.msk.f32.vlgmr.msra.gmra.mxu0 %vm2205_vm10, %v2678_v50 }
 0x972   :  { %v4187_v21 = vpop.f32.mrf.mxu0 }
 0x973   :  { %v2603_v6 = vmul.f32 0.25, %v4187_v21 }
 0x974   :  { %v2502_v40 = vpop.f32.mrf.mxu0 }
 0x975   :  { %v2602_v26 = vmul.f32 0.25, %v2502_v40  ;;  %v2615_v41 = vadd.f32 %v2609_v31, %v2603_v6 }
 0x977   :  { %v5488_v32 = vadd.f32 %v2609_v31, %v2602_v26  ;;  %v2621_v55 = vsel %vm73_vm2, %v2615_v41, -inf }
 0x979   :  { %v2618_v15 = vsel %vm73_vm2, %v5488_v32, -inf }
 0x97a   :  { %2619 = vmax.xlane.f32.xlu0 %v2618_v15  ;;  %v4194_v12 = vpop.f32.mrf.mxu0 }
 0x97b   :  { %v2605_v51 = vmul.f32 0.25, %v4194_v12 }
 0x97c   :  { %v2593_v49 = vpop.f32.mrf.mxu0 }
 0x97d   :  { %v2604_v18 = vmul.f32 0.25, %v2593_v49  ;;  %v2617_v8 = vadd.f32 %v2613_v43, %v2605_v51 }
 0x97f   :  { %v5501_v63 = vadd.f32 %v2613_v43, %v2604_v18  ;;  %v2627_v34 = vsel %vm73_vm2, %v2617_v8, -inf }
 0x981   :  { %v2624_v9 = vsel %vm73_vm2, %v5501_v63, -inf }
 0x982   :  { %v4201_v14 = vpop.f32.mrf.mxu0 }
 0x983   :  { %v2842_v24 = vmul.f32 0.25, %v4201_v14 }
 0x984   :  { %v2751_v59 = vpop.f32.mrf.mxu0 }
 0x985   :  { %v2841_v60 = vmul.f32 0.25, %v2751_v59  ;;  %v2846_v2 = vadd.f32 %v2842_v24, %v2609_v31 }
 0x987   :  { %v2852_v23 = vsel %vm73_vm2, %v2846_v2, -inf  ;;  %v5495_v38 = vadd.f32 %v2841_v60, %v2609_v31 }
 0x988   :  { %2853 = vmax.xlane.f32.xlu1 %v2852_v23 }
 0x989   :  { %v2849_v45 = vsel %vm73_vm2, %v5495_v38, -inf }
 0x98a   :  { %2850 = vmax.xlane.f32.xlu0 %v2849_v45  ;;  %v4208_v53 = vpop.f32.mrf.mxu0 }
 0x98b   :  { %v2844_v61 = vmul.f32 0.25, %v4208_v53 }
 0x98c   :  { %2622 = vmax.xlane.f32.xlu1 %v2621_v55  ;;  %v2832_v30 = vpop.f32.mrf.mxu0 }
 0x98d   :  { %v2843_v1 = vmul.f32 0.25, %v2832_v30  ;;  %v2848_v39 = vadd.f32 %v2844_v61, %v2613_v43 }
 0x98f   :  { %v2847_v52 = vadd.f32 %v2843_v1, %v2613_v43  ;;  %v2858_v46 = vsel %vm73_vm2, %v2848_v39, -inf }
 0x990   :  { %2625 = vmax.xlane.f32.xlu1 %v2624_v9 }
 0x991   :  { %v2855_v11 = vsel %vm73_vm2, %v2847_v52, -inf }
 0x992   :  { %2856 = vmax.xlane.f32.xlu0 %v2855_v11 }
 0x996   :  { %2859 = vmax.xlane.f32.xlu0 %v2858_v46 }
 0x99a   :  { %2628 = vmax.xlane.f32.xlu0 %v2627_v34 }
 0x9a1   :  { %2894 = vrot.lane.b32.xlu1 %v5460_v0, %s4747_s1 }
 0x9b0   :  { %2663 = vrot.lane.b32.xlu0 %v5421_v47, %s4747_s1 }
 0xa03   :  { %v2620_v62 = vpop.xlane.xlu0 %2619 }
 0xa11   :  { %v2854_v13 = vpop.xlane.xlu1 %2853 }
 0xa12   :  { %v2862_v26 = vsub.f32 %v2846_v2, %v2854_v13 }
 0xa13   :  { %v2851_v5 = vpop.xlane.xlu0 %2850 }
 0xa14   :  { %v2867_v12 = vmul.f32 1.442695, %v2862_v26  ;;  %v2861_v18 = vsub.f32 %v5495_v38, %v2851_v5 }
 0xa15   :  { %v2623_v19 = vpop.xlane.xlu1 %2622 }
 0xa16   :  { %v2631_v6 = vsub.f32 %v2615_v41, %v2623_v19  ;;  %v2865_v43 = vmul.f32 1.442695, %v2861_v18 }
 0xa18   :  { %v2636_v24 = vmul.f32 1.442695, %v2631_v6 }
 0xa19   :  { %v2626_v54 = vpop.xlane.xlu1 %2625 }
 0xa1a   :  { %v2632_v60 = vsub.f32 %v5501_v63, %v2626_v54 }
 0xa1b   :  { %v2857_v7 = vpop.xlane.xlu0 %2856 }
 0xa1c   :  { %v2863_v49 = vsub.f32 %v2847_v52, %v2857_v7  ;;  %v2638_v23 = vmul.f32 1.442695, %v2632_v60 }
 0xa1d   :  { %v2895_v16 = vpop.permute.xlu1 %2894 }
 0xa1e   :  { %v2898_v29 = vmul.f32 %v2895_v16, %v5414_v42  ;;  %v2897_v50 = vmul.f32 %v2895_v16, %v5417_v44  ;;  %v2900_v0 = vmul.f32 %v2895_v16, %v5428_v57  ;;  %v2899_v47 = vmul.f32 %v2895_v16, %v5432_v3 }
 0xa1f   :  { %v2860_v58 = vpop.xlane.xlu0 %2859  ;;  %v2869_v33 = vmul.f32 1.442695, %v2863_v49 }
 0xa20   :  { %2905 = vrot.lane.b32.xlu1 %v2898_v29, %s4747_s1  ;;  %2903 = vrot.lane.b32.xlu0 %v2897_v50, %s4747_s1  ;;  %v2864_v20 = vsub.f32 %v2848_v39, %v2860_v58 }
 0xa22   :  { %v2871_v14 = vmul.f32 1.442695, %v2864_v20 }
 0xa23   :  { %v2629_v17 = vpop.xlane.xlu0 %2628 }
 0xa24   :  { %2994 = vrot.lane.b32.xlu1 %v2900_v0, %s4747_s1  ;;  %2992 = vrot.lane.b32.xlu0 %v2899_v47, %s4747_s1  ;;  %v2633_v40 = vsub.f32 %v2617_v8, %v2629_v17 }
 0xa26   :  { %v2640_v15 = vmul.f32 1.442695, %v2633_v40 }
 0xa27   :  { %v2664_v56 = vpop.permute.xlu0 %2663 }
 0xa28   :  { %v2667_v21 = vmul.f32 %v2664_v56, %v5414_v42  ;;  %v2666_v31 = vmul.f32 %v2664_v56, %v5417_v44  ;;  %4661 = vpow2.f32 %v2640_v15  ;;  %v2630_v42 = vsub.f32 %v5488_v32, %v2620_v62 }
 0xa29   :  { %4663 = vpow2.f32 %v2867_v12  ;;  %v2669_v11 = vmul.f32 %v2664_v56, %v5428_v57  ;;  %v2668_v39 = vmul.f32 %v2664_v56, %v5432_v3 }
 0xa2a   :  { %3083 = vrot.lane.b32.xlu1 %v2667_v21, %s4747_s1  ;;  %4665 = vpow2.f32 %v2871_v14  ;;  %v2634_v44 = vmul.f32 1.442695, %v2630_v42 }
 0xa2b   :  { %4667 = vpow2.f32 %v2869_v33 }
 0xa2c   :  { %4669 = vpow2.f32 %v2636_v24 }
 0xa2d   :  { %4671 = vpow2.f32 %v2634_v44 }
 0xa2e   :  { %3081 = vrot.lane.b32.xlu1 %v2666_v31, %s4747_s1  ;;  %4673 = vpow2.f32 %v2638_v23 }
 0xa2f   :  { %4675 = vpow2.f32 %v2865_v43 }
 0xa35   :  { %v5525_v59 = vpop.eup %4661 }
 0xa36   :  { %v2651_v2 = vsel %vm73_vm2, %v5525_v59, 0.0  ;;  %v5530_v4 = vpop.eup %4663 }
 0xa37   :  { %v2876_v32 = vsel %vm73_vm2, %v5530_v4, 0.0  ;;  %v5535_v41 = vpop.eup %4665 }
 0xa38   :  { %v2882_v45 = vsel %vm73_vm2, %v5535_v41, 0.0  ;;  %v5539_v53 = vpop.eup %4667 }
 0xa39   :  { %v4670_v55 = vpop.eup %4669  ;;  %v2879_v38 = vsel %vm73_vm2, %v5539_v53, 0.0 }
 0xa3a   :  { %v2645_v63 = vsel %vm73_vm2, %v4670_v55, 0.0  ;;  %v4672_v30 = vpop.eup %4671 }
 0xa3b   :  { %v2642_v61 = vsel %vm73_vm2, %v4672_v30, 0.0  ;;  %v5545_v1 = vpop.eup %4673 }
 0xa3c   :  { %v2648_v9 = vsel %vm73_vm2, %v5545_v1, 0.0  ;;  %v4676_v52 = vpop.eup %4675 }
 0xa3d   :  { %v2873_v51 = vsel %vm73_vm2, %v4676_v52, 0.0 }
 0xa43   :  { %2652 = vadd.xlane.f32.xlu0 %v2651_v2 }
 0xa47   :  { %2877 = vadd.xlane.f32.xlu0 %v2876_v32 }
 0xa4b   :  { %2883 = vadd.xlane.f32.xlu0 %v2882_v45 }
 0xa4f   :  { %2880 = vadd.xlane.f32.xlu0 %v2879_v38 }
 0xa52   :  { %2646 = vadd.xlane.f32.xlu1 %v2645_v63 }
 0xa56   :  { %2643 = vadd.xlane.f32.xlu1 %v2642_v61 }
 0xa5a   :  { %2649 = vadd.xlane.f32.xlu1 %v2648_v9 }
 0xa5e   :  { %2874 = vadd.xlane.f32.xlu1 %v2873_v51 }
 0xa65   :  { %3172 = vrot.lane.b32.xlu0 %v2669_v11, %s4747_s1 }
 0xa69   :  { %3267 = vrot.lane.b32.xlu0 %v5360_v36, %s4748_s26 }
 0xa6d   :  { %3263 = vrot.lane.b32.xlu0 %v5373_v28, %s4748_s26 }
 0xa6f   :  { %3170 = vrot.lane.b32.xlu1 %v2668_v39, %s4747_s1 }
 0xa71   :  { %3274 = vrot.lane.b32.xlu0 %v5410_v35, %s4748_s26 }
 0xa73   :  { %3265 = vrot.lane.b32.xlu1 %v5367_v48, %s4748_s26 }
 0xa77   :  { %3261 = vrot.lane.b32.xlu1 %v5380_v10, %s4748_s26 }
 0xa92   :  { %v2906_v57 = vpop.permute.xlu1 %2905  ;;  %v2904_v3 = vpop.permute.xlu0 %2903 }
 0xa93   :  { %4209 = vmatprep.subr.mxu0 %v2906_v57 }
 0xa94   :  { %4210 = vmatpush3.msra.mxu0 %v2906_v57 }
 0xa95   :  { %4211 = vmatprep.subr.mxu0 %v2904_v3 }
 0xa96   :  { %v2995_v46 = vpop.permute.xlu1 %2994  ;;  %4212 = vmatpush3.msra.mxu0 %v2904_v3  ;;  %v2993_v28 = vpop.permute.xlu0 %2992 }
 0xa97   :  { %4216 = vmatprep.subr.mxu0 %v2995_v46 }
 0xa9c   :  { %v3084_v36 = vpop.permute.xlu1 %3083 }
 0xa9d   :  { %4223 = vmatprep.subr.mxu1 %v3084_v36 }
 0xa9e   :  { %4224 = vmatpush3.msra.mxu1 %v3084_v36 }
 0xaa0   :  { %v3082_v48 = vpop.permute.xlu1 %3081 }
 0xaa1   :  { %4225 = vmatprep.subr.mxu1 %v3082_v48 }
 0xaa2   :  { %4226 = vmatpush3.msra.mxu1 %v3082_v48 }
 0xacc   :  { %v2653_v8 = vpop.xlane.xlu0 %2652 }
 0xad0   :  { %v2878_v10 = vpop.xlane.xlu0 %2877 }
 0xad4   :  { %v2884_v13 = vpop.xlane.xlu0 %2883 }
 0xad8   :  { %v2881_v19 = vpop.xlane.xlu0 %2880 }
 0xadb   :  { %v2647_v34 = vpop.xlane.xlu1 %2646 }
 0xadc   :  { %4677 = vrcp.f32 %v2647_v34  ;;  %v3173_v15 = vpop.permute.xlu0 %3172 }
 0xadf   :  { %v2644_v35 = vpop.xlane.xlu1 %2643 }
 0xae0   :  { %4679 = vrcp.f32 %v2644_v35  ;;  %v3268_v14 = vpop.permute.xlu0 %3267 }
 0xae1   :  { %4681 = vrcp.f32 %v2878_v10 }
 0xae2   :  { %4683 = vrcp.f32 %v2881_v19 }
 0xae3   :  { %v2650_v62 = vpop.xlane.xlu1 %2649 }
 0xae4   :  { %v3264_v33 = vpop.permute.xlu0 %3263 }
 0xae7   :  { %v2875_v5 = vpop.xlane.xlu1 %2874 }
 0xae8   :  { %4685 = vrcp.f32 %v2875_v5 }
 0xae9   :  { %4687 = vrcp.f32 %v2884_v13  ;;  %v4678_v54 = vpop.eup %4677 }
 0xaea   :  { %4689 = vrcp.f32 %v2650_v62  ;;  %v2659_v29 = vmul.f32 %v4678_v54, %v4670_v55 }
 0xaeb   :  { %4691 = vrcp.f32 %v2653_v8  ;;  %v3171_v20 = vpop.permute.xlu1 %3170 }
 0xaed   :  { %v4680_v7 = vpop.eup %4679 }
 0xaee   :  { %v2658_v16 = vmul.f32 %v4680_v7, %v4672_v30  ;;  %v4682_v50 = vpop.eup %4681 }
 0xaef   :  { %v4684_v58 = vpop.eup %4683  ;;  %v2890_v17 = vmul.f32 %v4682_v50, %v5530_v4  ;;  %v3266_v6 = vpop.permute.xlu1 %3265 }
 0xaf0   :  { %4227 = vmatprep.mubr.msk.f32.mxu1 %vm73_vm2, %v2658_v16  ;;  %v2891_v21 = vmul.f32 %v4684_v58, %v5539_v53  ;;  %v3275_v53 = vpop.permute.xlu0 %3274 }
 0xaf1   :  { %4228 = vmatmul.mubr.msk.f32.vlgmr.msra.gmra.mxu1 %vm73_vm2, %v2659_v29 }
 0xaf3   :  { %v3262_v42 = vpop.permute.xlu1 %3261 }
 0xaf5   :  { %v4686_v0 = vpop.eup %4685 }
 0xaf6   :  { %v2889_v47 = vmul.f32 %v4686_v0, %v4676_v52  ;;  %v4688_v56 = vpop.eup %4687 }
 0xaf7   :  { %v4690_v40 = vpop.eup %4689  ;;  %v2892_v31 = vmul.f32 %v4688_v56, %v5535_v41 }
 0xaf8   :  { %4213 = vmatprep.mubr.msk.f32.mxu0 %vm73_vm2, %v2889_v47  ;;  %v4692_v26 = vpop.eup %4691  ;;  %v2660_v12 = vmul.f32 %v4690_v40, %v5545_v1  ;;  %v3451_v40 = vld [vmem:[%s5727_s4 + $0x38] sm:$0xff] }
 0xaf9   :  { %4214 = vmatmul.mubr.msk.f32.vlgmr.msra.gmra.mxu0 %vm73_vm2, %v2890_v17  ;;  %v2661_v49 = vmul.f32 %v4692_v26, %v5525_v59  ;;  %v3449_v26 = vld [vmem:[%s5727_s4 + $0x28] sm:$0xff] }
 0xafa   :  { %4217 = vmatpush3.msra.mxu0 %v2995_v46  ;;  %4220 = vmatprep.mubr.msk.f32.mxu0 %vm73_vm2, %v2891_v21 }
 0xafb   :  { %4218 = vmatprep.subr.mxu0 %v2993_v28 }
 0xafc   :  { %4219 = vmatpush3.msra.mxu0 %v2993_v28 }
 0xafd   :  { %4230 = vmatprep.subr.mxu0 %v3173_v15  ;;  %4221 = vmatmul.mubr.msk.f32.vlgmr.msra.gmra.mxu0 %vm73_vm2, %v2892_v31  ;;  %v3450_v31 = vld [vmem:[%s5727_s4 + $0x30] sm:$0xff] }
 0xafe   :  { %4231 = vmatpush3.msra.mxu0 %v3173_v15  ;;  %4234 = vmatprep.mubr.msk.f32.mxu0 %vm73_vm2, %v2660_v12  ;;  %v3448_v15 = vld [vmem:[%s5727_s4 + $0x20] sm:$0xff] }
 0xaff   :  { %4232 = vmatprep.subr.mxu0 %v3171_v20 }
 0xb00   :  { %4233 = vmatpush3.msra.mxu0 %v3171_v20 }
 0xb01   :  { %4235 = vmatmul.mubr.msk.f32.vlgmr.msra.gmra.mxu0 %vm73_vm2, %v2661_v49  ;;  %4237 = vmatprep.subr.mxu0 %v3268_v14 }
 0xb02   :  { %4238 = vmatpush3.msra.mxu0 %v3268_v14 }
 0xb03   :  { %4239 = vmatprep.subr.mxu0 %v3266_v6 }
 0xb04   :  { %4240 = vmatpush3.msra.mxu0 %v3266_v6 }
 0xb05   :  { %4241 = vmatprep.subr.mxu0 %v3264_v33 }
 0xb06   :  { %4242 = vmatpush3.msra.mxu0 %v3264_v33 }
 0xb07   :  { %4243 = vmatprep.subr.mxu0 %v3262_v42 }
 0xb08   :  { %4244 = vmatpush3.msra.mxu0 %v3262_v42 }
 0xb09   :  { %4251 = vmatprep.subr.mxu0 %v3451_v40 }
 0xbb1   :  { %v4229_v24 = vpop.f32.mrf.mxu1 }
 0xbb3   :  { %v3159_v60 = vpop.f32.mrf.mxu1 }
 0xbb9   :  { %v4215_v44 = vpop.f32.mrf.mxu0 }
 0xbba   :  { %v3165_v4 = vadd.f32 %v4229_v24, %v4215_v44 }
 0xbbb   :  { %v2981_v2 = vpop.f32.mrf.mxu0 }
 0xbbc   :  { %v3160_v59 = vadd.f32 %v3159_v60, %v2981_v2 }
 0xbbd   :  { %v4222_v18 = vpop.f32.mrf.mxu0 }
 0xbbe   :  { %4245 = vmatprep.mubr.msk.f32.mxu0 %vm2205_vm10, %v3160_v59 }
 0xbbf   :  { %v3070_v23 = vpop.f32.mrf.mxu0  ;;  %4246 = vmatmul.mubr.msk.f32.vlgmr.msra.gmra.mxu0 %vm2205_vm10, %v3165_v4  ;;  %v4042_v4 = vld [vmem:[%s5728_s5 + $0x196] ss:$0 sm:$0xff] }
 0xbc0   :  { %4252 = vmatpush3.msra.mxu0 %v3451_v40 }
 0xbc1   :  { %v4236_v32 = vpop.f32.mrf.mxu0  ;;  %4253 = vmatprep.subr.mxu0 %v3450_v31 }
 0xbc2   :  { %v3254_v45 = vadd.f32 %v4236_v32, %v4222_v18  ;;  %4254 = vmatpush3.msra.mxu0 %v3450_v31 }
 0xbc3   :  { %v3248_v41 = vpop.f32.mrf.mxu0  ;;  %4255 = vmatprep.subr.mxu0 %v3449_v26 }
 0xbc4   :  { %v3249_v43 = vadd.f32 %v3248_v41, %v3070_v23  ;;  %4256 = vmatpush3.msra.mxu0 %v3449_v26 }
 0xbc5   :  { %4257 = vmatprep.subr.mxu0 %v3448_v15 }
 0xbc6   :  { %4248 = vmatprep.mubr.msk.f32.mxu0 %vm2205_vm10, %v3249_v43  ;;  %4258 = vmatpush3.msra.mxu0 %v3448_v15 }
 0xbc7   :  { %4249 = vmatmul.mubr.msk.f32.gmra.mxu0 %vm2205_vm10, %v3254_v45 }
 0xc7f   :  { %v4247_v55 = vpop.f32.mrf.mxu0 }
 0xc80   :  { %v3361_v38 = vadd.f32 %v4247_v55, %v3275_v53 }
 0xc81   :  { %v3355_v63 = vpop.f32.mrf.mxu0 }
 0xc82   :  { %v3356_v30 = vadd.f32 %v3355_v63, %v3275_v53  ;;  %v3375_v61 = vadd.f32 %v3361_v38, %v5395_v37 }
 0xc84   :  { %v3381_v1 = vsel %vm2205_vm10, %v3375_v61, 0.0  ;;  %v3374_v9 = vadd.f32 %v3356_v30, %v5391_v25 }
 0xc85   :  { %3382 = vadd.xlane.f32.xlu0 %v3381_v1 }
 0xc86   :  { %v3378_v52 = vsel %vm2205_vm10, %v3374_v9, 0.0 }
 0xc87   :  { %v4250_v51 = vpop.f32.mrf.mxu0  ;;  %3379 = vadd.xlane.f32.xlu1 %v3378_v52 }
 0xc88   :  { %v3371_v11 = vadd.f32 %v4250_v51, %v3275_v53 }
 0xc89   :  { %v3365_v39 = vpop.f32.mrf.mxu0 }
 0xc8a   :  { %v3366_v57 = vadd.f32 %v3365_v39, %v3275_v53  ;;  %v3377_v3 = vadd.f32 %v3371_v11, %v5403_v27  ;;  %v4043_v53 = vld [vmem:[%s5728_s5 + $0x197] ss:$0 sm:$0xff]  ;;  %v3468_v39 = vld [vmem:[%s5728_s5 + $0x178] sm:$0xff] }
 0xc8b   :  { %4265 = vmatprep.subr.mxu1 %v3468_v39 }
 0xc8c   :  { %v3387_v46 = vsel %vm2205_vm10, %v3377_v3, 0.0  ;;  %v3376_v36 = vadd.f32 %v3366_v57, %v5399_v22  ;;  %4266 = vmatpush3.msra.mxu1 %v3468_v39  ;;  %v3467_v57 = vld [vmem:[%s5728_s5 + $0x170] sm:$0xff] }
 0xc8d   :  { %3388 = vadd.xlane.f32.xlu1 %v3387_v46  ;;  %4267 = vmatprep.subr.mxu1 %v3467_v57  ;;  %v3465_v46 = vld [vmem:[%s5728_s5 + $0x160] sm:$0xff] }
 0xc8e   :  { %v3384_v48 = vsel %vm2205_vm10, %v3376_v36, 0.0  ;;  %4268 = vmatpush3.msra.mxu1 %v3467_v57 }
 0xc8f   :  { %3385 = vadd.xlane.f32.xlu0 %v3384_v48  ;;  %v3463_v48 = vld [vmem:[%s5728_s5 + $0x150] sm:$0xff] }
 0xd0e   :  { %v3383_v28 = vpop.xlane.xlu0 %3382 }
 0xd0f   :  { %v3391_v8 = vmul.f32 0.03125, %v3383_v28  ;;  %v3462_v28 = vld [vmem:[%s5728_s5 + $0x148] sm:$0xff] }
 0xd10   :  { %v3380_v10 = vpop.xlane.xlu1 %3379 }
 0xd11   :  { %v3395_v34 = vsub.f32 %v3375_v61, %v3391_v8  ;;  %v3390_v13 = vmul.f32 0.03125, %v3380_v10  ;;  %v3461_v8 = vld [vmem:[%s5728_s5 + $0x140] sm:$0xff]  ;;  %v3460_v10 = vld [vmem:[%s5728_s5 + $0x138] sm:$0xff] }
 0xd13   :  { %v3394_v35 = vsub.f32 %v3374_v9, %v3390_v13  ;;  %v3399_v62 = vmul.f32 %v3395_v34, %v3395_v34  ;;  %v3424_v23 = vmul.f32 %v4042_v4, %v3395_v34  ;;  %v3459_v34 = vld [vmem:[%s5728_s5 + $0x130] sm:$0xff]  ;;  %v3458_v13 = vld [vmem:[%s5728_s5 + $0x128] sm:$0xff] }
 0xd15   :  { %v3405_v19 = vsel %vm2205_vm10, %v3399_v62, 0.0  ;;  %v3398_v5 = vmul.f32 %v3394_v35, %v3394_v35  ;;  %v3423_v32 = vmul.f32 %v4042_v4, %v3394_v35  ;;  %v3457_v35 = vld [vmem:[%s5728_s5 + $0x120] sm:$0xff]  ;;  %v3456_v62 = vld [vmem:[%s5728_s5 + $0x118] sm:$0xff] }
 0xd16   :  { %3406 = vadd.xlane.f32.xlu1 %v3405_v19  ;;  %v3389_v54 = vpop.xlane.xlu1 %3388  ;;  %v3455_v19 = vld [vmem:[%s5728_s5 + $0x110] sm:$0xff] }
 0xd17   :  { %v3393_v7 = vmul.f32 0.03125, %v3389_v54  ;;  %v3402_v16 = vsel %vm2205_vm10, %v3398_v5, 0.0  ;;  %v3454_v5 = vld [vmem:[%s5728_s5 + $0x108] sm:$0xff]  ;;  %v3453_v54 = vld [vmem:[%s5728_s5 + $0x100] sm:$0xff] }
 0xd18   :  { %v3386_v29 = vpop.xlane.xlu0 %3385  ;;  %3403 = vadd.xlane.f32.xlu0 %v3402_v16 }
 0xd19   :  { %v3397_v50 = vsub.f32 %v3377_v3, %v3393_v7  ;;  %v3392_v58 = vmul.f32 0.03125, %v3386_v29  ;;  %v3466_v3 = vld [vmem:[%s5728_s5 + $0x168] sm:$0xff]  ;;  %v4044_v7 = vld [vmem:[%s5727_s4 + $0x41] ss:$0 sm:$0xff] }
 0xd1a   :  { %4269 = vmatprep.subr.mxu1 %v3466_v3 }
 0xd1b   :  { %v3396_v0 = vsub.f32 %v3376_v36, %v3392_v58  ;;  %v3401_v47 = vmul.f32 %v3397_v50, %v3397_v50  ;;  %v3426_v30 = vmul.f32 %v4042_v4, %v3397_v50  ;;  %4270 = vmatpush3.msra.mxu1 %v3466_v3  ;;  %v3464_v36 = vld [vmem:[%s5728_s5 + $0x158] sm:$0xff] }
 0xd1c   :  { %4271 = vmatprep.subr.mxu1 %v3465_v46 }
 0xd1d   :  { %v3411_v17 = vsel %vm2205_vm10, %v3401_v47, 0.0  ;;  %v3400_v56 = vmul.f32 %v3396_v0, %v3396_v0  ;;  %v3425_v61 = vmul.f32 %v4042_v4, %v3396_v0  ;;  %4272 = vmatpush3.msra.mxu1 %v3465_v46 }
 0xd1e   :  { %3412 = vadd.xlane.f32.xlu1 %v3411_v17  ;;  %4273 = vmatprep.subr.mxu1 %v3464_v36 }
 0xd1f   :  { %v3408_v21 = vsel %vm2205_vm10, %v3400_v56, 0.0  ;;  %4274 = vmatpush3.msra.mxu1 %v3464_v36 }
 0xd20   :  { %3409 = vadd.xlane.f32.xlu0 %v3408_v21  ;;  %4275 = vmatprep.subr.mxu1 %v3463_v48 }
 0xd21   :  { %4276 = vmatpush3.msra.mxu1 %v3463_v48  ;;  %v4049_v48 = vld [vmem:[%s5728_s5 + $0x198] ss:$0 sm:$0xff] }
 0xd22   :  { %4277 = vmatprep.subr.mxu1 %v3462_v28 }
 0xd23   :  { %4278 = vmatpush3.msra.mxu1 %v3462_v28 }
 0xd24   :  { %4279 = vmatprep.subr.mxu1 %v3461_v8 }
 0xd25   :  { %4280 = vmatpush3.msra.mxu1 %v3461_v8 }
 0xd26   :  { %4281 = vmatprep.subr.mxu1 %v3460_v10 }
 0xd27   :  { %4282 = vmatpush3.msra.mxu1 %v3460_v10 }
 0xd28   :  { %4283 = vmatprep.subr.mxu1 %v3459_v34 }
 0xd29   :  { %4284 = vmatpush3.msra.mxu1 %v3459_v34 }
 0xd2a   :  { %4285 = vmatprep.subr.mxu1 %v3458_v13 }
 0xd2b   :  { %4286 = vmatpush3.msra.mxu1 %v3458_v13 }
 0xd2c   :  { %4287 = vmatprep.subr.mxu1 %v3457_v35 }
 0xd2d   :  { %4288 = vmatpush3.msra.mxu1 %v3457_v35 }
 0xd2e   :  { %4289 = vmatprep.subr.mxu1 %v3456_v62 }
 0xd2f   :  { %4290 = vmatpush3.msra.mxu1 %v3456_v62 }
 0xd30   :  { %4291 = vmatprep.subr.mxu1 %v3455_v19 }
 0xd31   :  { %4292 = vmatpush3.msra.mxu1 %v3455_v19 }
 0xd32   :  { %4293 = vmatprep.subr.mxu1 %v3454_v5 }
 0xd33   :  { %4294 = vmatpush3.msra.mxu1 %v3454_v5 }
 0xd34   :  { %4295 = vmatprep.subr.mxu1 %v3453_v54 }
 0xd35   :  { %4296 = vmatpush3.msra.mxu1 %v3453_v54 }
 0xd9f   :  { %v3407_v12 = vpop.xlane.xlu1 %3406 }
 0xda0   :  { %v3415_v20 = vmul.f32 0.03125, %v3407_v12 }
 0xda1   :  { %v3404_v49 = vpop.xlane.xlu0 %3403 }
 0xda2   :  { %v3428_v14 = vadd.f32 1e-12, %v3415_v20  ;;  %v3414_v6 = vmul.f32 0.03125, %v3404_v49 }
 0xda4   :  { %4693 = vrsqrt.f32 %v3428_v14  ;;  %v3427_v33 = vadd.f32 1e-12, %v3414_v6 }
 0xda6   :  { %4695 = vrsqrt.f32 %v3427_v33 }
 0xda7   :  { %v3413_v42 = vpop.xlane.xlu1 %3412 }
 0xda8   :  { %v3417_v24 = vmul.f32 0.03125, %v3413_v42 }
 0xda9   :  { %v3410_v44 = vpop.xlane.xlu0 %3409 }
 0xdaa   :  { %v3430_v60 = vadd.f32 1e-12, %v3417_v24  ;;  %v3416_v2 = vmul.f32 0.03125, %v3410_v44 }
 0xdac   :  { %4697 = vrsqrt.f32 %v3430_v60  ;;  %v3429_v59 = vadd.f32 1e-12, %v3416_v2 }
 0xdae   :  { %4699 = vrsqrt.f32 %v3429_v59 }
 0xdb1   :  { %v4694_v18 = vpop.eup %4693 }
 0xdb2   :  { %v3436_v43 = vmul.f32 %v4694_v18, %v3424_v23 }
 0xdb3   :  { %v4696_v41 = vpop.eup %4695 }
 0xdb4   :  { %v3435_v45 = vmul.f32 %v4696_v41, %v3423_v32  ;;  %v5613_v38 = vadd.f32 %v4043_v53, %v3436_v43 }
 0xdb6   :  { %v5611_v55 = vadd.f32 %v4043_v53, %v3435_v45 }
 0xdb8   :  { %4259 = vmatprep.mubr.msk.f32.mxu0 %vm2205_vm10, %v5611_v55 }
 0xdb9   :  { %v4698_v63 = vpop.eup %4697  ;;  %4260 = vmatmul.mubr.msk.f32.vlgmr.msra.gmra.mxu0 %vm2205_vm10, %v5613_v38 }
 0xdba   :  { %v3438_v9 = vmul.f32 %v4698_v63, %v3426_v30 }
 0xdbb   :  { %v4700_v1 = vpop.eup %4699 }
 0xdbc   :  { %v3437_v52 = vmul.f32 %v4700_v1, %v3425_v61  ;;  %v5621_v11 = vadd.f32 %v4043_v53, %v3438_v9 }
 0xdbe   :  { %v5619_v51 = vadd.f32 %v4043_v53, %v3437_v52 }
 0xdc0   :  { %4262 = vmatprep.mubr.msk.f32.mxu0 %vm2205_vm10, %v5619_v51 }
 0xdc1   :  { %4263 = vmatmul.mubr.msk.f32.gmra.mxu0 %vm2205_vm10, %v5621_v11 }
 0xe79   :  { %v4261_v16 = vpop.f32.mrf.mxu0 }
 0xe7a   :  { %v3557_v29 = vadd.f32 %v4261_v16, %v4044_v7 }
 0xe7b   :  { %v3551_v50 = vpop.f32.mrf.mxu0 }
 0xe7c   :  { %v3571_v58 = vmul.f32 %v3557_v29, %v3557_v29  ;;  %v3552_v0 = vadd.f32 %v4044_v7, %v3551_v50 }
 0xe7e   :  { %v3575_v47 = vmul.f32 %v3571_v58, %v3557_v29  ;;  %v3570_v17 = vmul.f32 %v3552_v0, %v3552_v0 }
 0xe80   :  { %v3579_v56 = vmul.f32 0.044715, %v3575_v47  ;;  %v3574_v21 = vmul.f32 %v3570_v17, %v3552_v0 }
 0xe81   :  { %v4264_v40 = vpop.f32.mrf.mxu0 }
 0xe82   :  { %v3583_v31 = vadd.f32 %v3579_v56, %v3557_v29  ;;  %v3578_v26 = vmul.f32 0.044715, %v3574_v21  ;;  %v3567_v15 = vadd.f32 %v4264_v40, %v4044_v7 }
 0xe83   :  { %v3561_v12 = vpop.f32.mrf.mxu0 }
 0xe84   :  { %v3587_v20 = vmul.f32 0.7978846, %v3583_v31  ;;  %v3582_v49 = vadd.f32 %v3578_v26, %v3552_v0  ;;  %v3573_v14 = vmul.f32 %v3567_v15, %v3567_v15  ;;  %v3562_v6 = vadd.f32 %v4044_v7, %v3561_v12 }
 0xe86   :  { %4701 = vtanh.f32 %v3587_v20  ;;  %v3586_v33 = vmul.f32 0.7978846, %v3582_v49  ;;  %v3577_v42 = vmul.f32 %v3573_v14, %v3567_v15  ;;  %v3572_v24 = vmul.f32 %v3562_v6, %v3562_v6 }
 0xe88   :  { %4703 = vtanh.f32 %v3586_v33  ;;  %v3581_v44 = vmul.f32 0.044715, %v3577_v42  ;;  %v3576_v60 = vmul.f32 %v3572_v24, %v3562_v6 }
 0xe8a   :  { %v3585_v2 = vadd.f32 %v3581_v44, %v3567_v15  ;;  %v3580_v59 = vmul.f32 0.044715, %v3576_v60 }
 0xe8c   :  { %v3589_v4 = vmul.f32 0.7978846, %v3585_v2  ;;  %v3584_v18 = vadd.f32 %v3580_v59, %v3562_v6 }
 0xe8e   :  { %4705 = vtanh.f32 %v3589_v4  ;;  %v3588_v23 = vmul.f32 0.7978846, %v3584_v18 }
 0xe90   :  { %4707 = vtanh.f32 %v3588_v23 }
 0xe93   :  { %v4702_v32 = vpop.eup %4701 }
 0xe94   :  { %v3595_v41 = vadd.f32 1.0, %v4702_v32 }
 0xe95   :  { %v4704_v43 = vpop.eup %4703 }
 0xe96   :  { %v3594_v45 = vadd.f32 1.0, %v4704_v43  ;;  %v3599_v53 = vmul.f32 0.5, %v3595_v41 }
 0xe98   :  { %v3598_v63 = vmul.f32 0.5, %v3594_v45  ;;  %v3603_v1 = vmul.f32 %v3599_v53, %v3557_v29 }
 0xe9a   :  { %v3602_v30 = vmul.f32 %v3598_v63, %v3552_v0  ;;  %v4050_v63 = vld [vmem:[%s5728_s5 + $0x199] ss:$0 sm:$0xff] }
 0xe9b   :  { %v4706_v61 = vpop.eup %4705 }
 0xe9c   :  { %4297 = vmatprep.mubr.f32.mxu1 %v3602_v30  ;;  %v3597_v9 = vadd.f32 1.0, %v4706_v61 }
 0xe9d   :  { %v4708_v52 = vpop.eup %4707  ;;  %4298 = vmatmul.mubr.f32.vlgmr.msra.gmra.mxu1 %v3603_v1  ;;  %v4051_v1 = vld [vmem:[%s5728_s5 + $0x19a] ss:$0 sm:$0xff] }
 0xe9e   :  { %v3596_v39 = vadd.f32 1.0, %v4708_v52  ;;  %v3601_v57 = vmul.f32 0.5, %v3597_v9 }
 0xea0   :  { %v3600_v3 = vmul.f32 0.5, %v3596_v39  ;;  %v3605_v36 = vmul.f32 %v3601_v57, %v3567_v15 }
 0xea2   :  { %v3604_v46 = vmul.f32 %v3600_v3, %v3562_v6 }
 0xea4   :  { %4300 = vmatprep.mubr.f32.mxu1 %v3604_v46 }
 0xea5   :  { %4301 = vmatmul.mubr.f32.gmra.mxu1 %v3605_v36 }
 0xf5d   :  { %v4299_v28 = vpop.f32.mrf.mxu1 }
 0xf5e   :  { %v3683_v8 = vadd.f32 %v4299_v28, %v4049_v48 }
 0xf5f   :  { %v3677_v10 = vpop.f32.mrf.mxu1 }
 0xf60   :  { %v3678_v34 = vadd.f32 %v4049_v48, %v3677_v10  ;;  %v3697_v13 = vadd.f32 %v3683_v8, %v5613_v38 }
 0xf62   :  { %v3703_v35 = vsel %vm2205_vm10, %v3697_v13, 0.0  ;;  %v3696_v62 = vadd.f32 %v3678_v34, %v5611_v55 }
 0xf63   :  { %3704 = vadd.xlane.f32.xlu1 %v3703_v35 }
 0xf64   :  { %v3700_v19 = vsel %vm2205_vm10, %v3696_v62, 0.0 }
 0xf65   :  { %3701 = vadd.xlane.f32.xlu0 %v3700_v19  ;;  %v4302_v5 = vpop.f32.mrf.mxu1 }
 0xf66   :  { %v3693_v54 = vadd.f32 %v4302_v5, %v4049_v48 }
 0xf67   :  { %v3687_v7 = vpop.f32.mrf.mxu1 }
 0xf68   :  { %v3688_v16 = vadd.f32 %v4049_v48, %v3687_v7  ;;  %v3699_v29 = vadd.f32 %v3693_v54, %v5621_v11 }
 0xf6a   :  { %v3709_v50 = vsel %vm2205_vm10, %v3699_v29, 0.0  ;;  %v3698_v58 = vadd.f32 %v3688_v16, %v5619_v51 }
 0xf6b   :  { %3710 = vadd.xlane.f32.xlu1 %v3709_v50 }
 0xf6c   :  { %v3706_v38 = vsel %vm2205_vm10, %v3698_v58, 0.0 }
 0xf6d   :  { %3707 = vadd.xlane.f32.xlu0 %v3706_v38 }
 0xfec   :  { %v3705_v0 = vpop.xlane.xlu1 %3704 }
 0xfed   :  { %v3713_v55 = vmul.f32 0.03125, %v3705_v0 }
 0xfee   :  { %v3702_v47 = vpop.xlane.xlu0 %3701 }
 0xfef   :  { %v3717_v17 = vsub.f32 %v3697_v13, %v3713_v55  ;;  %v3712_v56 = vmul.f32 0.03125, %v3702_v47 }
 0xff1   :  { %v3716_v21 = vsub.f32 %v3696_v62, %v3712_v56  ;;  %v3721_v40 = vmul.f32 %v3717_v17, %v3717_v17  ;;  %v3746_v30 = vmul.f32 %v4050_v63, %v3717_v17 }
 0xff3   :  { %v3727_v31 = vsel %vm2205_vm10, %v3721_v40, 0.0  ;;  %v3720_v26 = vmul.f32 %v3716_v21, %v3716_v21  ;;  %v3745_v9 = vmul.f32 %v4050_v63, %v3716_v21 }
 0xff4   :  { %3728 = vadd.xlane.f32.xlu1 %v3727_v31  ;;  %v3711_v11 = vpop.xlane.xlu1 %3710 }
 0xff5   :  { %v3715_v15 = vmul.f32 0.03125, %v3711_v11  ;;  %v3724_v12 = vsel %vm2205_vm10, %v3720_v26, 0.0 }
 0xff6   :  { %3725 = vadd.xlane.f32.xlu0 %v3724_v12  ;;  %v3708_v51 = vpop.xlane.xlu0 %3707 }
 0xff7   :  { %v3719_v20 = vsub.f32 %v3699_v29, %v3715_v15  ;;  %v3714_v49 = vmul.f32 0.03125, %v3708_v51 }
 0xff9   :  { %v3718_v14 = vsub.f32 %v3698_v58, %v3714_v49  ;;  %v3723_v6 = vmul.f32 %v3719_v20, %v3719_v20  ;;  %v3748_v36 = vmul.f32 %v4050_v63, %v3719_v20 }
 0xffb   :  { %v3733_v33 = vsel %vm2205_vm10, %v3723_v6, 0.0  ;;  %v3722_v42 = vmul.f32 %v3718_v14, %v3718_v14  ;;  %v3747_v28 = vmul.f32 %v4050_v63, %v3718_v14 }
 0xffc   :  { %3734 = vadd.xlane.f32.xlu1 %v3733_v33 }
 0xffd   :  { %v3730_v24 = vsel %vm2205_vm10, %v3722_v42, 0.0 }
 0xffe   :  { %3731 = vadd.xlane.f32.xlu0 %v3730_v24 }
0x107d   :  { %v3729_v44 = vpop.xlane.xlu1 %3728 }
0x107e   :  { %v3737_v60 = vmul.f32 0.03125, %v3729_v44 }
0x107f   :  { %v3726_v2 = vpop.xlane.xlu0 %3725 }
0x1080   :  { %v3750_v59 = vadd.f32 1e-12, %v3737_v60  ;;  %v3736_v4 = vmul.f32 0.03125, %v3726_v2 }
0x1082   :  { %4709 = vrsqrt.f32 %v3750_v59  ;;  %v3749_v18 = vadd.f32 1e-12, %v3736_v4 }
0x1084   :  { %4711 = vrsqrt.f32 %v3749_v18 }
0x1085   :  { %v3735_v23 = vpop.xlane.xlu1 %3734 }
0x1086   :  { %v3739_v32 = vmul.f32 0.03125, %v3735_v23 }
0x1087   :  { %v3732_v41 = vpop.xlane.xlu0 %3731 }
0x1088   :  { %v3752_v43 = vadd.f32 1e-12, %v3739_v32  ;;  %v3738_v45 = vmul.f32 0.03125, %v3732_v41 }
0x108a   :  { %4713 = vrsqrt.f32 %v3752_v43  ;;  %v3751_v53 = vadd.f32 1e-12, %v3738_v45 }
0x108c   :  { %4715 = vrsqrt.f32 %v3751_v53 }
0x108f   :  { %v4710_v61 = vpop.eup %4709 }
0x1090   :  { %v3758_v52 = vmul.f32 %v4710_v61, %v3746_v30 }
0x1091   :  { %v4712_v39 = vpop.eup %4711 }
0x1092   :  { %v3767_v57 = vadd.f32 %v4051_v1, %v3758_v52  ;;  %v3757_v3 = vmul.f32 %v4712_v39, %v3745_v9 }
0x1094   :  { %3776 = vrot.lane.b32.xlu1 %v3767_v57, %s4748_s26  ;;  %v3766_v46 = vadd.f32 %v4051_v1, %v3757_v3 }
0x1096   :  { %3774 = vrot.lane.b32.xlu0 %v3766_v46, %s4748_s26 }
0x1097   :  { %v4714_v48 = vpop.eup %4713 }
0x1098   :  { %v3760_v8 = vmul.f32 %v4714_v48, %v3748_v36 }
0x1099   :  { %v4716_v10 = vpop.eup %4715 }
0x109a   :  { %v3769_v34 = vadd.f32 %v4051_v1, %v3760_v8  ;;  %v3759_v13 = vmul.f32 %v4716_v10, %v3747_v28 }
0x109c   :  { %3780 = vrot.lane.b32.xlu0 %v3769_v34, %s4748_s26  ;;  %v3768_v35 = vadd.f32 %v4051_v1, %v3759_v13 }
0x109e   :  { %3778 = vrot.lane.b32.xlu1 %v3768_v35, %s4748_s26 }
0x1106   :  { %v3777_v62 = vpop.permute.xlu1 %3776 }
0x1107   :  { %v3787_v19 = vsel %vm2205_vm10, %v5395_v37, %v3777_v62 }
0x1108   :  { %v3792_v5 = vsel %vm3790_vm1, %v3787_v19, 0.0  ;;  %v3775_v54 = vpop.permute.xlu0 %3774 }
0x1109   :  { %3796 = vst [vmem:[%s5729_s6 + $0x8] sm:$0x1] %v3792_v5  ;;  %v3786_v7 = vsel %vm2205_vm10, %v5391_v25, %v3775_v54 }
0x110a   :  { %v3791_v16 = vsel %vm3790_vm1, %v3786_v7, 0.0 }
0x110b   :  { %3795 = vst [vmem:[%s5729_s6] sm:$0xff] %v3791_v16 }
0x110e   :  { %v3781_v29 = vpop.permute.xlu0 %3780 }
0x110f   :  { %v3789_v50 = vsel %vm2205_vm10, %v5403_v27, %v3781_v29 }
0x1110   :  { %v3794_v58 = vsel %vm3790_vm1, %v3789_v50, 0.0  ;;  %v3779_v37 = vpop.permute.xlu1 %3778 }
0x1111   :  { %3798 = vst [vmem:[%s5729_s6 + $0x18] sm:$0x1] %v3794_v58  ;;  %v3788_v38 = vsel %vm2205_vm10, %v5399_v22, %v3779_v37 }
0x1112   :  { %v3793_v0 = vsel %vm3790_vm1, %v3788_v38, 0.0 }
0x1113   :  { %3797 = vst [vmem:[%s5729_s6 + $0x10] sm:$0xff] %v3793_v0 }
0x1114   :  { %3803 = vsyncpa [#allocation3], 1 }

</bundles_post_ra>
